<compile_context>
chip_gen: v7x
topology: tpu7x:2x2x1
jax: 0.10.0
libtpu: 0.0.40
codegen_flags: <defaults>
</compile_context>

<pallas_src>
import math

import jax
import jax.numpy as jnp
from jax import lax
from jax.experimental import pallas as pl
from jax.experimental.pallas import tpu as pltpu


def _softplus(x):
    # numerically stable softplus: one exp + one log on the EUP
    return jnp.maximum(x, 0.0) + jnp.log(1.0 + jnp.exp(-jnp.abs(x)))


def _rmsnorm(x, gamma, scale):
    # torch: F.normalize(x, dim=-1) * sqrt(D) * (gamma + 1), eps = 1e-12
    ss = jnp.sum(x * x, axis=-1, keepdims=True)
    inv = lax.rsqrt(jnp.maximum(ss, 1e-24))        # == 1 / max(||x||, 1e-12)
    return x * (inv * scale) * (gamma + 1.0)


def make_fused_kernel(seq_len):
    """Kernel body for the whole L-layer network; seq_len is a static closure."""
    assert seq_len & (seq_len - 1) == 0, "seq_len must be a power of two"
    shifts = []
    d = 1
    while d < seq_len:
        shifts.append(d)
        d *= 2

    def kernel(x0_ref, lab_ref, g1_ref, whg_ref, w1_ref, b1_ref, w2_ref,
               b2_ref, g2_ref, wlog_ref, embn_ref, logits_ref, loss_ref,
               act_ref):
        l = pl.program_id(1)
        n_layers = pl.num_programs(1)
        R, D = act_ref.shape
        V = wlog_ref.shape[1]
        scale = float(D) ** 0.5

        # ---- layer 0: load the embedded tokens, zero the loss accumulator ----
        @pl.when(l == 0)
        def _():
            act_ref[...] = x0_ref[...]
            loss_ref[...] = jnp.zeros_like(loss_ref)

        x = act_ref[...]                                   # (R, D) f32
        xn = _rmsnorm(x, g1_ref[...], scale)               # RMSNorm #1
        xn_b = xn.astype(jnp.bfloat16)

        # ---- fused minGRU projection: one bf16 MXU matmul (D -> 2D) ----------
        hg = jnp.dot(xn_b, whg_ref[...], preferred_element_type=jnp.float32)
        hidden = hg[:, :D]                                 # to_hidden
        gate = hg[:, D:]                                   # to_gate

        # log-space quantities (f32); log_z via softplus identity (saves one
        # softplus), log_g(hidden) with a single exp + single log.
        log_coeffs = -_softplus(gate)                      # log(1 - z)
        log_z = gate + log_coeffs                          # == -softplus(-gate)
        u = jnp.exp(-jnp.abs(hidden))
        log_tilde_h = jnp.where(hidden >= 0.0,
                                jnp.log(jnp.maximum(hidden, 0.0) + 0.5),
                                hidden - jnp.log(1.0 + u))  # == -softplus(-h)
        log_values = log_z + log_tilde_h

        # ---- heinsen scan: masked Hillis-Steele segment cumsums (f32, XLU) ---
        row = lax.broadcasted_iota(jnp.int32, (R, 1), 0)
        row_in_seq = jnp.bitwise_and(row, seq_len - 1)      # row % seq_len
        masks = [row_in_seq >= s for s in shifts]

        def seg_cumsum(vals):
            # inclusive prefix sum along rows, independently per seq_len segment
            for s, msk in zip(shifts, masks):
                shifted = pltpu.roll(vals, shift=s, axis=0)  # out[i] = in[i-s]
                vals = vals + jnp.where(msk, shifted, 0.0)
            return vals

        a_star = seg_cumsum(log_coeffs)                     # cumsum log_coeffs
        v = log_values - a_star
        m = jnp.max(v, axis=0, keepdims=True)               # per-feature stabilizer
        e = jnp.exp(v - m)
        cs = seg_cumsum(e)                                  # cumsum exp(v - m)
        gru = jnp.exp(a_star + m + jnp.log(jnp.maximum(cs, 1e-30)))  # h_t

        x1 = gru + xn                                       # residual

        # ---- FeedForward: Linear -> exact GELU -> Linear, residual -----------
        h1 = jnp.dot(x1.astype(jnp.bfloat16), w1_ref[...],
                     preferred_element_type=jnp.float32) + b1_ref[...]
        h1 = 0.5 * h1 * (1.0 + lax.erf(h1 * (1.0 / math.sqrt(2.0))))
        h2 = jnp.dot(h1.astype(jnp.bfloat16), w2_ref[...],
                     preferred_element_type=jnp.float32) + b2_ref[...]
        x2 = h2 + x1

        # ---- final RMSNorm + logits projection --------------------------------
        xn2 = _rmsnorm(x2, g2_ref[...], scale)
        logits = jnp.dot(xn2.astype(jnp.bfloat16), wlog_ref[...],
                         preferred_element_type=jnp.float32)          # (R, V)

        # ---- cross entropy partial sum (no materialized one-hot) --------------
        lab = lab_ref[...]                                             # (R, 1) int32
        vio = lax.broadcasted_iota(jnp.int32, (R, V), 1)
        picked = jnp.sum(jnp.where(vio == lab, logits, 0.0),
                         axis=-1, keepdims=True)                       # (R, 1)
        mx = jnp.max(logits, axis=-1, keepdims=True)
        lse = mx + jnp.log(jnp.sum(jnp.exp(logits - mx),
                                   axis=-1, keepdims=True))
        part = jnp.sum(lse - picked, axis=0, keepdims=True)            # (1, 1)
        loss_ref[...] += part                                          # lane-dense tile

        # ---- epilogue: emit logits (last layer) or re-embed argmax ------------
        @pl.when(l == n_layers - 1)
        def _():
            logits_ref[...] = logits

        @pl.when(l < n_layers - 1)
        def _():
            # first-match argmax (torch semantics) -> one-hot -> next-layer emb
            vio_f = vio.astype(jnp.float32)
            ids = jnp.min(jnp.where(logits >= mx, vio_f, jnp.float32(V)),
                          axis=-1, keepdims=True)                      # (R, 1)
            onehot = (vio_f == ids).astype(jnp.bfloat16)                # (R, V)
            act_ref[...] = jnp.dot(onehot, embn_ref[...],
                                   preferred_element_type=jnp.float32)  # (R, D)

    return kernel


def mingru_lm_forward(token_ids, labels, params, *, block_b=8):
    B, S = token_ids.shape
    emb = params["emb"]                                   # (L, V, D) f32
    L, V, D = emb.shape
    assert S & (S - 1) == 0                               # TODO(synk): general S
    R = block_b * S
    BS = B * S
    assert BS % R == 0
    G = BS // R                                           # keep even for v7x 2-TC

    # layer-0 embedding gather (exact f32 rows), done once on the host side
    x0 = jnp.take(emb[0], token_ids.reshape(-1), axis=0)  # (BS, D) f32
    labels2d = labels.reshape(BS, 1).astype(jnp.int32)
    # table used to re-embed layer l's argmax for layer l+1 (last slot unused)
    emb_next = jnp.concatenate([emb[1:], emb[-1:]], axis=0).astype(jnp.bfloat16)

    def row_spec(cols):
        return pl.BlockSpec((R, cols), lambda g, l: (g, 0))

    def layer_spec(shape):    # stacked per-layer weight, leading L dim squeezed
        return pl.BlockSpec((None,) + shape, lambda g, l: (l, 0, 0))

    in_specs = [
        row_spec(D),                       # x0 (layer-0 activations)
        row_spec(1),                       # labels
        layer_spec((1, D)),                # rms_norm gamma
        layer_spec((D, 2 * D)),            # fused [to_hidden | to_gate]  (bf16)
        layer_spec((D, 4 * D)),            # ff linear1 W                 (bf16)
        layer_spec((1, 4 * D)),            # ff linear1 b
        layer_spec((4 * D, D)),            # ff linear2 W                 (bf16)
        layer_spec((1, D)),                # ff linear2 b
        layer_spec((1, D)),                # final norm gamma
        layer_spec((D, V)),                # to_logits W                  (bf16)
        layer_spec((V, D)),                # next layer embedding         (bf16)
    ]
    out_specs = (
        pl.BlockSpec((R, V), lambda g, l: (g, 0)),            # last-layer logits
        pl.BlockSpec((None, 8, 128), lambda g, l: (g, 0, 0)),  # loss partials
    )
    out_shape = (
        jax.ShapeDtypeStruct((BS, V), jnp.float32),
        jax.ShapeDtypeStruct((G, 8, 128), jnp.float32),
    )

    # advisory cost hint
    flops = 2 * BS * L * D * (10 * D + 2 * V)
    transcendentals = BS * L * (11 * D + V)
    bytes_accessed = (G * L * ((10 * D * D + 2 * D * V) * 2 + (R * D + R) * 4)
                      + BS * V * 4 + G * 8 * 128 * 4)

    logits, loss_part = pl.pallas_call(
        make_fused_kernel(S),
        grid=(G, L),
        in_specs=in_specs,
        out_specs=out_specs,
        out_shape=out_shape,
        scratch_shapes=[pltpu.VMEM((R, D), jnp.float32)],   # layer activation
        compiler_params=pltpu.CompilerParams(
            dimension_semantics=("parallel", "arbitrary")),
        cost_estimate=pl.CostEstimate(flops=flops,
                                      transcendentals=transcendentals,
                                      bytes_accessed=bytes_accessed),
    )(x0, labels2d, params["gamma1"], params["whg"], params["w1"],
      params["b1"], params["w2"], params["b2"], params["gamma2"],
      params["w_logits"], emb_next)

    # loss_part[g, :, :] is the scalar partial broadcast across a (8,128) tile
    total_loss = jnp.sum(loss_part[:, 0, 0]) / BS / L
    return total_loss, logits.reshape(B, S, V)


def init_params(key, dim, num_tokens, num_layers):
    ks = jax.random.split(key, 5)
    s = 0.02
    L, D, V = num_layers, dim, num_tokens

    def w(k, shape):  # matmul weights stored as (in, out) in bf16
        return (jax.random.normal(k, shape, jnp.float32) * s).astype(jnp.bfloat16)

    return {
        "emb": jax.random.normal(ks[0], (L, V, D), jnp.float32) * s,
        "gamma1": jnp.zeros((L, 1, D), jnp.float32),       # RMSNorm gamma (zeros)
        "whg": w(ks[1], (L, D, 2 * D)),                    # [to_hidden | to_gate]
        "w1": w(ks[2], (L, D, 4 * D)),
        "b1": jnp.zeros((L, 1, 4 * D), jnp.float32),
        "w2": w(ks[3], (L, 4 * D, D)),
        "b2": jnp.zeros((L, 1, D), jnp.float32),
        "gamma2": jnp.zeros((L, 1, D), jnp.float32),
        "w_logits": w(ks[4], (L, D, V)),
    }


if __name__ == "__main__":
    # small, lane-aligned shapes: batch=16, seq=16, dim=128, vocab=256, 2 layers
    B, S, D, V, L = 16, 16, 128, 256, 2

    key = jax.random.PRNGKey(0)
    k_tok, k_lab, k_par = jax.random.split(key, 3)
    token_ids = jax.random.randint(k_tok, (B, S), 0, V, dtype=jnp.int32)
    labels = jax.random.randint(k_lab, (B, S), 0, V, dtype=jnp.int32)
    params = init_params(k_par, D, V, L)

    loss, logits = mingru_lm_forward(token_ids, labels, params, block_b=8)
    jax.block_until_ready((loss, logits))
    assert logits.shape == (B, S, V)
    assert bool(jnp.isfinite(loss))
    print("KERNEL_OK")
</pallas_src>

<mosaic_0001>
module attributes {stable_mosaic.version = 11 : i64} {
  func.func @kernel(%arg0: i32, %arg1: i32, %arg2: memref<128x128xf32, #tpu.memory_space<vmem>>, %arg3: memref<128x1xi32, #tpu.memory_space<vmem>>, %arg4: memref<1x1x128xf32, #tpu.memory_space<vmem>>, %arg5: memref<1x128x256xbf16, #tpu.memory_space<vmem>>, %arg6: memref<1x128x512xbf16, #tpu.memory_space<vmem>>, %arg7: memref<1x1x512xf32, #tpu.memory_space<vmem>>, %arg8: memref<1x512x128xbf16, #tpu.memory_space<vmem>>, %arg9: memref<1x1x128xf32, #tpu.memory_space<vmem>>, %arg10: memref<1x1x128xf32, #tpu.memory_space<vmem>>, %arg11: memref<1x128x256xbf16, #tpu.memory_space<vmem>>, %arg12: memref<1x256x128xbf16, #tpu.memory_space<vmem>>, %arg13: memref<128x256xf32, #tpu.memory_space<vmem>>, %arg14: memref<1x8x128xf32, #tpu.memory_space<vmem>>, %arg15: memref<128x128xf32, #tpu.memory_space<vmem>>) attributes {dimension_semantics = [#tpu.dimension_semantics<parallel>, #tpu.dimension_semantics<arbitrary>], iteration_bounds = array<i64: 2, 2>, scalar_prefetch = 0 : i64, scratch_operands = 1 : i64, tpu.core_type = #tpu.core_type<tc>, window_params = [{transform_indices = @transform_0, window_bounds = array<i64: 128, 128>}, {transform_indices = @transform_1, window_bounds = array<i64: 128, 1>}, {transform_indices = @transform_2, window_bounds = array<i64: 1, 1, 128>}, {transform_indices = @transform_3, window_bounds = array<i64: 1, 128, 256>}, {transform_indices = @transform_4, window_bounds = array<i64: 1, 128, 512>}, {transform_indices = @transform_5, window_bounds = array<i64: 1, 1, 512>}, {transform_indices = @transform_6, window_bounds = array<i64: 1, 512, 128>}, {transform_indices = @transform_7, window_bounds = array<i64: 1, 1, 128>}, {transform_indices = @transform_8, window_bounds = array<i64: 1, 1, 128>}, {transform_indices = @transform_9, window_bounds = array<i64: 1, 128, 256>}, {transform_indices = @transform_10, window_bounds = array<i64: 1, 256, 128>}, {transform_indices = @transform_11, window_bounds = array<i64: 128, 256>}, {transform_indices = @transform_12, window_bounds = array<i64: 1, 8, 128>}]} {
    %c0_i32 = arith.constant 0 : i32
    %0 = arith.cmpi eq, %arg1, %c0_i32 : i32
    %1 = arith.extui %0 : i1 to i32
    %c0_i32_0 = arith.constant 0 : i32
    %2 = arith.cmpi ne, %1, %c0_i32_0 : i32
    scf.if %2 {
      %c0_84 = arith.constant 0 : index
      %c0_85 = arith.constant 0 : index
      %207 = vector.load %arg2[%c0_84, %c0_85] : memref<128x128xf32, #tpu.memory_space<vmem>>, vector<128x128xf32>
      %c0_86 = arith.constant 0 : index
      %c0_87 = arith.constant 0 : index
      %208 = vector.load %arg15[%c0_86, %c0_87] : memref<128x128xf32, #tpu.memory_space<vmem>>, vector<128x128xf32>
      tpu.vector_store %arg15[%c0_86, %c0_87], %207 {strides = array<i32>} : memref<128x128xf32, #tpu.memory_space<vmem>>, vector<128x128xf32>,
      %cst_88 = arith.constant 0.000000e+00 : f32
      %209 = vector.broadcast %cst_88 : f32 to vector<8x128xf32>
      %c0_89 = arith.constant 0 : index
      %c0_90 = arith.constant 0 : index
      %c0_91 = arith.constant 0 : index
      %210 = vector.load %arg14[%c0_89, %c0_90, %c0_91] : memref<1x8x128xf32, #tpu.memory_space<vmem>>, vector<1x8x128xf32>
      %211 = vector.shape_cast %210 : vector<1x8x128xf32> to vector<8x128xf32>
      %212 = vector.shape_cast %209 : vector<8x128xf32> to vector<1x8x128xf32>
      tpu.vector_store %arg14[%c0_89, %c0_90, %c0_91], %212 {strides = array<i32>} : memref<1x8x128xf32, #tpu.memory_space<vmem>>, vector<1x8x128xf32>,
    } else {
    }
    %c0 = arith.constant 0 : index
    %c0_1 = arith.constant 0 : index
    %3 = vector.load %arg15[%c0, %c0_1] : memref<128x128xf32, #tpu.memory_space<vmem>>, vector<128x128xf32>
    %c0_2 = arith.constant 0 : index
    %c0_3 = arith.constant 0 : index
    %c0_4 = arith.constant 0 : index
    %4 = vector.load %arg4[%c0_2, %c0_3, %c0_4] : memref<1x1x128xf32, #tpu.memory_space<vmem>>, vector<1x1x128xf32>
    %5 = vector.shape_cast %4 : vector<1x1x128xf32> to vector<1x128xf32>
    %6 = arith.mulf %3, %3 : vector<128x128xf32>
    %cst = arith.constant dense<0.000000e+00> : vector<128xf32>
    %7 = vector.multi_reduction <add>, %6, %cst [1] : vector<128x128xf32> to vector<128xf32>
    %8 = vector.shape_cast %7 : vector<128xf32> to vector<128x1xf32>
    %cst_5 = arith.constant 1.000000e-24 : f32
    %9 = vector.broadcast %cst_5 : f32 to vector<128x1xf32>
    %10 = arith.maximumf %8, %9 : vector<128x1xf32>
    %11 = math.rsqrt %10 : vector<128x1xf32>
    %cst_6 = arith.constant 11.3137083 : f32
    %12 = vector.broadcast %cst_6 : f32 to vector<128x1xf32>
    %13 = arith.mulf %11, %12 : vector<128x1xf32>
    %14 = vector.broadcast %13 : vector<128x1xf32> to vector<128x128xf32>
    %15 = arith.mulf %3, %14 : vector<128x128xf32>
    %cst_7 = arith.constant 1.000000e+00 : f32
    %16 = vector.broadcast %cst_7 : f32 to vector<1x128xf32>
    %17 = arith.addf %5, %16 : vector<1x128xf32>
    %18 = vector.broadcast %17 : vector<1x128xf32> to vector<128x128xf32>
    %19 = arith.mulf %15, %18 : vector<128x128xf32>
    %20 = arith.truncf %19 : vector<128x128xf32> to vector<128x128xbf16>
    %c0_8 = arith.constant 0 : index
    %c0_9 = arith.constant 0 : index
    %c0_10 = arith.constant 0 : index
    %21 = vector.load %arg5[%c0_8, %c0_9, %c0_10] : memref<1x128x256xbf16, #tpu.memory_space<vmem>>, vector<1x128x256xbf16>
    %22 = vector.shape_cast %21 : vector<1x128x256xbf16> to vector<128x256xbf16>
    %cst_11 = arith.constant dense<0.000000e+00> : vector<128x256xf32>
    %23 = tpu.matmul %20, %22, %cst_11 {dimension_numbers = #tpu.dot_dimension_numbers<[1], [0], [0], [1], [0, 0, 1, 1], [], []>} : vector<128x128xbf16>, vector<128x256xbf16>, vector<128x256xf32> -> vector<128x256xf32>
    %24 = vector.extract_strided_slice %23 {offsets = [0, 0], sizes = [128, 128], strides = [1, 1]} : vector<128x256xf32> to vector<128x128xf32>
    %25 = vector.extract_strided_slice %23 {offsets = [0, 128], sizes = [128, 128], strides = [1, 1]} : vector<128x256xf32> to vector<128x128xf32>
    %cst_12 = arith.constant 0.000000e+00 : f32
    %26 = vector.broadcast %cst_12 : f32 to vector<128x128xf32>
    %27 = arith.maximumf %25, %26 : vector<128x128xf32>
    %28 = math.absf %25 : vector<128x128xf32>
    %cst_13 = arith.constant 0.000000e+00 : f32
    %29 = vector.broadcast %cst_13 : f32 to vector<128x128xf32>
    %30 = arith.subf %29, %28 : vector<128x128xf32>
    %31 = math.exp %30 : vector<128x128xf32>
    %cst_14 = arith.constant 1.000000e+00 : f32
    %32 = vector.broadcast %cst_14 : f32 to vector<128x128xf32>
    %33 = arith.addf %32, %31 : vector<128x128xf32>
    %34 = math.log %33 : vector<128x128xf32>
    %35 = arith.addf %27, %34 : vector<128x128xf32>
    %cst_15 = arith.constant 0.000000e+00 : f32
    %36 = vector.broadcast %cst_15 : f32 to vector<128x128xf32>
    %37 = arith.subf %36, %35 : vector<128x128xf32>
    %38 = arith.addf %25, %37 : vector<128x128xf32>
    %39 = math.absf %24 : vector<128x128xf32>
    %cst_16 = arith.constant 0.000000e+00 : f32
    %40 = vector.broadcast %cst_16 : f32 to vector<128x128xf32>
    %41 = arith.subf %40, %39 : vector<128x128xf32>
    %42 = math.exp %41 : vector<128x128xf32>
    %cst_17 = arith.constant 0.000000e+00 : f32
    %43 = vector.broadcast %cst_17 : f32 to vector<128x128xf32>
    %44 = arith.cmpf oge, %24, %43 : vector<128x128xf32>
    %cst_18 = arith.constant 0.000000e+00 : f32
    %45 = vector.broadcast %cst_18 : f32 to vector<128x128xf32>
    %46 = arith.maximumf %24, %45 : vector<128x128xf32>
    %cst_19 = arith.constant 5.000000e-01 : f32
    %47 = vector.broadcast %cst_19 : f32 to vector<128x128xf32>
    %48 = arith.addf %46, %47 : vector<128x128xf32>
    %49 = math.log %48 : vector<128x128xf32>
    %cst_20 = arith.constant 1.000000e+00 : f32
    %50 = vector.broadcast %cst_20 : f32 to vector<128x128xf32>
    %51 = arith.addf %50, %42 : vector<128x128xf32>
    %52 = math.log %51 : vector<128x128xf32>
    %53 = arith.subf %24, %52 : vector<128x128xf32>
    %54 = arith.select %44, %49, %53 : vector<128x128xi1>, vector<128x128xf32>
    %55 = arith.addf %38, %54 : vector<128x128xf32>
    %56 = tpu.iota {dimensions = array<i32: 0>} : vector<128x1xi32>
    %c15_i32 = arith.constant 15 : i32
    %57 = vector.broadcast %c15_i32 : i32 to vector<128x1xi32>
    %58 = arith.andi %56, %57 : vector<128x1xi32>
    %c1_i32 = arith.constant 1 : i32
    %59 = vector.broadcast %c1_i32 : i32 to vector<128x1xi32>
    %60 = arith.cmpi sge, %58, %59 : vector<128x1xi32>
    %c2_i32 = arith.constant 2 : i32
    %61 = vector.broadcast %c2_i32 : i32 to vector<128x1xi32>
    %62 = arith.cmpi sge, %58, %61 : vector<128x1xi32>
    %c4_i32 = arith.constant 4 : i32
    %63 = vector.broadcast %c4_i32 : i32 to vector<128x1xi32>
    %64 = arith.cmpi sge, %58, %63 : vector<128x1xi32>
    %c8_i32 = arith.constant 8 : i32
    %65 = vector.broadcast %c8_i32 : i32 to vector<128x1xi32>
    %66 = arith.cmpi sge, %58, %65 : vector<128x1xi32>
    %c1_i32_21 = arith.constant 1 : i32
    %67 = tpu.dynamic_rotate %37 by %c1_i32_21 dim 0 : vector<128x128xf32>, i32 -> vector<128x128xf32>
    %cst_22 = arith.constant 0.000000e+00 : f32
    %68 = vector.shape_cast %60 : vector<128x1xi1> to vector<128x1xi1>
    %69 = vector.broadcast %68 : vector<128x1xi1> to vector<128x128xi1>
    %70 = vector.broadcast %cst_22 : f32 to vector<128x128xf32>
    %71 = arith.select %69, %67, %70 : vector<128x128xi1>, vector<128x128xf32>
    %72 = arith.addf %37, %71 : vector<128x128xf32>
    %c2_i32_23 = arith.constant 2 : i32
    %73 = tpu.dynamic_rotate %72 by %c2_i32_23 dim 0 : vector<128x128xf32>, i32 -> vector<128x128xf32>
    %cst_24 = arith.constant 0.000000e+00 : f32
    %74 = vector.shape_cast %62 : vector<128x1xi1> to vector<128x1xi1>
    %75 = vector.broadcast %74 : vector<128x1xi1> to vector<128x128xi1>
    %76 = vector.broadcast %cst_24 : f32 to vector<128x128xf32>
    %77 = arith.select %75, %73, %76 : vector<128x128xi1>, vector<128x128xf32>
    %78 = arith.addf %72, %77 : vector<128x128xf32>
    %c4_i32_25 = arith.constant 4 : i32
    %79 = tpu.dynamic_rotate %78 by %c4_i32_25 dim 0 : vector<128x128xf32>, i32 -> vector<128x128xf32>
    %cst_26 = arith.constant 0.000000e+00 : f32
    %80 = vector.shape_cast %64 : vector<128x1xi1> to vector<128x1xi1>
    %81 = vector.broadcast %80 : vector<128x1xi1> to vector<128x128xi1>
    %82 = vector.broadcast %cst_26 : f32 to vector<128x128xf32>
    %83 = arith.select %81, %79, %82 : vector<128x128xi1>, vector<128x128xf32>
    %84 = arith.addf %78, %83 : vector<128x128xf32>
    %c8_i32_27 = arith.constant 8 : i32
    %85 = tpu.dynamic_rotate %84 by %c8_i32_27 dim 0 : vector<128x128xf32>, i32 -> vector<128x128xf32>
    %cst_28 = arith.constant 0.000000e+00 : f32
    %86 = vector.shape_cast %66 : vector<128x1xi1> to vector<128x1xi1>
    %87 = vector.broadcast %86 : vector<128x1xi1> to vector<128x128xi1>
    %88 = vector.broadcast %cst_28 : f32 to vector<128x128xf32>
    %89 = arith.select %87, %85, %88 : vector<128x128xi1>, vector<128x128xf32>
    %90 = arith.addf %84, %89 : vector<128x128xf32>
    %91 = arith.subf %55, %90 : vector<128x128xf32>
    %cst_29 = arith.constant dense<0xFF800000> : vector<128xf32>
    %92 = vector.multi_reduction <maximumf>, %91, %cst_29 [0] : vector<128x128xf32> to vector<128xf32>
    %93 = vector.shape_cast %92 : vector<128xf32> to vector<1x128xf32>
    %94 = vector.broadcast %93 : vector<1x128xf32> to vector<128x128xf32>
    %95 = arith.subf %91, %94 : vector<128x128xf32>
    %96 = math.exp %95 : vector<128x128xf32>
    %c1_i32_30 = arith.constant 1 : i32
    %97 = tpu.dynamic_rotate %96 by %c1_i32_30 dim 0 : vector<128x128xf32>, i32 -> vector<128x128xf32>
    %cst_31 = arith.constant 0.000000e+00 : f32
    %98 = vector.shape_cast %60 : vector<128x1xi1> to vector<128x1xi1>
    %99 = vector.broadcast %98 : vector<128x1xi1> to vector<128x128xi1>
    %100 = vector.broadcast %cst_31 : f32 to vector<128x128xf32>
    %101 = arith.select %99, %97, %100 : vector<128x128xi1>, vector<128x128xf32>
    %102 = arith.addf %96, %101 : vector<128x128xf32>
    %c2_i32_32 = arith.constant 2 : i32
    %103 = tpu.dynamic_rotate %102 by %c2_i32_32 dim 0 : vector<128x128xf32>, i32 -> vector<128x128xf32>
    %cst_33 = arith.constant 0.000000e+00 : f32
    %104 = vector.shape_cast %62 : vector<128x1xi1> to vector<128x1xi1>
    %105 = vector.broadcast %104 : vector<128x1xi1> to vector<128x128xi1>
    %106 = vector.broadcast %cst_33 : f32 to vector<128x128xf32>
    %107 = arith.select %105, %103, %106 : vector<128x128xi1>, vector<128x128xf32>
    %108 = arith.addf %102, %107 : vector<128x128xf32>
    %c4_i32_34 = arith.constant 4 : i32
    %109 = tpu.dynamic_rotate %108 by %c4_i32_34 dim 0 : vector<128x128xf32>, i32 -> vector<128x128xf32>
    %cst_35 = arith.constant 0.000000e+00 : f32
    %110 = vector.shape_cast %64 : vector<128x1xi1> to vector<128x1xi1>
    %111 = vector.broadcast %110 : vector<128x1xi1> to vector<128x128xi1>
    %112 = vector.broadcast %cst_35 : f32 to vector<128x128xf32>
    %113 = arith.select %111, %109, %112 : vector<128x128xi1>, vector<128x128xf32>
    %114 = arith.addf %108, %113 : vector<128x128xf32>
    %c8_i32_36 = arith.constant 8 : i32
    %115 = tpu.dynamic_rotate %114 by %c8_i32_36 dim 0 : vector<128x128xf32>, i32 -> vector<128x128xf32>
    %cst_37 = arith.constant 0.000000e+00 : f32
    %116 = vector.shape_cast %66 : vector<128x1xi1> to vector<128x1xi1>
    %117 = vector.broadcast %116 : vector<128x1xi1> to vector<128x128xi1>
    %118 = vector.broadcast %cst_37 : f32 to vector<128x128xf32>
    %119 = arith.select %117, %115, %118 : vector<128x128xi1>, vector<128x128xf32>
    %120 = arith.addf %114, %119 : vector<128x128xf32>
    %121 = vector.broadcast %93 : vector<1x128xf32> to vector<128x128xf32>
    %122 = arith.addf %90, %121 : vector<128x128xf32>
    %cst_38 = arith.constant 1.000000e-30 : f32
    %123 = vector.broadcast %cst_38 : f32 to vector<128x128xf32>
    %124 = arith.maximumf %120, %123 : vector<128x128xf32>
    %125 = math.log %124 : vector<128x128xf32>
    %126 = arith.addf %122, %125 : vector<128x128xf32>
    %127 = math.exp %126 : vector<128x128xf32>
    %128 = arith.addf %127, %19 : vector<128x128xf32>
    %129 = arith.truncf %128 : vector<128x128xf32> to vector<128x128xbf16>
    %c0_39 = arith.constant 0 : index
    %c0_40 = arith.constant 0 : index
    %c0_41 = arith.constant 0 : index
    %130 = vector.load %arg6[%c0_39, %c0_40, %c0_41] : memref<1x128x512xbf16, #tpu.memory_space<vmem>>, vector<1x128x512xbf16>
    %131 = vector.shape_cast %130 : vector<1x128x512xbf16> to vector<128x512xbf16>
    %cst_42 = arith.constant dense<0.000000e+00> : vector<128x512xf32>
    %132 = tpu.matmul %129, %131, %cst_42 {dimension_numbers = #tpu.dot_dimension_numbers<[1], [0], [0], [1], [0, 0, 1, 1], [], []>} : vector<128x128xbf16>, vector<128x512xbf16>, vector<128x512xf32> -> vector<128x512xf32>
    %c0_43 = arith.constant 0 : index
    %c0_44 = arith.constant 0 : index
    %c0_45 = arith.constant 0 : index
    %133 = vector.load %arg7[%c0_43, %c0_44, %c0_45] : memref<1x1x512xf32, #tpu.memory_space<vmem>>, vector<1x1x512xf32>
    %134 = vector.shape_cast %133 : vector<1x1x512xf32> to vector<1x512xf32>
    %135 = vector.broadcast %134 : vector<1x512xf32> to vector<128x512xf32>
    %136 = arith.addf %132, %135 : vector<128x512xf32>
    %cst_46 = arith.constant 5.000000e-01 : f32
    %137 = vector.broadcast %cst_46 : f32 to vector<128x512xf32>
    %138 = arith.mulf %137, %136 : vector<128x512xf32>
    %cst_47 = arith.constant 0.707106769 : f32
    %139 = vector.broadcast %cst_47 : f32 to vector<128x512xf32>
    %140 = arith.mulf %136, %139 : vector<128x512xf32>
    %141 = math.erf %140 : vector<128x512xf32>
    %cst_48 = arith.constant 1.000000e+00 : f32
    %142 = vector.broadcast %cst_48 : f32 to vector<128x512xf32>
    %143 = arith.addf %142, %141 : vector<128x512xf32>
    %144 = arith.mulf %138, %143 : vector<128x512xf32>
    %145 = arith.truncf %144 : vector<128x512xf32> to vector<128x512xbf16>
    %c0_49 = arith.constant 0 : index
    %c0_50 = arith.constant 0 : index
    %c0_51 = arith.constant 0 : index
    %146 = vector.load %arg8[%c0_49, %c0_50, %c0_51] : memref<1x512x128xbf16, #tpu.memory_space<vmem>>, vector<1x512x128xbf16>
    %147 = vector.shape_cast %146 : vector<1x512x128xbf16> to vector<512x128xbf16>
    %cst_52 = arith.constant dense<0.000000e+00> : vector<128x128xf32>
    %148 = tpu.matmul %145, %147, %cst_52 {dimension_numbers = #tpu.dot_dimension_numbers<[1], [0], [0], [1], [0, 0, 1, 1], [], []>} : vector<128x512xbf16>, vector<512x128xbf16>, vector<128x128xf32> -> vector<128x128xf32>
    %c0_53 = arith.constant 0 : index
    %c0_54 = arith.constant 0 : index
    %c0_55 = arith.constant 0 : index
    %149 = vector.load %arg9[%c0_53, %c0_54, %c0_55] : memref<1x1x128xf32, #tpu.memory_space<vmem>>, vector<1x1x128xf32>
    %150 = vector.shape_cast %149 : vector<1x1x128xf32> to vector<1x128xf32>
    %151 = vector.broadcast %150 : vector<1x128xf32> to vector<128x128xf32>
    %152 = arith.addf %148, %151 : vector<128x128xf32>
    %153 = arith.addf %152, %128 : vector<128x128xf32>
    %c0_56 = arith.constant 0 : index
    %c0_57 = arith.constant 0 : index
    %c0_58 = arith.constant 0 : index
    %154 = vector.load %arg10[%c0_56, %c0_57, %c0_58] : memref<1x1x128xf32, #tpu.memory_space<vmem>>, vector<1x1x128xf32>
    %155 = vector.shape_cast %154 : vector<1x1x128xf32> to vector<1x128xf32>
    %156 = arith.mulf %153, %153 : vector<128x128xf32>
    %cst_59 = arith.constant dense<0.000000e+00> : vector<128xf32>
    %157 = vector.multi_reduction <add>, %156, %cst_59 [1] : vector<128x128xf32> to vector<128xf32>
    %158 = vector.shape_cast %157 : vector<128xf32> to vector<128x1xf32>
    %cst_60 = arith.constant 1.000000e-24 : f32
    %159 = vector.broadcast %cst_60 : f32 to vector<128x1xf32>
    %160 = arith.maximumf %158, %159 : vector<128x1xf32>
    %161 = math.rsqrt %160 : vector<128x1xf32>
    %cst_61 = arith.constant 11.3137083 : f32
    %162 = vector.broadcast %cst_61 : f32 to vector<128x1xf32>
    %163 = arith.mulf %161, %162 : vector<128x1xf32>
    %164 = vector.broadcast %163 : vector<128x1xf32> to vector<128x128xf32>
    %165 = arith.mulf %153, %164 : vector<128x128xf32>
    %cst_62 = arith.constant 1.000000e+00 : f32
    %166 = vector.broadcast %cst_62 : f32 to vector<1x128xf32>
    %167 = arith.addf %155, %166 : vector<1x128xf32>
    %168 = vector.broadcast %167 : vector<1x128xf32> to vector<128x128xf32>
    %169 = arith.mulf %165, %168 : vector<128x128xf32>
    %170 = arith.truncf %169 : vector<128x128xf32> to vector<128x128xbf16>
    %c0_63 = arith.constant 0 : index
    %c0_64 = arith.constant 0 : index
    %c0_65 = arith.constant 0 : index
    %171 = vector.load %arg11[%c0_63, %c0_64, %c0_65] : memref<1x128x256xbf16, #tpu.memory_space<vmem>>, vector<1x128x256xbf16>
    %172 = vector.shape_cast %171 : vector<1x128x256xbf16> to vector<128x256xbf16>
    %cst_66 = arith.constant dense<0.000000e+00> : vector<128x256xf32>
    %173 = tpu.matmul %170, %172, %cst_66 {dimension_numbers = #tpu.dot_dimension_numbers<[1], [0], [0], [1], [0, 0, 1, 1], [], []>} : vector<128x128xbf16>, vector<128x256xbf16>, vector<128x256xf32> -> vector<128x256xf32>
    %c0_67 = arith.constant 0 : index
    %c0_68 = arith.constant 0 : index
    %174 = vector.load %arg3[%c0_67, %c0_68] : memref<128x1xi32, #tpu.memory_space<vmem>>, vector<128x1xi32>
    %175 = tpu.iota {dimensions = array<i32: 1>} : vector<128x256xi32>
    %176 = vector.broadcast %174 : vector<128x1xi32> to vector<128x256xi32>
    %177 = arith.cmpi eq, %175, %176 : vector<128x256xi32>
    %cst_69 = arith.constant 0.000000e+00 : f32
    %178 = vector.broadcast %cst_69 : f32 to vector<128x256xf32>
    %179 = arith.select %177, %173, %178 : vector<128x256xi1>, vector<128x256xf32>
    %cst_70 = arith.constant dense<0.000000e+00> : vector<128xf32>
    %180 = vector.multi_reduction <add>, %179, %cst_70 [1] : vector<128x256xf32> to vector<128xf32>
    %181 = vector.shape_cast %180 : vector<128xf32> to vector<128x1xf32>
    %cst_71 = arith.constant dense<0xFF800000> : vector<128xf32>
    %182 = vector.multi_reduction <maximumf>, %173, %cst_71 [1] : vector<128x256xf32> to vector<128xf32>
    %183 = vector.shape_cast %182 : vector<128xf32> to vector<128x1xf32>
    %184 = vector.broadcast %183 : vector<128x1xf32> to vector<128x256xf32>
    %185 = arith.subf %173, %184 : vector<128x256xf32>
    %186 = math.exp %185 : vector<128x256xf32>
    %cst_72 = arith.constant dense<0.000000e+00> : vector<128xf32>
    %187 = vector.multi_reduction <add>, %186, %cst_72 [1] : vector<128x256xf32> to vector<128xf32>
    %188 = vector.shape_cast %187 : vector<128xf32> to vector<128x1xf32>
    %189 = math.log %188 : vector<128x1xf32>
    %190 = arith.addf %183, %189 : vector<128x1xf32>
    %191 = arith.subf %190, %181 : vector<128x1xf32>
    %cst_73 = arith.constant dense<0.000000e+00> : vector<1xf32>
    %192 = vector.multi_reduction <add>, %191, %cst_73 [0] : vector<128x1xf32> to vector<1xf32>
    %193 = vector.shape_cast %192 : vector<1xf32> to vector<1x1xf32>
    %c0_74 = arith.constant 0 : index
    %c0_75 = arith.constant 0 : index
    %c0_76 = arith.constant 0 : index
    %194 = vector.load %arg14[%c0_74, %c0_75, %c0_76] : memref<1x8x128xf32, #tpu.memory_space<vmem>>, vector<1x8x128xf32>
    %195 = vector.shape_cast %194 : vector<1x8x128xf32> to vector<8x128xf32>
    %196 = vector.broadcast %193 : vector<1x1xf32> to vector<8x128xf32>
    %197 = arith.addf %195, %196 : vector<8x128xf32>
    %c0_77 = arith.constant 0 : index
    %c0_78 = arith.constant 0 : index
    %c0_79 = arith.constant 0 : index
    %198 = vector.load %arg14[%c0_77, %c0_78, %c0_79] : memref<1x8x128xf32, #tpu.memory_space<vmem>>, vector<1x8x128xf32>
    %199 = vector.shape_cast %198 : vector<1x8x128xf32> to vector<8x128xf32>
    %200 = vector.shape_cast %197 : vector<8x128xf32> to vector<1x8x128xf32>
    tpu.vector_store %arg14[%c0_77, %c0_78, %c0_79], %200 {strides = array<i32>} : memref<1x8x128xf32, #tpu.memory_space<vmem>>, vector<1x8x128xf32>,
    %c1_i32_80 = arith.constant 1 : i32
    %201 = arith.cmpi eq, %arg1, %c1_i32_80 : i32
    %202 = arith.extui %201 : i1 to i32
    %c0_i32_81 = arith.constant 0 : i32
    %203 = arith.cmpi ne, %202, %c0_i32_81 : i32
    scf.if %203 {
      %c0_84 = arith.constant 0 : index
      %c0_85 = arith.constant 0 : index
      %207 = vector.load %arg13[%c0_84, %c0_85] : memref<128x256xf32, #tpu.memory_space<vmem>>, vector<128x256xf32>
      tpu.vector_store %arg13[%c0_84, %c0_85], %173 {strides = array<i32>} : memref<128x256xf32, #tpu.memory_space<vmem>>, vector<128x256xf32>,
    } else {
    }
    %c1_i32_82 = arith.constant 1 : i32
    %204 = arith.cmpi slt, %arg1, %c1_i32_82 : i32
    %205 = arith.extui %204 : i1 to i32
    %c0_i32_83 = arith.constant 0 : i32
    %206 = arith.cmpi ne, %205, %c0_i32_83 : i32
    scf.if %206 {
      %207 = arith.sitofp %175 : vector<128x256xi32> to vector<128x256xf32>
      %208 = vector.broadcast %183 : vector<128x1xf32> to vector<128x256xf32>
      %209 = arith.cmpf oge, %173, %208 : vector<128x256xf32>
      %cst_84 = arith.constant 2.560000e+02 : f32
      %210 = vector.broadcast %cst_84 : f32 to vector<128x256xf32>
      %211 = arith.select %209, %207, %210 : vector<128x256xi1>, vector<128x256xf32>
      %cst_85 = arith.constant dense<0x7F800000> : vector<128xf32>
      %212 = vector.multi_reduction <minimumf>, %211, %cst_85 [1] : vector<128x256xf32> to vector<128xf32>
      %213 = vector.shape_cast %212 : vector<128xf32> to vector<128x1xf32>
      %214 = vector.broadcast %213 : vector<128x1xf32> to vector<128x256xf32>
      %215 = arith.cmpf oeq, %207, %214 : vector<128x256xf32>
      %216 = arith.extui %215 : vector<128x256xi1> to vector<128x256xi32>
      %217 = arith.sitofp %216 : vector<128x256xi32> to vector<128x256xf32>
      %218 = arith.truncf %217 : vector<128x256xf32> to vector<128x256xbf16>
      %c0_86 = arith.constant 0 : index
      %c0_87 = arith.constant 0 : index
      %c0_88 = arith.constant 0 : index
      %219 = vector.load %arg12[%c0_86, %c0_87, %c0_88] : memref<1x256x128xbf16, #tpu.memory_space<vmem>>, vector<1x256x128xbf16>
      %220 = vector.shape_cast %219 : vector<1x256x128xbf16> to vector<256x128xbf16>
      %cst_89 = arith.constant dense<0.000000e+00> : vector<128x128xf32>
      %221 = tpu.matmul %218, %220, %cst_89 {dimension_numbers = #tpu.dot_dimension_numbers<[1], [0], [0], [1], [0, 0, 1, 1], [], []>} : vector<128x256xbf16>, vector<256x128xbf16>, vector<128x128xf32> -> vector<128x128xf32>
      %c0_90 = arith.constant 0 : index
      %c0_91 = arith.constant 0 : index
      %222 = vector.load %arg15[%c0_90, %c0_91] : memref<128x128xf32, #tpu.memory_space<vmem>>, vector<128x128xf32>
      tpu.vector_store %arg15[%c0_90, %c0_91], %221 {strides = array<i32>} : memref<128x128xf32, #tpu.memory_space<vmem>>, vector<128x128xf32>,
    } else {
    }
    return
  }
  func.func @transform_0(%arg0: i32, %arg1: i32) -> (i32, i32) {
    %c0_i32 = arith.constant 0 : i32
    %c0_i32_0 = arith.constant 0 : i32
    return %arg0, %c0_i32 : i32, i32
  }
  func.func @transform_1(%arg0: i32, %arg1: i32) -> (i32, i32) {
    %c0_i32 = arith.constant 0 : i32
    %c0_i32_0 = arith.constant 0 : i32
    return %arg0, %c0_i32 : i32, i32
  }
  func.func @transform_2(%arg0: i32, %arg1: i32) -> (i32, i32, i32) {
    %c0_i32 = arith.constant 0 : i32
    %c0_i32_0 = arith.constant 0 : i32
    %c0_i32_1 = arith.constant 0 : i32
    return %arg1, %c0_i32, %c0_i32_0 : i32, i32, i32
  }
  func.func @transform_3(%arg0: i32, %arg1: i32) -> (i32, i32, i32) {
    %c0_i32 = arith.constant 0 : i32
    %c0_i32_0 = arith.constant 0 : i32
    %c0_i32_1 = arith.constant 0 : i32
    return %arg1, %c0_i32, %c0_i32_0 : i32, i32, i32
  }
  func.func @transform_4(%arg0: i32, %arg1: i32) -> (i32, i32, i32) {
    %c0_i32 = arith.constant 0 : i32
    %c0_i32_0 = arith.constant 0 : i32
    %c0_i32_1 = arith.constant 0 : i32
    return %arg1, %c0_i32, %c0_i32_0 : i32, i32, i32
  }
  func.func @transform_5(%arg0: i32, %arg1: i32) -> (i32, i32, i32) {
    %c0_i32 = arith.constant 0 : i32
    %c0_i32_0 = arith.constant 0 : i32
    %c0_i32_1 = arith.constant 0 : i32
    return %arg1, %c0_i32, %c0_i32_0 : i32, i32, i32
  }
  func.func @transform_6(%arg0: i32, %arg1: i32) -> (i32, i32, i32) {
    %c0_i32 = arith.constant 0 : i32
    %c0_i32_0 = arith.constant 0 : i32
    %c0_i32_1 = arith.constant 0 : i32
    return %arg1, %c0_i32, %c0_i32_0 : i32, i32, i32
  }
  func.func @transform_7(%arg0: i32, %arg1: i32) -> (i32, i32, i32) {
    %c0_i32 = arith.constant 0 : i32
    %c0_i32_0 = arith.constant 0 : i32
    %c0_i32_1 = arith.constant 0 : i32
    return %arg1, %c0_i32, %c0_i32_0 : i32, i32, i32
  }
  func.func @transform_8(%arg0: i32, %arg1: i32) -> (i32, i32, i32) {
    %c0_i32 = arith.constant 0 : i32
    %c0_i32_0 = arith.constant 0 : i32
    %c0_i32_1 = arith.constant 0 : i32
    return %arg1, %c0_i32, %c0_i32_0 : i32, i32, i32
  }
  func.func @transform_9(%arg0: i32, %arg1: i32) -> (i32, i32, i32) {
    %c0_i32 = arith.constant 0 : i32
    %c0_i32_0 = arith.constant 0 : i32
    %c0_i32_1 = arith.constant 0 : i32
    return %arg1, %c0_i32, %c0_i32_0 : i32, i32, i32
  }
  func.func @transform_10(%arg0: i32, %arg1: i32) -> (i32, i32, i32) {
    %c0_i32 = arith.constant 0 : i32
    %c0_i32_0 = arith.constant 0 : i32
    %c0_i32_1 = arith.constant 0 : i32
    return %arg1, %c0_i32, %c0_i32_0 : i32, i32, i32
  }
  func.func @transform_11(%arg0: i32, %arg1: i32) -> (i32, i32) {
    %c0_i32 = arith.constant 0 : i32
    %c0_i32_0 = arith.constant 0 : i32
    return %arg0, %c0_i32 : i32, i32
  }
  func.func @transform_12(%arg0: i32, %arg1: i32) -> (i32, i32, i32) {
    %c0_i32 = arith.constant 0 : i32
    %c0_i32_0 = arith.constant 0 : i32
    %c0_i32_1 = arith.constant 0 : i32
    return %arg0, %c0_i32, %c0_i32_0 : i32, i32, i32
  }
}

</mosaic_0001>

<bundles_post_ra>
// kernel: tpu_custom_call.1
= control target key start
LH: loop header
LB: loop body
LE: loop exit
PB: predicated region body
PF: predicated region fallthrough
CT: control target
= control target key end

     0   :  { %s10101_s0 = inlined_call_operand.vmem [shape: f32[256,128], index: 0, kind: input, shape index: {}]   ;;  %s10102_s1 = inlined_call_operand.vmem [shape: s32[256,1], index: 1, kind: input, shape index: {}]   ;;  %s10103_s2 = inlined_call_operand.vmem [shape: f32[2,1,128], index: 2, kind: input, shape index: {}]   ;;  %s10104_s3 = inlined_call_operand.hbm [shape: bf16[2,128,256], index: 3, kind: input, shape index: {}]   ;;  %s10105_s4 = inlined_call_operand.hbm [shape: bf16[2,128,512], index: 4, kind: input, shape index: {}]   ;;  %s10106_s5 = inlined_call_operand.vmem [shape: f32[2,1,512], index: 5, kind: input, shape index: {}]   ;;  %s10107_s6 = inlined_call_operand.hbm [shape: bf16[2,512,128], index: 6, kind: input, shape index: {}]   ;;  %s10108_s7 = inlined_call_operand.vmem [shape: f32[2,1,128], index: 7, kind: input, shape index: {}]   ;;  %s10109_s8 = inlined_call_operand.vmem [shape: f32[2,1,128], index: 8, kind: input, shape index: {}]   ;;  %s10110_s9 = inlined_call_operand.hbm [shape: bf16[2,128,256], index: 9, kind: input, shape index: {}]   ;;  %s10111_s10 = inlined_call_operand.hbm [shape: bf16[2,256,128], index: 10, kind: input, shape index: {}]   ;;  %s10112_s11 = inlined_call_operand.hbm [shape: f32[256,256], index: 11, kind: output, shape index: {0}]   ;;  %s10113_s12 = inlined_call_operand.hbm [shape: f32[2,8,128], index: 12, kind: output, shape index: {1}]  }
   0x1   :  { %10218 = sst [smem:[#allocation56_spill]] %s10101_s0 }
   0x2   :  { %10219 = sst [smem:[#allocation57_spill]] %s10102_s1 }
   0x3   :  { %10220 = sst [smem:[#allocation58_spill]] %s10103_s2 }
   0x4   :  { %10221 = sst [smem:[#allocation59_spill]] %s10104_s3 }
   0x5   :  { %10222 = sst [smem:[#allocation60_spill]] %s10105_s4 }
   0x6   :  { %10223 = sst [smem:[#allocation61_spill]] %s10106_s5 }
   0x7   :  { %10224 = sst [smem:[#allocation62_spill]] %s10107_s6 }
   0x8   :  { %10225 = sst [smem:[#allocation63_spill]] %s10108_s7 }
   0x9   :  { %10226 = sst [smem:[#allocation64_spill]] %s10109_s8 }
   0xa   :  { %10227 = sst [smem:[#allocation65_spill]] %s10110_s9 }
   0xb   :  { %10228 = sst [smem:[#allocation66_spill]] %s10111_s10 }
   0xc   :  { %10229 = sst [smem:[#allocation67_spill]] %s10112_s11 }
   0xd   :  { %10230 = sst [smem:[#allocation68_spill]] %s10113_s12 }
   0xe   :  { %18 = vsyncpa [#allocation4], 0 }
   0xf   :  { %20 = vsyncpa [#allocation4 + $0x1], 0 }
  0x10   :  { %21 = vsyncpa [#allocation7], 0 }
  0x11   :  { %23 = vsyncpa [#allocation7 + $0x1], 0 }
  0x12   :  { %24 = vsyncpa [#allocation10], 0 }
  0x13   :  { %26 = vsyncpa [#allocation10 + $0x1], 0 }
  0x14   :  { %27 = vsyncpa [#allocation5], 0 }
  0x15   :  { %29 = vsyncpa [#allocation5 + $0x1], 0 }
  0x16   :  { %30 = vsyncpa [#allocation14], 0 }
  0x17   :  { %32 = vsyncpa [#allocation14 + $0x1], 0  ;;  %s6975_s21 = smov 0   ;;  %s6977_s22 = smov 0  }
  0x18   :  { %s6979_s23 = smov 0   ;;  %s6981_s24 = smov 0  }
  0x19   :  { %s6983_s25 = smov 0   ;;  %s6985_s26 = smov 0  }
  0x1a   :  { %s6987_s27 = smov 0   ;;  %s6989_s28 = smov 0  }
  0x1b   :  { %s6991_s29 = smov 0   ;;  %s6993_s30 = smov 0  }
  0x1c   :  { %s6995_s13 = smov 0  }
  0x1d LB: > { %10231 = sst [smem:[#allocation20_spill]] %s6850_s21  ;;  %s7029_s14 = sadd.s32 4294967295, %s6890_s13   ;;  %s6890_s13 = sphi %s6995_s13, %s38_s13   ;;  %s6886_s30 = sphi %s6993_s30, %s10454_s30   ;;  %s6882_s29 = sphi %s6991_s29, %s10453_s29   ;;  %s6878_s28 = sphi %s6989_s28, %s10452_s28   ;;  %s6874_s27 = sphi %s6987_s27, %s10451_s27   ;;  %s6870_s26 = sphi %s6985_s26, %s10450_s26   ;;  %s6866_s25 = sphi %s6983_s25, %s10449_s25   ;;  %s6862_s24 = sphi %s6981_s24, %s10448_s24   ;;  %s6858_s23 = sphi %s6979_s23, %s10447_s23   ;;  %s6854_s22 = sphi %s6977_s22, %s10446_s22   ;;  %s6850_s21 = sphi %s6975_s21, %s10445_s21  }
  0x1e   : > { %10232 = sst [smem:[#allocation21_spill]] %s6854_s22  ;;  %s5316_s15 = sadd.s32 4294967294, %s6890_s13  }
  0x1f   : > { %10233 = sst [smem:[#allocation22_spill]] %s6858_s23  ;;  %s47_s16 = sadd.s32 1, %s6882_s29 }
  0x20   : > { %10234 = sst [smem:[#allocation23_spill]] %s6866_s25  ;;  %s50_s17 = sadd.s32 1, %s6886_s30 }
  0x21   : > { %10235 = sst [smem:[#allocation24_spill]] %s6870_s26  ;;  %p48_p0 = scmp.ge.s32.totalorder %s47_s16, 2 }
  0x22   : > { %10236 = sst [smem:[#allocation25_spill]] %s6882_s29  ;;  %s135_s18 = sadd.s32 1, %s6870_s26 }
  0x23   : > { %10237 = sst [smem:[#allocation26_spill]] %s6886_s30  ;;  %p142_p1 = scmp.ne.s32.totalorder %s6870_s26, %s6866_s25 }
  0x24   : > { %10238 = sst [smem:[#allocation27_spill]] %s6890_s13  ;;  %p143_p2 = scmp.eq.s32.totalorder %s6890_s13, 0 }
  0x25   : > { %s10456_s16 = smov (%p48_p0, %s47_s16), 0  ;;  %s10458_s17 = smov (!%p48_p0, %s50_s17), %s6886_s30 }
  0x26   : > { %10239 = sst [smem:[#allocation28_spill]] %s10456_s16  ;;  %s132_s19 = ssub.s32 %s6882_s29, %s10456_s16 }
  0x27   : > { %p7043_p3 = por %p143_p2, %p142_p1  ;;  %p52_p4 = scmp.ge.s32.totalorder %s10458_s17, 2 }
  0x28   : > { %p133_p5 = scmp.eq.s32.totalorder %s132_s19, 0  ;;  %p148_p6 = scmp.ne.s32.totalorder %s6866_s25, %s6862_s24 }
  0x29   : > { %p149_p7 = scmp.eq.s32.totalorder %s7029_s14, 0  ;;  %s10460_s17 = smov (%p52_p4, %s10458_s17), 0 }
  0x2a   : > { %10241 = sst [smem:[#allocation29_spill]] %s10460_s17  ;;  %s340_s11 = ssub.s32 %s6886_s30, %s10460_s17 }
  0x2b   : > { %s7052_s12 = scalar_select %p133_p5, %s6870_s26, %s135_s18  }
  0x2c   : > { %p7054_p8 = por %p149_p7, %p148_p6  ;;  %p341_p9 = scmp.eq.s32.totalorder %s340_s11, 0 }
  0x2d   : > { %10242 = sst [smem:[#allocation30_spill]] %s7052_s12  ;;  %s343_s8 = sadd.s32 1, %s6858_s23 }
  0x2e   : > { %s10243_s16 = scalar_select %p7054_p8, 1, 0 }
  0x2f   : > { %p353_p10 = scmp.ne.s32.totalorder %s6858_s23, %s6854_s22  ;;  %p354_p11 = scmp.eq.s32.totalorder %s7029_s14, 3 }
  0x30   : > { %s7065_s24 = scalar_select %p341_p9, %s6858_s23, %s343_s8  }
  0x31   : > { %p7067_p12 = por %p354_p11, %p353_p10  ;;  %p359_p13 = scmp.ne.s32.totalorder %s6854_s22, %s6850_s21 }
  0x32   : > { %10244 = sst [smem:[#allocation31_spill]] %s7065_s24  ;;  %p360_p0 = scmp.eq.s32.totalorder %s5316_s15, 3 }
  0x33   : > { %s10245_s19 = scalar_select %p7067_p12, 1, 0 }
  0x34   : > { %p5787_p1 = scmp.lt.s32.totalorder %s6890_s13, 4  ;;  %s7075_s18 = sand.u32 1, %s6870_s26  }
  0x35   : > { %10246 = sst [smem:[#allocation32_spill]] %s10245_s19  ;;  %p7077_p2 = por %p360_p0, %p359_p13 }
  0x36   : > { %p7084_p4 = pnand %p5787_p1, %p7043_p3  ;;  %s10125_s30 = sshll.u32 %s7075_s18, 8 }
  0x37   : > { %s10247_s17 = scalar_select %p7077_p2, 1, 0 }
  0x38   : > { %s10126_s12 = sshll.u32 %s6882_s29, 12  ;;  %s10250_s4 = sld [smem:[#allocation60_spill]] }
  0x39   : > { %10248 = sst [smem:[#allocation33_spill]] %s10247_s17  ;;  %s455_s11 = scalar_lea.vmem [#allocation6], %s10125_s30 }
  0x3a   : > { %s462_s20 = sshll.u32 %s455_s11, 4  ;;  %s10251_s23 = sand.u32 1, %s6890_s13   ;;  %s7099_s20 = int_to_ptr.vmem [resolvable:$true] %s462_s20 }
  0x3b   : > { %s7103_s17 = scalar_lea.sflag [#allocation7], %s10251_s23  ;;  %p7109_p5 = pneg %p7084_p4 }
  0x3e   : > { %s7095_s26 = scalar_lea.hbm %s10250_s4, %s10126_s12  ;;  %s6583_s11 = scalar_lea.hbm %s10250_s4, 8192 }
  0x3f   : > { %s6578_s21 = scalar_lea.hbm %s7095_s26, 4096  ;;  %p6584_p9 = scmp.lt.u32.totalorder %s7095_s26, %s10250_s4 }
  0x40   : > { %p6579_p3 = scmp.ne.s32.totalorder %s7095_s26, %s6578_s21  ;;  %p6585_p10 = scmp.lt.u32.totalorder %s6583_s11, %s6578_s21 }
  0x41   : > { %p6587_p13 = scmp.lt.u32.totalorder %s6578_s21, %s7095_s26 }
  0x42   : > { %p6581_p6 = pnand %p7109_p5, %p6579_p3  ;;  %p6586_p11 = por %p6585_p10, %p6584_p9 }
  0x44   : > { %p6582_p7 = pneg %p6581_p6  ;;  %p6588_p0 = por %p6587_p13, %p6586_p11 }
  0x46   : > { %p6589_p1 = pnand %p6588_p0, %p6582_p7 }
  0x48   : > { %6592 = shalt.err (!%p6589_p1)
}
  0x49   : > { %s6593_s23 = scalar_lea.vmem %s7099_s20, 4096  ;;  %s6892_s24 = smov [#allocation6]  }
  0x4a   : > { %p6594_p3 = scmp.ne.s32.totalorder %s7099_s20, %s6593_s23  ;;  %s6598_s15 = sshll.u32 %s6892_s24, 4  ;;  %s6599_s15 = int_to_ptr.vmem [resolvable:$false] %s6598_s15 }
  0x4b   : > { %s6600_s12 = scalar_lea.vmem %s6599_s15, 8192  ;;  %p6601_p12 = scmp.lt.s32.totalorder %s7099_s20, %s6599_s15 }
  0x4c   : > { %p6596_p6 = pnand %p6594_p3, %p7109_p5  ;;  %p6602_p8 = scmp.lt.s32.totalorder %s6600_s12, %s6593_s23 }
  0x4e   : > { %p6597_p2 = pneg %p6596_p6  ;;  %p6603_p9 = por %p6602_p8, %p6601_p12 }
  0x50   : > { %p6604_p10 = pnand %p6603_p9, %p6597_p2 }
  0x52   : > { %6607 = shalt.err (!%p6604_p10)
}
  0x53   : > { %s6893_s21 = smov 256   ;;  %s6894_s30 = smov 16  }
  0x54   : > { %5770 = dma.hbm_to_vmem [thread:$0]  (!%p7084_p4), %s7095_s26, 4096, %s7099_s20, %s7103_s17, %s6893_s21, %s6893_s21, %s6894_s30  }
  0x55   : > { %s10253_s11 = sshll.u32 %s6882_s29, 12  ;;  %s10254_s6 = sld [smem:[#allocation62_spill]] }
  0x56   : > { %s10255_s12 = sshll.u32 %s7075_s18, 8  ;;  %p5334_p8 = scmp.ge.s32.totalorder %s6890_s13, 1 }
  0x57   : > { %s483_s4 = scalar_lea.vmem [#allocation8], %s10255_s12  ;;  %p552_p12 = scmp.lt.s32.totalorder %s6890_s13, 5 }
  0x58   : > { %s490_s7 = sshll.u32 %s483_s4, 4  ;;  %s7147_s1 = sshll.u32 %s7075_s18, 7  ;;  %s7142_s7 = int_to_ptr.vmem [resolvable:$true] %s490_s7 }
  0x59   : > { %s7150_s0 = sshll.u32 %s6882_s29, 11  ;;  %p7152_p2 = pnand %p5334_p8, %p552_p12 }
  0x5a   : > { %s10257_s9 = sld [smem:[#allocation65_spill]]  ;;  %s516_s4 = scalar_lea.vmem [#allocation9], %s7147_s1 }
  0x5b   : > { %s7138_s15 = scalar_lea.hbm %s10254_s6, %s10253_s11  ;;  %s523_s11 = sshll.u32 %s516_s4, 4  ;;  %s7163_s11 = int_to_ptr.vmem [resolvable:$true] %s523_s11 }
  0x5c   : > { %s10256_s26 = scalar_select %p7152_p2, 1, 0 }
  0x5d   : > { %s10258_s23 = sand.u32 1, %s6890_s13  }
  0x5e   : > { %s7167_s24 = scalar_lea.sflag [#allocation10], %s10258_s23 }
  0x60   : > { %s7160_s30 = scalar_lea.hbm %s10257_s9, %s7150_s0  ;;  %s6613_s21 = scalar_lea.hbm %s10257_s9, 4096 }
  0x61   : > { %s6608_s12 = scalar_lea.hbm %s7160_s30, 2048  ;;  %p6614_p0 = scmp.lt.u32.totalorder %s7160_s30, %s10257_s9 }
  0x62   : > { %p6609_p7 = scmp.ne.s32.totalorder %s7160_s30, %s6608_s12  ;;  %p6615_p1 = scmp.lt.u32.totalorder %s6613_s21, %s6608_s12 }
  0x63   : > { %p6617_p6 = scmp.lt.u32.totalorder %s6608_s12, %s7160_s30 }
  0x64   : > { %p6611_p11 = pnand %p6609_p7, %p7109_p5  ;;  %p6616_p3 = por %p6615_p1, %p6614_p0 }
  0x66   : > { %p6612_p13 = pneg %p6611_p11  ;;  %p6618_p9 = por %p6617_p6, %p6616_p3 }
  0x68   : > { %p6619_p10 = pnand %p6618_p9, %p6612_p13 }
  0x6a   : > { %6622 = shalt.err (!%p6619_p10)
}
  0x6b   : > { %s6623_s4 = scalar_lea.vmem %s7163_s11, 2048  ;;  %s6895_s29 = smov [#allocation9]  }
  0x6c   : > { %p6624_p8 = scmp.ne.s32.totalorder %s7163_s11, %s6623_s4  ;;  %s6628_s23 = sshll.u32 %s6895_s29, 4  ;;  %s6629_s23 = int_to_ptr.vmem [resolvable:$false] %s6628_s23 }
  0x6d   : > { %s6630_s2 = scalar_lea.vmem %s6629_s23, 4096  ;;  %p6631_p11 = scmp.lt.s32.totalorder %s7163_s11, %s6629_s23 }
  0x6e   : > { %p6626_p12 = pnand %p6624_p8, %p7109_p5  ;;  %p6632_p2 = scmp.lt.s32.totalorder %s6630_s2, %s6623_s4 }
  0x70   : > { %p6627_p7 = pneg %p6626_p12  ;;  %p6633_p0 = por %p6632_p2, %p6631_p11 }
  0x72   : > { %p6634_p1 = pnand %p6633_p0, %p6627_p7 }
  0x74   : > { %6637 = shalt.err (!%p6634_p1)
}
  0x75   : > { %s10130_s5 = smov 128   ;;  %s6897_s12 = smov 8  }
  0x76   : > { %5776 = dma.hbm_to_vmem [thread:$0]  (!%p7084_p4), %s7160_s30, 2048, %s7163_s11, %s7167_s24, %s10130_s5, %s10130_s5, %s6897_s12  }
  0x77   : > { %s10259_s3 = sld [smem:[#allocation59_spill]]  ;;  %s434_s29 = scalar_lea.vmem [#allocation3], %s7147_s1 }
  0x78   : > { %s441_s23 = sshll.u32 %s434_s29, 4  ;;  %s431_s2 = scalar_lea.sflag [#allocation4], %s7075_s18  ;;  %s7201_s23 = int_to_ptr.vmem [resolvable:$true] %s441_s23 }
  0x7d   : > { %s7198_s4 = scalar_lea.hbm %s10259_s3, %s7150_s0  ;;  %s6643_s20 = scalar_lea.hbm %s10259_s3, 4096 }
  0x7e   : > { %s6638_s9 = scalar_lea.hbm %s7198_s4, 2048  ;;  %p6644_p6 = scmp.lt.u32.totalorder %s7198_s4, %s10259_s3 }
  0x7f   : > { %p6639_p2 = scmp.ne.s32.totalorder %s7198_s4, %s6638_s9  ;;  %p6645_p9 = scmp.lt.u32.totalorder %s6643_s20, %s6638_s9 }
  0x80   : > { %p6647_p8 = scmp.lt.u32.totalorder %s6638_s9, %s7198_s4 }
  0x81   : > { %p6641_p13 = pnand %p6639_p2, %p7109_p5  ;;  %p6646_p10 = por %p6645_p9, %p6644_p6 }
  0x83   : > { %p6642_p3 = pneg %p6641_p13  ;;  %p6648_p12 = por %p6647_p8, %p6646_p10 }
  0x85   : > { %p6649_p7 = pnand %p6648_p12, %p6642_p3 }
  0x87   : > { %6652 = shalt.err (!%p6649_p7)
}
  0x88   : > { %s6653_s29 = scalar_lea.vmem %s7201_s23, 2048  ;;  %s6898_s30 = smov [#allocation3]  }
  0x89   : > { %p6654_p11 = scmp.ne.s32.totalorder %s7201_s23, %s6653_s29  ;;  %s6658_s11 = sshll.u32 %s6898_s30, 4  ;;  %s6659_s11 = int_to_ptr.vmem [resolvable:$false] %s6658_s11 }
  0x8a   : > { %s6660_s5 = scalar_lea.vmem %s6659_s11, 4096  ;;  %p6661_p2 = scmp.lt.s32.totalorder %s7201_s23, %s6659_s11 }
  0x8b   : > { %p6656_p0 = pnand %p6654_p11, %p7109_p5  ;;  %p6662_p13 = scmp.lt.s32.totalorder %s6660_s5, %s6653_s29 }
  0x8d   : > { %p6657_p1 = pneg %p6656_p0  ;;  %p6663_p6 = por %p6662_p13, %p6661_p2 }
  0x8f   : > { %p6664_p9 = pnand %p6663_p6, %p6657_p1 }
  0x91   : > { %6667 = shalt.err (!%p6664_p9)
}
  0x92   : > { %s10260_s9 = smov 128   ;;  %s6668_s20 = scalar_lea.hbm %s7138_s15, 4096 }
  0x93   : > { %5767 = dma.hbm_to_vmem [thread:$0]  (!%p7084_p4), %s7198_s4, 2048, %s7201_s23, %s431_s2, %s10260_s9, %s10260_s9, %s6897_s12  }
  0x94   : > { %p6669_p3 = scmp.ne.s32.totalorder %s7138_s15, %s6668_s20  ;;  %s6673_s30 = scalar_lea.hbm %s10254_s6, 8192 }
  0x95   : > { %p6674_p12 = scmp.lt.u32.totalorder %s7138_s15, %s10254_s6  ;;  %p6675_p7 = scmp.lt.u32.totalorder %s6673_s30, %s6668_s20 }
  0x96   : > { %p6671_p10 = pnand %p6669_p3, %p7109_p5  ;;  %p6677_p0 = scmp.lt.u32.totalorder %s6668_s20, %s7138_s15 }
  0x97   : > { %p6676_p11 = por %p6675_p7, %p6674_p12 }
  0x98   : > { %p6672_p8 = pneg %p6671_p10 }
  0x99   : > { %p6678_p1 = por %p6677_p0, %p6676_p11 }
  0x9b   : > { %p6679_p2 = pnand %p6678_p1, %p6672_p8 }
  0x9d   : > { %6682 = shalt.err (!%p6679_p2)
}
  0x9e   : > { %s6683_s18 = scalar_lea.vmem %s7142_s7, 4096  ;;  %s6899_s12 = smov [#allocation8]  }
  0x9f   : > { %p6684_p13 = scmp.ne.s32.totalorder %s7142_s7, %s6683_s18  ;;  %s6688_s4 = sshll.u32 %s6899_s12, 4  ;;  %s6689_s4 = int_to_ptr.vmem [resolvable:$false] %s6688_s4 }
  0xa0   : > { %s6690_s23 = scalar_lea.vmem %s6689_s4, 8192  ;;  %p6691_p3 = scmp.lt.s32.totalorder %s7142_s7, %s6689_s4 }
  0xa1   : > { %p6686_p6 = pnand %p6684_p13, %p7109_p5  ;;  %p6692_p10 = scmp.lt.s32.totalorder %s6690_s23, %s6683_s18 }
  0xa3   : > { %p6687_p9 = pneg %p6686_p6  ;;  %p6693_p12 = por %p6692_p10, %p6691_p3 }
  0xa5   : > { %p6694_p7 = pnand %p6693_p12, %p6687_p9 }
  0xa7   : > { %6697 = shalt.err (!%p6694_p7)
}
  0xa8   : > { %s6900_s2 = smov 64   ;;  %s6901_s9 = smov 4  }
  0xa9   : > { %5773 = dma.hbm_to_vmem [thread:$0]  (!%p7084_p4), %s7138_s15, 4096, %s7142_s7, %s7103_s17, %s6900_s2, %s6900_s2, %s6901_s9  }
  0xaa   : > { %s10261_s10 = sld [smem:[#allocation66_spill]]  ;;  %s537_s30 = scalar_lea.vmem [#allocation11], %s7147_s1 }
  0xab   : > { %s544_s11 = sshll.u32 %s537_s30, 4  ;;  %s7262_s11 = int_to_ptr.vmem [resolvable:$true] %s544_s11 }
  0xb0   : > { %s7259_s29 = scalar_lea.hbm %s10261_s10, %s7150_s0  ;;  %s6703_s17 = scalar_lea.hbm %s10261_s10, 4096 }
  0xb1   : > { %s6698_s5 = scalar_lea.hbm %s7259_s29, 2048  ;;  %p6704_p1 = scmp.lt.u32.totalorder %s7259_s29, %s10261_s10 }
  0xb2   : > { %p6699_p8 = scmp.ne.s32.totalorder %s7259_s29, %s6698_s5  ;;  %p6705_p2 = scmp.lt.u32.totalorder %s6703_s17, %s6698_s5 }
  0xb3   : > { %p6707_p6 = scmp.lt.u32.totalorder %s6698_s5, %s7259_s29 }
  0xb4   : > { %p6701_p11 = pnand %p6699_p8, %p7109_p5  ;;  %p6706_p13 = por %p6705_p2, %p6704_p1 }
  0xb6   : > { %p6702_p0 = pneg %p6701_p11  ;;  %p6708_p9 = por %p6707_p6, %p6706_p13 }
  0xb8   : > { %p6709_p3 = pnand %p6708_p9, %p6702_p0 }
  0xba   : > { %6712 = shalt.err (!%p6709_p3)
}
  0xbb   : > { %s6713_s1 = scalar_lea.vmem %s7262_s11, 2048  ;;  %s6902_s12 = smov [#allocation11]  }
  0xbc   : > { %p6714_p10 = scmp.ne.s32.totalorder %s7262_s11, %s6713_s1  ;;  %s6718_s4 = sshll.u32 %s6902_s12, 4  ;;  %s6719_s4 = int_to_ptr.vmem [resolvable:$false] %s6718_s4 }
  0xbd   : > { %s6720_s23 = scalar_lea.vmem %s6719_s4, 4096  ;;  %p6721_p8 = scmp.lt.s32.totalorder %s7262_s11, %s6719_s4 }
  0xbe   : > { %p6716_p12 = pnand %p6714_p10, %p7109_p5  ;;  %p6722_p11 = scmp.lt.s32.totalorder %s6720_s23, %s6713_s1 }
  0xc0   : > { %p6717_p7 = pneg %p6716_p12  ;;  %p6723_p1 = por %p6722_p11, %p6721_p8 }
  0xc2   : > { %p6724_p2 = pnand %p6723_p1, %p6717_p7 }
  0xc4   : > { %6727 = shalt.err (!%p6724_p2)
}
  0xc5   : > { %5779 = dma.hbm_to_vmem [thread:$0]  (!%p7084_p4), %s7259_s29, 2048, %s7262_s11, %s7167_s24, %s6900_s2, %s6900_s2, %s6901_s9  }
  0xc6   : > { %p10262_p5 = scmp.ne.s32.totalorder %s10256_s26, 0 }
  0xc8   : > { %556 = sbr.rel (%p10262_p5) target bundleno = 2656 (0xa60), region = 64 }
  0xcf   : > { %s558_s19 = sand.u32 1, %s6866_s25   ;;  %p10263_p0 = scmp.ne.s32.totalorder %s10243_s16, 0 }
  0xd0   : > { %s7292_s20 = sshll.u32 %s558_s19, 7  ;;  %s559_s21 = scalar_lea.sflag [#allocation4], %s558_s19 }
  0xd1   : > { %s7295_s30 = scalar_lea.vmem [#allocation3], %s7292_s20 }
  0xd2   : > { %6829 = dma.done.wait (%p10263_p0), %s559_s21, 2048  }
  0xd3   : > { %6831 = vsyncadd (%p10263_p0), %s559_s21, 4294965248  ;;  %s567_s8 = sand.u32 1, %s7029_s14   ;;  %s5336_s24 = sshll.u32 %s558_s19, 8 }
  0xd4   : > { %s568_s26 = scalar_lea.sflag [#allocation7], %s567_s8  ;;  %s7302_s2 = scalar_lea.vmem [#allocation6], %s5336_s24 }
  0xd5   : > { %6833 = dma.done.wait (%p10263_p0), %s568_s26, 8192  }
  0xd6   : > { %6835 = vsyncadd (%p10263_p0), %s568_s26, 4294959104  ;;  %s7308_s9 = scalar_lea.vmem [#allocation8], %s5336_s24  ;;  %s586_s29 = scalar_lea.sflag [#allocation10], %s567_s8 }
  0xd7   : > { %s7311_s11 = scalar_lea.vmem [#allocation9], %s7292_s20 }
  0xd8   : > { %6837 = dma.done.wait (%p10263_p0), %s586_s29, 4096  }
  0xd9   : > { %6839 = vsyncadd (%p10263_p0), %s586_s29, 4294963200  ;;  %s7318_s14 = sand.u32 1, %s6854_s22   ;;  %s5342_s7 = sshll.u32 %s6878_s28, 4 }
  0xda   : > { %10264 = sst [smem:[#allocation34_spill]] %s7318_s14  ;;  %s5340_s5 = sshll.u32 %s7318_s14, 8 }
  0xdb   : > { %s5341_s18 = sshll.u32 %s7318_s14, 3  ;;  %p699_p4 = scmp.lt.s32.totalorder %s6874_s27, 1 }
  0xdc   : > { %p688_p13 = scmp.lt.s32.totalorder %s5342_s7, 31  ;;  %s10266_s21 = sld [smem:[#allocation61_spill]] }
  0xdd   : > { %s7325_s17 = scalar_select %p699_p4, %s6874_s27, 1 }
  0xde   : > { %s10462_s7 = smov (!%p688_p13, %s5342_s7), 31  ;;  %s10267_s29 = sld [smem:[#allocation56_spill]] }
  0xdf   : > { %s5346_s12 = sshll.u32 %s7325_s17, 2  ;;  %s5343_s4 = sshll.u32 %s10462_s7, 3 }
  0xe0   : > { %s10268_s25 = sld [smem:[#allocation57_spill]]  ;;  %s10269_s15 = sld [smem:[#allocation63_spill]] }
  0xe1   : > { %s10270_s14 = sld [smem:[#allocation64_spill]]  ;;  %s7358_s19 = scalar_lea.vmem [#allocation12], %s5340_s5 }
  0xe2   : > { %s7335_s8 = scalar_lea.vmem %s10266_s21, %s5346_s12  ;;  %s7356_s12 = scalar_lea.vmem [#allocation11], %s7292_s20 }
  0xe3   : > { %s7360_s21 = scalar_lea.vmem [#allocation13], %s5341_s18  ;;  %p5347_p6 = scmp.ne.s32.totalorder %s6874_s27, 0 }
  0xe4   : > { %s7340_s3 = scalar_lea.vmem %s10267_s29, %s5343_s4  ;;  %v6903_v6 = vmov (!%p5347_p6), 0.0  }
  0xe5   : > { %717 = sbr.rel (%p5347_p6) target bundleno = 238 (0xee), region = 88  ;;  %v718_v0 = vld [vmem:[%s7340_s3] sm:$0xff] (!%p5347_p6)  ;;  %v719_v1 = vld [vmem:[%s7340_s3 + $0x8] sm:$0xff] (!%p5347_p6)  ;;  %v720_v2 = vld [vmem:[%s7340_s3 + $0x10] sm:$0xff] (!%p5347_p6)  ;;  %750 = vst [vmem:[%s7360_s21] sm:$0xff] (!%p5347_p6), %v6903_v6 }
  0xe6   : > { %s7345_s22 = scalar_lea.vmem %s10268_s25, %s5343_s4  ;;  %s708_s0 = scalar_lea.vmem %s10269_s15, %s7325_s17  ;;  %734 = vst [vmem:[#allocation2] sm:$0xff] (!%p5347_p6), %v718_v0  ;;  %735 = vst [vmem:[#allocation2 + $0x8] sm:$0xff] (!%p5347_p6), %v719_v1  ;;  %v721_v3 = vld [vmem:[%s7340_s3 + $0x18] sm:$0xff] (!%p5347_p6)  ;;  %v722_v4 = vld [vmem:[%s7340_s3 + $0x20] sm:$0xff] (!%p5347_p6) }
  0xe7   : > { %s711_s23 = scalar_lea.vmem %s10270_s14, %s7325_s17  ;;  %736 = vst [vmem:[#allocation2 + $0x10] sm:$0xff] (!%p5347_p6), %v720_v2  ;;  %v723_v5 = vld [vmem:[%s7340_s3 + $0x28] sm:$0xff] (!%p5347_p6)  ;;  %737 = vst [vmem:[#allocation2 + $0x18] sm:$0xff] (!%p5347_p6), %v721_v3  ;;  %v724_v7 = vld [vmem:[%s7340_s3 + $0x30] sm:$0xff] (!%p5347_p6) }
  0xe8   : > { %738 = vst [vmem:[#allocation2 + $0x20] sm:$0xff] (!%p5347_p6), %v722_v4  ;;  %739 = vst [vmem:[#allocation2 + $0x28] sm:$0xff] (!%p5347_p6), %v723_v5  ;;  %v725_v8 = vld [vmem:[%s7340_s3 + $0x38] sm:$0xff] (!%p5347_p6)  ;;  %v726_v9 = vld [vmem:[%s7340_s3 + $0x40] sm:$0xff] (!%p5347_p6) }
  0xe9   : > { %740 = vst [vmem:[#allocation2 + $0x30] sm:$0xff] (!%p5347_p6), %v724_v7  ;;  %741 = vst [vmem:[#allocation2 + $0x38] sm:$0xff] (!%p5347_p6), %v725_v8  ;;  %v727_v10 = vld [vmem:[%s7340_s3 + $0x48] sm:$0xff] (!%p5347_p6)  ;;  %v728_v11 = vld [vmem:[%s7340_s3 + $0x50] sm:$0xff] (!%p5347_p6) }
  0xea   : > { %742 = vst [vmem:[#allocation2 + $0x40] sm:$0xff] (!%p5347_p6), %v726_v9  ;;  %v729_v12 = vld [vmem:[%s7340_s3 + $0x58] sm:$0xff] (!%p5347_p6)  ;;  %743 = vst [vmem:[#allocation2 + $0x48] sm:$0xff] (!%p5347_p6), %v727_v10  ;;  %v730_v13 = vld [vmem:[%s7340_s3 + $0x60] sm:$0xff] (!%p5347_p6) }
  0xeb   : > { %744 = vst [vmem:[#allocation2 + $0x50] sm:$0xff] (!%p5347_p6), %v728_v11  ;;  %745 = vst [vmem:[#allocation2 + $0x58] sm:$0xff] (!%p5347_p6), %v729_v12  ;;  %v731_v14 = vld [vmem:[%s7340_s3 + $0x68] sm:$0xff] (!%p5347_p6)  ;;  %v732_v15 = vld [vmem:[%s7340_s3 + $0x70] sm:$0xff] (!%p5347_p6) }
  0xec   : > { %746 = vst [vmem:[#allocation2 + $0x60] sm:$0xff] %v730_v13  ;;  %747 = vst [vmem:[#allocation2 + $0x68] sm:$0xff] %v731_v14  ;;  %v733_v16 = vld [vmem:[%s7340_s3 + $0x78] sm:$0xff] }
  0xed   : > { %748 = vst [vmem:[#allocation2 + $0x70] sm:$0xff] %v732_v15  ;;  %749 = vst [vmem:[#allocation2 + $0x78] sm:$0xff] %v733_v16 }
  0xee PF: > { %v5890_v29 = vld [vmem:[%s7295_s30 + $0x4] ss:$8 sps:$4 sm:$0xff]   ;;  %v5892_v30 = vld [vmem:[%s7295_s30] ss:$8 sps:$4 sm:$0xff]   ;;  %v5893_v33 = vld [vmem:[%s7295_s30 + $0x14] ss:$8 sps:$4 sm:$0xff]   ;;  %v10137_v10 = vlaneseq }
  0xef   : > { %v7380_v17 = vld [vmem:[#allocation2] sm:$0xff]  ;;  %v7384_v19 = vld [vmem:[#allocation2 + $0x8] sm:$0xff]  ;;  %v5895_v34 = vld [vmem:[%s7295_s30 + $0x10] ss:$8 sps:$4 sm:$0xff]   ;;  %1007 = vmatprep.subr.bf16.mxu0 %v5890_v29  ;;  %v10138_v1 = vmov 0   ;;  %s10271_s10 = sld [smem:[#allocation58_spill]] }
  0xf0   : > { %v7382_v18 = vld [vmem:[#allocation2 + $0x10] sm:$0xff]  ;;  %v768_v20 = vmul.f32 %v7380_v17, %v7380_v17  ;;  %v7390_v22 = vld [vmem:[#allocation2 + $0x18] sm:$0xff]  ;;  %v769_v23 = vmul.f32 %v7384_v19, %v7384_v19  ;;  %1008 = vmatpush1.bf16.msra.mxu0 %v5892_v30  ;;  %v5896_v43 = vld [vmem:[%s7295_s30 + $0x24] ss:$8 sps:$4 sm:$0xff]   ;;  %1039 = vmatprep.mubr.bf16.mxu0 %v10138_v1  ;;  %v7465_v15 = vshrl.u32 %v10137_v10, 7  ;;  %p5445_p9 = scmp.ne.s32.totalorder %s6874_s27, 1 }
  0xf1   : > { %v770_v21 = vmul.f32 %v7382_v18, %v7382_v18  ;;  %v771_v24 = vmul.f32 %v7390_v22, %v7390_v22  ;;  %v7396_v25 = vld [vmem:[#allocation2 + $0x28] sm:$0xff]  ;;  %v7398_v26 = vld [vmem:[#allocation2 + $0x20] sm:$0xff]  ;;  %1009 = vmatprep.subr.bf16.mxu0 %v5893_v33  ;;  %v5899_v49 = vld [vmem:[%s7295_s30 + $0x34] ss:$8 sps:$4 sm:$0xff]   ;;  %2679 = vmatprep.mubr.bf16.mxu1 %v10138_v1 }
  0xf2   : > { %784 = vadd.xlane.f32.xlu0 %v768_v20  ;;  %v7400_v27 = vld [vmem:[#allocation2 + $0x38] sm:$0xff]  ;;  %v7402_v28 = vld [vmem:[#allocation2 + $0x30] sm:$0xff]  ;;  %v773_v31 = vmul.f32 %v7396_v25, %v7396_v25  ;;  %v772_v32 = vmul.f32 %v7398_v26, %v7398_v26  ;;  %v5898_v44 = vld [vmem:[%s7295_s30 + $0x20] ss:$8 sps:$4 sm:$0xff]   ;;  %5889 = vset.pattern.permute.xlu1 %v10138_v1  ;;  %v7473_v29 = vsub.s32 0, %v7465_v15  ;;  %vm1649_vm1 = vcmp.lt.s32.totalorder %v7465_v15, 1 }
  0xf3   : > { %788 = vadd.xlane.f32.xlu1 %v770_v21  ;;  %v7412_v35 = vld [vmem:[#allocation2 + $0x48] sm:$0xff]  ;;  %v7414_v36 = vld [vmem:[#allocation2 + $0x40] sm:$0xff]  ;;  %v775_v37 = vmul.f32 %v7400_v27, %v7400_v27  ;;  %v774_v38 = vmul.f32 %v7402_v28, %v7402_v28  ;;  %v5901_v50 = vld [vmem:[%s7295_s30 + $0x30] ss:$8 sps:$4 sm:$0xff]   ;;  %5888 = vset.pattern.permute.xlu0 %v10138_v1  ;;  %vm1746_vm6 = vcmp.lt.s32.totalorder %v7465_v15, 2  ;;  %vm1843_vm10 = vcmp.lt.s32.totalorder %v7465_v15, 4 }
  0xf4   : > { %1010 = vmatpush1.bf16.msra.mxu0 %v5895_v34  ;;  %v7420_v39 = vld [vmem:[#allocation2 + $0x58] sm:$0xff]  ;;  %v7422_v40 = vld [vmem:[#allocation2 + $0x50] sm:$0xff]  ;;  %v777_v41 = vmul.f32 %v7412_v35, %v7412_v35  ;;  %v776_v42 = vmul.f32 %v7414_v36, %v7414_v36  ;;  %v7430_v45 = vld [vmem:[#allocation2 + $0x68] sm:$0xff]  ;;  %10273 = vst [vmem:[#allocation35_spill] sm:$0xff] %v7473_v29 }
  0xf5   : > { %v7432_v46 = vld [vmem:[#allocation2 + $0x60] sm:$0xff]  ;;  %1011 = vmatprep.subr.bf16.mxu0 %v5896_v43  ;;  %v779_v47 = vmul.f32 %v7420_v39, %v7420_v39  ;;  %v778_v48 = vmul.f32 %v7422_v40, %v7422_v40  ;;  %v7440_v51 = vld [vmem:[#allocation2 + $0x78] sm:$0xff]  ;;  %v7442_v52 = vld [vmem:[#allocation2 + $0x70] sm:$0xff]  ;;  %v781_v53 = vmul.f32 %v7430_v45, %v7430_v45  ;;  %s10272_s25 = scalar_lea.vmem %s10271_s10, %s7325_s17 }
  0xf6   : > { %786 = vadd.xlane.f32.xlu0 %v769_v23  ;;  %v780_v54 = vmul.f32 %v7432_v46, %v7432_v46  ;;  %v5902_v55 = vld [vmem:[%s7295_s30 + $0x44] ss:$8 sps:$4 sm:$0xff]   ;;  %v5904_v56 = vld [vmem:[%s7295_s30 + $0x40] ss:$8 sps:$4 sm:$0xff]   ;;  %v783_v57 = vmul.f32 %v7440_v51, %v7440_v51  ;;  %v782_v58 = vmul.f32 %v7442_v52, %v7442_v52  ;;  %v5905_v59 = vld [vmem:[%s7295_s30 + $0x54] ss:$8 sps:$4 sm:$0xff]  }
  0xf7   : > { %790 = vadd.xlane.f32.xlu1 %v771_v24  ;;  %v5907_v60 = vld [vmem:[%s7295_s30 + $0x50] ss:$8 sps:$4 sm:$0xff]   ;;  %v5908_v61 = vld [vmem:[%s7295_s30 + $0x64] ss:$8 sps:$4 sm:$0xff]   ;;  %v5910_v62 = vld [vmem:[%s7295_s30 + $0x60] ss:$8 sps:$4 sm:$0xff]  }
  0xf8   : > { %1012 = vmatpush1.bf16.msra.mxu0 %v5898_v44  ;;  %v5911_v63 = vld [vmem:[%s7295_s30 + $0x74] ss:$8 sps:$4 sm:$0xff]   ;;  %v5913_v0 = vld [vmem:[%s7295_s30 + $0x70] ss:$8 sps:$4 sm:$0xff]   ;;  %v767_v16 = vld [vmem:[%s10272_s25] sm:$0x1] }
  0xf9   : > { %1013 = vmatprep.subr.bf16.mxu0 %v5899_v49  ;;  %v880_v24 = vadd.f32 1.0, %v767_v16 }
  0xfa   : > { %792 = vadd.xlane.f32.xlu0 %v772_v32 }
  0xfb   : > { %794 = vadd.xlane.f32.xlu1 %v773_v31 }
  0xfc   : > { %1014 = vmatpush1.bf16.msra.mxu0 %v5901_v50 }
  0xfd   : > { %1015 = vmatprep.subr.bf16.mxu0 %v5902_v55 }
  0xfe   : > { %796 = vadd.xlane.f32.xlu0 %v774_v38 }
  0xff   : > { %798 = vadd.xlane.f32.xlu1 %v775_v37 }
 0x100   : > { %1016 = vmatpush1.bf16.msra.mxu0 %v5904_v56 }
 0x101   : > { %1017 = vmatprep.subr.bf16.mxu0 %v5905_v59 }
 0x102   : > { %800 = vadd.xlane.f32.xlu0 %v776_v42  ;;  %v7477_v42 = vrot.slane %v880_v24, %v7473_v29 }
 0x103   : > { %802 = vadd.xlane.f32.xlu1 %v777_v41 }
 0x104   : > { %1018 = vmatpush1.bf16.msra.mxu0 %v5907_v60 }
 0x105   : > { %1019 = vmatprep.subr.bf16.mxu0 %v5908_v61 }
 0x106   : > { %804 = vadd.xlane.f32.xlu0 %v778_v48 }
 0x107   : > { %806 = vadd.xlane.f32.xlu1 %v779_v47 }
 0x108   : > { %1020 = vmatpush1.bf16.msra.mxu0 %v5910_v62 }
 0x109   : > { %1021 = vmatprep.subr.bf16.mxu0 %v5911_v63 }
 0x10a   : > { %808 = vadd.xlane.f32.xlu0 %v780_v54 }
 0x10b   : > { %810 = vadd.xlane.f32.xlu1 %v781_v53 }
 0x10c   : > { %1022 = vmatpush1.bf16.msra.mxu0 %v5913_v0 }
 0x10e   : > { %812 = vadd.xlane.f32.xlu0 %v782_v58 }
 0x10f   : > { %814 = vadd.xlane.f32.xlu1 %v783_v57 }
 0x17f   : > { %v785_v2 = vpop.xlane.xlu0 %784 }
 0x180   : > { %v789_v3 = vpop.xlane.xlu1 %788  ;;  %v816_v4 = vmax.f32 %v785_v2, 1e-24 }
 0x181   : > { %v818_v5 = vmax.f32 %v789_v3, 1e-24 }
 0x182   : > { %6018 = vrsqrt.f32 %v816_v4 }
 0x183   : > { %v787_v6 = vpop.xlane.xlu0 %786  ;;  %6020 = vrsqrt.f32 %v818_v5 }
 0x184   : > { %v791_v7 = vpop.xlane.xlu1 %790  ;;  %v817_v8 = vmax.f32 %v787_v6, 1e-24 }
 0x185   : > { %v819_v9 = vmax.f32 %v791_v7, 1e-24 }
 0x186   : > { %6022 = vrsqrt.f32 %v817_v8 }
 0x187   : > { %6024 = vrsqrt.f32 %v819_v9  ;;  %v793_v12 = vpop.xlane.xlu0 %792 }
 0x188   : > { %v795_v11 = vpop.xlane.xlu1 %794  ;;  %v820_v14 = vmax.f32 %v793_v12, 1e-24 }
 0x189   : > { %v821_v13 = vmax.f32 %v795_v11, 1e-24 }
 0x18b   : > { %6026 = vrsqrt.f32 %v821_v13  ;;  %v797_v30 = vpop.xlane.xlu0 %796 }
 0x18c   : > { %v6019_v20 = vpop.eup %6018  ;;  %6028 = vrsqrt.f32 %v820_v14  ;;  %v799_v21 = vpop.xlane.xlu1 %798  ;;  %v822_v34 = vmax.f32 %v797_v30, 1e-24 }
 0x18d   : > { %v848_v23 = vmul.f32 11.313708, %v6019_v20  ;;  %v6021_v31 = vpop.eup %6020  ;;  %v823_v32 = vmax.f32 %v799_v21, 1e-24 }
 0x18e   : > { %v850_v43 = vmul.f32 11.313708, %v6021_v31 }
 0x18f   : > { %v864_v38 = vmul.f32 %v848_v23, %v7380_v17  ;;  %6030 = vrsqrt.f32 %v823_v32  ;;  %v801_v54 = vpop.xlane.xlu0 %800 }
 0x190   : > { %v6023_v33 = vpop.eup %6022  ;;  %6032 = vrsqrt.f32 %v822_v34  ;;  %v803_v48 = vpop.xlane.xlu1 %802  ;;  %v866_v55 = vmul.f32 %v850_v43, %v7382_v18  ;;  %v824_v58 = vmax.f32 %v801_v54, 1e-24 }
 0x191   : > { %v6025_v37 = vpop.eup %6024  ;;  %v849_v41 = vmul.f32 11.313708, %v6023_v33  ;;  %v7481_v50 = vmul.f32 %v7477_v42, %v864_v38  ;;  %v825_v57 = vmax.f32 %v803_v48, 1e-24 }
 0x192   : > { %v851_v47 = vmul.f32 11.313708, %v6025_v37  ;;  %v7492_v61 = vmul.f32 %v7477_v42, %v866_v55 }
 0x193   : > { %v865_v44 = vmul.f32 %v849_v41, %v7384_v19  ;;  %10274 = vst [vmem:[#allocation36_spill] sm:$0xff] %v7481_v50  ;;  %6034 = vrsqrt.f32 %v825_v57  ;;  %v805_v2 = vpop.xlane.xlu0 %804 }
 0x194   : > { %v867_v56 = vmul.f32 %v851_v47, %v7390_v22  ;;  %10276 = vst [vmem:[#allocation38_spill] sm:$0xff] %v7492_v61  ;;  %6036 = vrsqrt.f32 %v824_v58  ;;  %v807_v18 = vpop.xlane.xlu1 %806  ;;  %v826_v6 = vmax.f32 %v805_v2, 1e-24 }
 0x195   : > { %v6027_v49 = vpop.eup %6026  ;;  %v7484_v53 = vmul.f32 %v7477_v42, %v865_v44  ;;  %v827_v5 = vmax.f32 %v807_v18, 1e-24 }
 0x196   : > { %v6029_v17 = vpop.eup %6028  ;;  %v853_v59 = vmul.f32 11.313708, %v6027_v49  ;;  %v7495_v62 = vmul.f32 %v7477_v42, %v867_v56 }
 0x197   : > { %10275 = vst [vmem:[#allocation37_spill] sm:$0xff] %v7484_v53  ;;  %v903_v19 = vpack.c.bf16 %v7484_v53, %v7481_v50  ;;  %v852_v60 = vmul.f32 11.313708, %v6029_v17  ;;  %6038 = vrsqrt.f32 %v827_v5  ;;  %v809_v16 = vpop.xlane.xlu0 %808 }
 0x198   : > { %10277 = vst [vmem:[#allocation39_spill] sm:$0xff] %v7495_v62  ;;  %v869_v63 = vmul.f32 %v853_v59, %v7396_v25  ;;  %v904_v4 = vpack.c.bf16 %v7495_v62, %v7492_v61  ;;  %6040 = vrsqrt.f32 %v826_v6  ;;  %v811_v25 = vpop.xlane.xlu1 %810  ;;  %v828_v23 = vmax.f32 %v809_v16, 1e-24 }
 0x199   : > { %1040 = vmatmul.mubr.bf16.vlgmr.msra.gmra.mrb[0].mxu0 %v903_v19  ;;  %v6031_v22 = vpop.eup %6030  ;;  %v868_v0 = vmul.f32 %v852_v60, %v7398_v26  ;;  %v829_v21 = vmax.f32 %v811_v25, 1e-24 }
 0x19a   : > { %1049 = vmatprep.mubr.bf16.mxu0 %v10138_v1  ;;  %v6033_v3 = vpop.eup %6032  ;;  %v855_v7 = vmul.f32 11.313708, %v6031_v22  ;;  %v7505_v11 = vmul.f32 %v7477_v42, %v869_v63 }
 0x19b   : > { %v854_v8 = vmul.f32 11.313708, %v6033_v3  ;;  %v7502_v9 = vmul.f32 %v7477_v42, %v868_v0  ;;  %6042 = vrsqrt.f32 %v829_v21  ;;  %v813_v38 = vpop.xlane.xlu0 %812 }
 0x19c   : > { %10279 = vst [vmem:[#allocation41_spill] sm:$0xff] %v7505_v11  ;;  %v871_v12 = vmul.f32 %v855_v7, %v7400_v27  ;;  %6044 = vrsqrt.f32 %v828_v23  ;;  %v815_v27 = vpop.xlane.xlu1 %814  ;;  %v830_v44 = vmax.f32 %v813_v38, 1e-24 }
 0x19d   : > { %10278 = vst [vmem:[#allocation40_spill] sm:$0xff] %v7502_v9  ;;  %v6035_v26 = vpop.eup %6034  ;;  %v870_v13 = vmul.f32 %v854_v8, %v7402_v28  ;;  %v905_v14 = vpack.c.bf16 %v7505_v11, %v7502_v9  ;;  %v831_v43 = vmax.f32 %v815_v27, 1e-24 }
 0x19e   : > { %v6037_v20 = vpop.eup %6036  ;;  %v857_v24 = vmul.f32 11.313708, %v6035_v26  ;;  %v7516_v32 = vmul.f32 %v7477_v42, %v871_v12 }
 0x19f   : > { %v856_v30 = vmul.f32 11.313708, %v6037_v20  ;;  %v7513_v31 = vmul.f32 %v7477_v42, %v870_v13  ;;  %6046 = vrsqrt.f32 %v831_v43 }
 0x1a0   : > { %10281 = vst [vmem:[#allocation43_spill] sm:$0xff] %v7516_v32  ;;  %v873_v33 = vmul.f32 %v857_v24, %v7412_v35  ;;  %6048 = vrsqrt.f32 %v830_v44 }
 0x1a1   : > { %1050 = vmatmul.mubr.bf16.gmra.mrb[4].mxu0 %v904_v4  ;;  %10280 = vst [vmem:[#allocation42_spill] sm:$0xff] %v7513_v31  ;;  %v6039_v28 = vpop.eup %6038  ;;  %v872_v34 = vmul.f32 %v856_v30, %v7414_v36  ;;  %v906_v37 = vpack.c.bf16 %v7516_v32, %v7513_v31 }
 0x1a2   : > { %1059 = vmatprep.mubr.bf16.mxu0 %v10138_v1  ;;  %v6041_v41 = vpop.eup %6040  ;;  %v859_v47 = vmul.f32 11.313708, %v6039_v28  ;;  %v7527_v54 = vmul.f32 %v7477_v42, %v873_v33 }
 0x1a3   : > { %v858_v48 = vmul.f32 11.313708, %v6041_v41  ;;  %v7524_v49 = vmul.f32 %v7477_v42, %v872_v34 }
 0x1a4   : > { %10283 = vst [vmem:[#allocation45_spill] sm:$0xff] %v7527_v54  ;;  %v875_v36 = vmul.f32 %v859_v47, %v7420_v39 }
 0x1a5   : > { %10282 = vst [vmem:[#allocation44_spill] sm:$0xff] %v7524_v49  ;;  %v6043_v35 = vpop.eup %6042  ;;  %v874_v17 = vmul.f32 %v858_v48, %v7422_v40  ;;  %v907_v55 = vpack.c.bf16 %v7527_v54, %v7524_v49 }
 0x1a6   : > { %v6045_v56 = vpop.eup %6044  ;;  %v861_v19 = vmul.f32 11.313708, %v6043_v35  ;;  %v7538_v59 = vmul.f32 %v7477_v42, %v875_v36 }
 0x1a7   : > { %v860_v57 = vmul.f32 11.313708, %v6045_v56  ;;  %v7535_v58 = vmul.f32 %v7477_v42, %v874_v17 }
 0x1a8   : > { %10285 = vst [vmem:[#allocation47_spill] sm:$0xff] %v7538_v59  ;;  %v877_v39 = vmul.f32 %v861_v19, %v7430_v45 }
 0x1a9   : > { %1060 = vmatmul.mubr.bf16.gmra.mrb[8].mxu0 %v905_v14  ;;  %10284 = vst [vmem:[#allocation46_spill] sm:$0xff] %v7535_v58  ;;  %v6047_v60 = vpop.eup %6046  ;;  %v876_v40 = vmul.f32 %v860_v57, %v7432_v46  ;;  %v908_v18 = vpack.c.bf16 %v7538_v59, %v7535_v58 }
 0x1aa   : > { %1069 = vmatprep.mubr.bf16.mxu0 %v10138_v1  ;;  %v6049_v22 = vpop.eup %6048  ;;  %v863_v63 = vmul.f32 11.313708, %v6047_v60  ;;  %v7549_v3 = vmul.f32 %v7477_v42, %v877_v39 }
 0x1ab   : > { %v862_v0 = vmul.f32 11.313708, %v6049_v22  ;;  %v7546_v2 = vmul.f32 %v7477_v42, %v876_v40 }
 0x1ac   : > { %10287 = vst [vmem:[#allocation49_spill] sm:$0xff] %v7549_v3  ;;  %v879_v4 = vmul.f32 %v863_v63, %v7440_v51  ;;  %v1539_v63 = vadd.s32 16, %v7465_v15 }
 0x1ad   : > { %10286 = vst [vmem:[#allocation48_spill] sm:$0xff] %v7546_v2  ;;  %v878_v45 = vmul.f32 %v862_v0, %v7442_v52  ;;  %v909_v46 = vpack.c.bf16 %v7549_v3, %v7546_v2 }
 0x1ae   : > { %v7560_v6 = vmul.f32 %v7477_v42, %v879_v4 }
 0x1af   : > { %v7557_v5 = vmul.f32 %v7477_v42, %v878_v45 }
 0x1b0   : > { %10289 = vst [vmem:[#allocation51_spill] sm:$0xff] %v7560_v6 }
 0x1b1   : > { %1070 = vmatmul.mubr.bf16.gmra.mrb[12].mxu0 %v906_v37  ;;  %10288 = vst [vmem:[#allocation50_spill] sm:$0xff] %v7557_v5  ;;  %v910_v7 = vpack.c.bf16 %v7560_v6, %v7557_v5 }
 0x1b2   : > { %1079 = vmatprep.mubr.bf16.mxu0 %v10138_v1 }
 0x1b9   : > { %1080 = vmatmul.mubr.bf16.gmra.mrb[16].mxu0 %v907_v55 }
 0x1ba   : > { %1089 = vmatprep.mubr.bf16.mxu0 %v10138_v1 }
 0x1c1   : > { %1090 = vmatmul.mubr.bf16.gmra.mrb[20].mxu0 %v908_v18 }
 0x1c2   : > { %1099 = vmatprep.mubr.bf16.mxu0 %v10138_v1 }
 0x1c9   : > { %1100 = vmatmul.mubr.bf16.gmra.mrb[24].mxu0 %v909_v46 }
 0x1ca   : > { %1109 = vmatprep.mubr.bf16.mxu0 %v10138_v1 }
 0x1d1   : > { %1110 = vmatmul.mubr.bf16.gmra.mrb[28].mxu0 %v910_v7 }
 0x1d2   : > { %2792 = vmatprep.mubr.bf16.mxu0 %v10138_v1 }
 0x26c   : > { %v7566_v51 = vpop.f32.mrb[0].mxu0 }
 0x26d   : > { %v1296_v52 = vand.u32 2147483647, %v7566_v51  ;;  %v7569_v8 = vpop.f32.mrb[1].mxu0  ;;  %v1376_v23 = vmax.f32 %v7566_v51, 0.0  ;;  %vm1360_vm0 = vcmp.ge.f32.partialorder %v7566_v51, 0.0 }
 0x26e   : > { %v1136_v25 = vand.u32 2147483647, %v7569_v8  ;;  %v7572_v26 = vpop.f32.mrb[2].mxu0 }
 0x26f   : > { %v1312_v42 = vsub.f32 0.0, %v1296_v52  ;;  %v1297_v12 = vand.u32 2147483647, %v7572_v26  ;;  %v7575_v13 = vpop.f32.mrb[3].mxu0  ;;  %v1392_v38 = vadd.f32 0.5, %v1376_v23  ;;  %v1377_v41 = vmax.f32 %v7572_v26, 0.0 }
 0x270   : > { %v1152_v14 = vsub.f32 0.0, %v1136_v25  ;;  %v1137_v16 = vand.u32 2147483647, %v7575_v13  ;;  %v1541_v52 = vadd.s32 32, %v7465_v15  ;;  %vm1361_vm2 = vcmp.ge.f32.partialorder %v7572_v26, 0.0 }
 0x271   : > { %v1328_v20 = vmul.f32 1.442695, %v1312_v42  ;;  %v1313_v21 = vsub.f32 0.0, %v1297_v12  ;;  %v1393_v19 = vadd.f32 0.5, %v1377_v41  ;;  %v1543_v42 = vadd.s32 48, %v7465_v15 }
 0x272   : > { %v1168_v24 = vmul.f32 1.442695, %v1152_v14  ;;  %v1153_v30 = vsub.f32 0.0, %v1137_v16 }
 0x273   : > { %6050 = vpow2.f32 %v1328_v20  ;;  %v1330_v27 = vmul.f32 1.442695, %v1313_v21 }
 0x274   : > { %6052 = vpow2.f32 %v1168_v24  ;;  %v1170_v28 = vmul.f32 1.442695, %v1153_v30  ;;  %v7579_v33 = vpop.f32.mrb[4].mxu0 }
 0x275   : > { %6054 = vpow2.f32 %v1330_v27  ;;  %v1298_v34 = vand.u32 2147483647, %v7579_v33  ;;  %v7582_v37 = vpop.f32.mrb[5].mxu0  ;;  %v1378_v40 = vmax.f32 %v7579_v33, 0.0  ;;  %vm1362_vm3 = vcmp.ge.f32.partialorder %v7579_v33, 0.0 }
 0x276   : > { %v1138_v43 = vand.u32 2147483647, %v7582_v37  ;;  %v7586_v44 = vpop.f32.mrb[6].mxu0  ;;  %6056 = vpow2.f32 %v1170_v28 }
 0x277   : > { %v1314_v47 = vsub.f32 0.0, %v1298_v34  ;;  %v1299_v48 = vand.u32 2147483647, %v7586_v44  ;;  %v7589_v35 = vpop.f32.mrb[7].mxu0  ;;  %6058 = vlog2.f32 %v1392_v38  ;;  %v1394_v24 = vadd.f32 0.5, %v1378_v40 }
 0x278   : > { %v1154_v36 = vsub.f32 0.0, %v1138_v43  ;;  %v1139_v56 = vand.u32 2147483647, %v7589_v35  ;;  %v1379_v28 = vmax.f32 %v7586_v44, 0.0  ;;  %v7618_v40 = vand.u32 15, %v1543_v42 }
 0x279   : > { %v1332_v17 = vmul.f32 1.442695, %v1314_v47  ;;  %v1315_v55 = vsub.f32 0.0, %v1299_v48  ;;  %v7608_v47 = vand.u32 15, %v1539_v63  ;;  %v1121_v42 = vmax.f32 %v7575_v13, 0.0 }
 0x27a   : > { %v1172_v57 = vmul.f32 1.442695, %v1154_v36  ;;  %v1155_v39 = vsub.f32 0.0, %v1139_v56  ;;  %vm1363_vm5 = vcmp.ge.f32.partialorder %v7586_v44, 0.0  ;;  %vm1575_vm15 = vcmp.ge.s32.totalorder %v7618_v40, 1 }
 0x27b   : > { %6060 = vpow2.f32 %v1332_v17  ;;  %v1334_v60 = vmul.f32 1.442695, %v1315_v55  ;;  %v7612_v17 = vand.u32 15, %v1541_v52  ;;  %vm1571_vm4 = vcmp.ge.s32.totalorder %v7608_v47, 1 }
 0x27c   : > { %6062 = vpow2.f32 %v1172_v57  ;;  %v7593_v18 = vpop.f32.mrb[8].mxu0  ;;  %v1174_v0 = vmul.f32 1.442695, %v1155_v39  ;;  %v1120_v57 = vmax.f32 %v7569_v8, 0.0  ;;  %vm10170_vm7 = vcmp.ge.s32.totalorder %v7608_v47, 2 }
 0x27d   : > { %v6051_v22 = vpop.eup %6050  ;;  %6064 = vpow2.f32 %v1334_v60  ;;  %v1300_v4 = vand.u32 2147483647, %v7593_v18  ;;  %v7597_v45 = vpop.f32.mrb[9].mxu0  ;;  %v1395_v60 = vadd.f32 0.5, %v1379_v28  ;;  %vm1364_vm8 = vcmp.ge.f32.partialorder %v7593_v18, 0.0 }
 0x27e   : > { %v6053_v46 = vpop.eup %6052  ;;  %v1440_v7 = vadd.f32 1.0, %v6051_v22  ;;  %6066 = vlog2.f32 %v1393_v19  ;;  %v7600_v25 = vpop.f32.mrb[10].mxu0  ;;  %v1140_v20 = vand.u32 2147483647, %v7597_v45  ;;  %vm10171_vm9 = vcmp.ge.s32.totalorder %v7612_v17, 1 }
 0x27f   : > { %v6055_v12 = vpop.eup %6054  ;;  %v1200_v14 = vadd.f32 1.0, %v6053_v46  ;;  %6068 = vpow2.f32 %v1174_v0  ;;  %v1316_v16 = vsub.f32 0.0, %v1300_v4  ;;  %v7604_v21 = vpop.f32.mrb[11].mxu0  ;;  %v1301_v30 = vand.u32 2147483647, %v7600_v25 }
 0x280   : > { %6070 = vlog2.f32 %v1440_v7  ;;  %v1441_v23 = vadd.f32 1.0, %v6055_v12  ;;  %v6057_v27 = vpop.eup %6056  ;;  %v1156_v38 = vsub.f32 0.0, %v1140_v20  ;;  %v1141_v56 = vand.u32 2147483647, %v7604_v21 }
 0x281   : > { %6072 = vlog2.f32 %v1200_v14  ;;  %v1336_v34 = vmul.f32 1.442695, %v1316_v16  ;;  %v1201_v41 = vadd.f32 1.0, %v6057_v27  ;;  %v1317_v43 = vsub.f32 0.0, %v1301_v30  ;;  %v7610_v36 = vpop.eup %6058 }
 0x282   : > { %6074 = vlog2.f32 %v1441_v23  ;;  %v1176_v48 = vmul.f32 1.442695, %v1156_v38  ;;  %v1157_v0 = vsub.f32 0.0, %v1141_v56  ;;  %v1380_v12 = vmax.f32 %v7593_v18, 0.0 }
 0x283   : > { %6076 = vpow2.f32 %v1336_v34  ;;  %v1338_v55 = vmul.f32 1.442695, %v1317_v43  ;;  %v1381_v14 = vmax.f32 %v7600_v25, 0.0  ;;  %v1409_v34 = vmul.f32 0.6931472, %v7610_v36 }
 0x284   : > { %6078 = vlog2.f32 %v1201_v41  ;;  %v7616_v39 = vpop.f32.mrb[12].mxu0  ;;  %v1178_v38 = vmul.f32 1.442695, %v1157_v0  ;;  %vm10167_vm11 = vcmp.ge.s32.totalorder %v7612_v17, 2  ;;  %vm1365_vm12 = vcmp.ge.f32.partialorder %v7600_v25, 0.0 }
 0x285   : > { %v6061_v19 = vpop.eup %6060  ;;  %6080 = vlog2.f32 %v1394_v24  ;;  %v1302_v4 = vand.u32 2147483647, %v7616_v39  ;;  %v7621_v46 = vpop.f32.mrb[13].mxu0  ;;  %vm10166_vm13 = vcmp.ge.s32.totalorder %v7612_v17, 4  ;;  %vm1366_vm14 = vcmp.ge.f32.partialorder %v7616_v39, 0.0 }
 0x286   : > { %v6063_v22 = vpop.eup %6062  ;;  %v1442_v63 = vadd.f32 1.0, %v6061_v19  ;;  %6082 = vpow2.f32 %v1176_v48  ;;  %v7625_v16 = vpop.f32.mrb[14].mxu0 }
 0x287   : > { %v6065_v7 = vpop.eup %6064  ;;  %v1202_v52 = vadd.f32 1.0, %v6063_v22  ;;  %6084 = vpow2.f32 %v1338_v55  ;;  %v1318_v24 = vsub.f32 0.0, %v1302_v4  ;;  %v7628_v30 = vpop.f32.mrb[15].mxu0  ;;  %v1142_v55 = vand.u32 2147483647, %v7621_v46 }
 0x288   : > { %v6067_v20 = vpop.eup %6066  ;;  %6086 = vlog2.f32 %v1442_v63  ;;  %v1443_v23 = vadd.f32 1.0, %v6065_v7  ;;  %v1396_v22 = vadd.f32 0.5, %v1380_v12  ;;  %v1397_v63 = vadd.f32 0.5, %v1381_v14 }
 0x289   : > { %v6069_v27 = vpop.eup %6068  ;;  %6088 = vlog2.f32 %v1202_v52  ;;  %v1340_v48 = vmul.f32 1.442695, %v1318_v24  ;;  %v1382_v52 = vmax.f32 %v7616_v39, 0.0  ;;  %v1158_v10 = vsub.f32 0.0, %v1142_v55 }
 0x28a   : > { %v6071_v41 = vpop.eup %6070  ;;  %6090 = vlog2.f32 %v1443_v23  ;;  %v1203_v43 = vadd.f32 1.0, %v6069_v27  ;;  %v1411_v5 = vmul.f32 0.6931472, %v6067_v20 }
 0x28b   : > { %v6073_v56 = vpop.eup %6072  ;;  %v1457_v19 = vmul.f32 0.6931472, %v6071_v41  ;;  %6092 = vlog2.f32 %v1395_v60  ;;  %v1303_v60 = vand.u32 2147483647, %v7625_v16 }
 0x28c   : > { %v6075_v4 = vpop.eup %6074  ;;  %v1217_v7 = vmul.f32 0.6931472, %v6073_v56  ;;  %6094 = vlog2.f32 %v1203_v43  ;;  %v7636_v0 = vpop.f32.mrb[16].mxu0  ;;  %v1180_v43 = vmul.f32 1.442695, %v1158_v10 }
 0x28d   : > { %v6077_v23 = vpop.eup %6076  ;;  %v1488_v24 = vsub.f32 %v7566_v51, %v1457_v19  ;;  %v1459_v27 = vmul.f32 0.6931472, %v6075_v4  ;;  %6096 = vpow2.f32 %v1178_v38  ;;  %v7641_v12 = vpop.f32.mrb[17].mxu0 }
 0x28e   : > { %v6079_v14 = vpop.eup %6078  ;;  %v1248_v41 = vadd.f32 %v1217_v7, %v1120_v57  ;;  %v1444_v56 = vadd.f32 1.0, %v6077_v23  ;;  %6098 = vpow2.f32 %v1340_v48  ;;  %v7643_v1 = vpop.f32.mrb[18].mxu0  ;;  %v1398_v57 = vadd.f32 0.5, %v1382_v52 }
 0x28f   : > { %v6081_v55 = vpop.eup %6080  ;;  %v1219_v28 = vmul.f32 0.6931472, %v6079_v14  ;;  %6100 = vlog2.f32 %v1396_v22  ;;  %v7647_v4 = vpop.f32.mrb[19].mxu0  ;;  %v1319_v23 = vsub.f32 0.0, %v1303_v60  ;;  %v1504_v14 = vsel %vm1360_vm0, %v1409_v34, %v1488_v24 }
 0x290   : > { %v6083_v38 = vpop.eup %6082  ;;  %v7649_v29 = vsub.f32 0.0, %v1248_v41  ;;  %6102 = vlog2.f32 %v1444_v56  ;;  %v1489_v41 = vsub.f32 %v7572_v26, %v1459_v27  ;;  %v1413_v60 = vmul.f32 0.6931472, %v6081_v55 }
 0x291   : > { %v6085_v7 = vpop.eup %6084  ;;  %v1249_v48 = vadd.f32 %v1219_v28, %v1121_v42  ;;  %v1204_v10 = vadd.f32 1.0, %v6083_v38  ;;  %6104 = vpow2.f32 %v1180_v43  ;;  %v10290_v55 = vmax.f32 %v7582_v37, 0.0 }
 0x292   : > { %v6087_v36 = vpop.eup %6086  ;;  %v1280_v22 = vadd.f32 %v7649_v29, %v7569_v8  ;;  %6106 = vlog2.f32 %v1397_v63  ;;  %v1445_v28 = vadd.f32 1.0, %v6085_v7  ;;  %v10145_v34 = vrot.slane %v7649_v29, 7 }
 0x293   : > { %v6089_v20 = vpop.eup %6088  ;;  %v1265_v52 = vsub.f32 0.0, %v1249_v48  ;;  %v1461_v42 = vmul.f32 0.6931472, %v6087_v36  ;;  %6108 = vlog2.f32 %v1204_v10  ;;  %v1342_v63 = vmul.f32 1.442695, %v1319_v23 }
 0x294   : > { %v6091_v56 = vpop.eup %6090  ;;  %v7658_v43 = vadd.f32 %v1504_v14, %v1280_v22  ;;  %v1221_v38 = vmul.f32 0.6931472, %v6089_v20  ;;  %6110 = vlog2.f32 %v1398_v57  ;;  %v7660_v8 = vpop.f32.mrb[20].mxu0  ;;  %v1505_v7 = vsel %vm1361_vm2, %v1411_v5, %v1489_v41 }
 0x295   : > { %v6093_v51 = vpop.eup %6092  ;;  %v1281_v24 = vadd.f32 %v1265_v52, %v7575_v13  ;;  %v1634_v27 = vrot.slane %v1265_v52, 7  ;;  %v7664_v19 = vpop.f32.mrb[21].mxu0  ;;  %v1490_v10 = vsub.f32 %v7579_v33, %v1461_v42  ;;  %v1143_v36 = vand.u32 2147483647, %v7628_v30 }
 0x296   : > { %v6095_v48 = vpop.eup %6094  ;;  %v1250_v57 = vadd.f32 %v1221_v38, %v10290_v55  ;;  %v7673_v22 = vpop.f32.mrb[22].mxu0  ;;  %v1463_v5 = vmul.f32 0.6931472, %v6091_v56  ;;  %6112 = vlog2.f32 %v1445_v28  ;;  %v1415_v55 = vmul.f32 0.6931472, %v6093_v51 }
 0x297   : > { %v6097_v13 = vpop.eup %6096  ;;  %v7675_v14 = vadd.f32 %v1505_v7, %v1281_v24  ;;  %v1664_v26 = vsel %vm1649_vm1, %v10145_v34, %v1634_v27  ;;  %v7682_v23 = vpop.f32.mrb[23].mxu0  ;;  %v1223_v38 = vmul.f32 0.6931472, %v6095_v48  ;;  %6114 = vpow2.f32 %v1342_v63 }
 0x298   : > { %v6099_v41 = vpop.eup %6098  ;;  %v7684_v20 = vadd.f32 %v1664_v26, %v1265_v52  ;;  %v1266_v42 = vsub.f32 0.0, %v1250_v57  ;;  %v1205_v24 = vadd.f32 1.0, %v6097_v13  ;;  %v1159_v2 = vsub.f32 0.0, %v1143_v36 }
 0x299   : > { %v6101_v7 = vpop.eup %6100  ;;  %v1446_v6 = vadd.f32 1.0, %v6099_v41  ;;  %v1506_v28 = vsel %vm1362_vm3, %v1413_v60, %v1490_v10  ;;  %v10291_v52 = vmax.f32 %v7589_v35, 0.0  ;;  %v1491_v58 = vsub.f32 %v7586_v44, %v1463_v5 }
 0x29a   : > { %v6103_v34 = vpop.eup %6102  ;;  %v1282_v3 = vadd.f32 %v1266_v42, %v7582_v37  ;;  %v1635_v56 = vrot.slane %v1266_v42, 7  ;;  %6116 = vlog2.f32 %v1205_v24  ;;  %v1304_v51 = vand.u32 2147483647, %v7636_v0 }
 0x29b   : > { %v1251_v26 = vadd.f32 %v1223_v38, %v10291_v52  ;;  %v6105_v57 = vpop.eup %6104  ;;  %v1465_v48 = vmul.f32 0.6931472, %v6103_v34  ;;  %6118 = vlog2.f32 %v1446_v6  ;;  %v1383_v5 = vmax.f32 %v7625_v16, 0.0 }
 0x29c   : > { %v7694_v13 = vpop.eup %6106  ;;  %v7696_v63 = vadd.f32 %v1506_v28, %v1282_v3  ;;  %v1663_v37 = vsel %vm1649_vm1, %v1634_v27, %v1635_v56  ;;  %v7702_v60 = vpop.f32.mrb[24].mxu0  ;;  %v1206_v36 = vadd.f32 1.0, %v6105_v57  ;;  %v1182_v3 = vmul.f32 1.442695, %v1159_v2 }
 0x29d   : > { %v1267_v33 = vsub.f32 0.0, %v1251_v26  ;;  %v6109_v10 = vpop.eup %6108  ;;  %v1700_v34 = vsel %vm1571_vm4, %v1663_v37, 0.0  ;;  %v7707_v41 = vpop.f32.mrb[25].mxu0  ;;  %v1507_v37 = vsel %vm1363_vm5, %v1415_v55, %v1491_v58  ;;  %v1320_v2 = vsub.f32 0.0, %v1304_v51 }
 0x29e   : > { %v7709_v38 = vpop.eup %6110  ;;  %v1716_v27 = vadd.f32 %v1700_v34, %v1266_v42  ;;  %v1225_v52 = vmul.f32 0.6931472, %v6109_v10  ;;  %v7712_v6 = vpop.f32.mrb[26].mxu0  ;;  %6120 = vlog2.f32 %v1206_v36  ;;  %v10292_v42 = vmax.f32 %v7597_v45, 0.0 }
 0x29f   : > { %v1283_v24 = vadd.f32 %v1267_v33, %v7589_v35  ;;  %v1636_v28 = vrot.slane %v1267_v33, 7  ;;  %v7718_v57 = vpop.f32.mrb[27].mxu0  ;;  %v1492_v44 = vsub.f32 %v7593_v18, %v1465_v48  ;;  %v1125_v58 = vmax.f32 %v7604_v21, 0.0 }
 0x2a0   : > { %v1732_v59 = vrot.slane %v1716_v27, 6  ;;  %v1252_v10 = vadd.f32 %v1225_v52, %v10292_v42  ;;  %v6113_v34 = vpop.eup %6112  ;;  %v1126_v55 = vmax.f32 %v7621_v46, 0.0  ;;  %v10293_v51 = vrot.slane %v7684_v20, 6 }
 0x2a1   : > { %v7720_v49 = vadd.f32 %v1507_v37, %v1283_v24  ;;  %v1662_v35 = vsel %vm1649_vm1, %v1635_v56, %v1636_v28  ;;  %6122 = vpow2.f32 %v1182_v3  ;;  %v1344_v56 = vmul.f32 1.442695, %v1320_v2  ;;  %v6115_v52 = vpop.eup %6114 }
 0x2a2   : > { %v1717_v26 = vadd.f32 %v1662_v35, %v1267_v33  ;;  %v1760_v36 = vsel %vm1746_vm6, %v10293_v51, %v1732_v59  ;;  %v7733_v24 = vsub.f32 0.0, %v1252_v10  ;;  %v1417_v37 = vmul.f32 0.6931472, %v6101_v7 }
 0x2a3   : > { %v1797_v33 = vsel %vm10170_vm7, %v1760_v36, 0.0  ;;  %v7738_v35 = vadd.f32 0.5, %v1383_v5  ;;  %6124 = vpow2.f32 %v1344_v56  ;;  %v1467_v7 = vmul.f32 0.6931472, %v6113_v34 }
 0x2a4   : > { %v1733_v48 = vrot.slane %v1717_v26, 6  ;;  %v7740_v42 = vadd.f32 %v1797_v33, %v1716_v27  ;;  %v1284_v54 = vadd.f32 %v7733_v24, %v7597_v45  ;;  %v1637_v10 = vrot.slane %v7733_v24, 7  ;;  %v7745_v51 = vpop.f32.mrb[28].mxu0  ;;  %v6117_v3 = vpop.eup %6116 }
 0x2a5   : > { %v1508_v36 = vsel %vm1364_vm8, %v1417_v37, %v1492_v44  ;;  %v1144_v5 = vand.u32 2147483647, %v7641_v12  ;;  %v7753_v27 = vpop.f32.mrb[29].mxu0  ;;  %v6119_v45 = vpop.eup %6118  ;;  %v1227_v44 = vmul.f32 0.6931472, %v6117_v3  ;;  %v1447_v37 = vadd.f32 1.0, %v6115_v52 }
 0x2a6   : > { %v1759_v2 = vsel %vm1746_vm6, %v1732_v59, %v1733_v48  ;;  %v10159_v33 = vrot.slane %v7740_v42, 4  ;;  %v7756_v31 = vadd.f32 %v1508_v36, %v1284_v54  ;;  %v1661_v32 = vsel %vm1649_vm1, %v1636_v28, %v1637_v10  ;;  %v7760_v59 = vpop.f32.mrb[30].mxu0 }
 0x2a7   : > { %v1814_v56 = vadd.f32 %v1759_v2, %v1717_v26  ;;  %v1702_v18 = vsel %vm10171_vm9, %v1661_v32, 0.0  ;;  %v1469_v34 = vmul.f32 0.6931472, %v6119_v45  ;;  %v1160_v54 = vsub.f32 0.0, %v1144_v5  ;;  %v7769_v26 = vpop.f32.mrb[31].mxu0 }
 0x2a8   : > { %v1718_v11 = vadd.f32 %v1702_v18, %v7733_v24  ;;  %v1305_v28 = vand.u32 2147483647, %v7643_v1  ;;  %v6121_v2 = vpop.eup %6120  ;;  %v1419_v32 = vmul.f32 0.6931472, %v7694_v13  ;;  %v1493_v3 = vsub.f32 %v7600_v25, %v1467_v7 }
 0x2a9   : > { %v1830_v9 = vrot.slane %v1814_v56, 4  ;;  %v1253_v52 = vadd.f32 %v1227_v44, %v1125_v58  ;;  %v1421_v36 = vmul.f32 0.6931472, %v7709_v38  ;;  %v1229_v18 = vmul.f32 0.6931472, %v6121_v2 }
 0x2aa   : > { %v1734_v45 = vrot.slane %v1718_v11, 6  ;;  %v1184_v5 = vmul.f32 1.442695, %v1160_v54  ;;  %6126 = vlog2.f32 %v1447_v37  ;;  %v1321_v53 = vsub.f32 0.0, %v1305_v28 }
 0x2ab   : > { %v1856_v24 = vsel %vm1843_vm10, %v10159_v33, %v1830_v9  ;;  %v1269_v61 = vsub.f32 0.0, %v1253_v52  ;;  %v6123_v50 = vpop.eup %6122  ;;  %v1494_v58 = vsub.f32 %v7616_v39, %v1469_v34  ;;  %v1254_v38 = vadd.f32 %v1229_v18, %v1126_v55 }
 0x2ac   : > { %v7778_v62 = vadd.f32 %v1856_v24, %v1814_v56  ;;  %v1758_v13 = vsel %vm1746_vm6, %v1733_v48, %v1734_v45  ;;  %6128 = vpow2.f32 %v1184_v5  ;;  %v1207_v54 = vadd.f32 1.0, %v6123_v50 }
 0x2ad   : > { %v1799_v7 = vsel %vm10167_vm11, %v1758_v13, 0.0  ;;  %v1285_v44 = vadd.f32 %v1269_v61, %v7604_v21  ;;  %v1638_v2 = vrot.slane %v1269_v61, 7  ;;  %v6125_v56 = vpop.eup %6124  ;;  %v1509_v37 = vsel %vm1365_vm12, %v1419_v32, %v1493_v3 }
 0x2ae   : > { %v1815_v24 = vadd.f32 %v1799_v7, %v1718_v11  ;;  %v7788_v28 = vsub.f32 0.0, %v1254_v38  ;;  %v1384_v48 = vmax.f32 %v7636_v0, 0.0  ;;  %6130 = vlog2.f32 %v1207_v54 }
 0x2af   : > { %v7791_v52 = vadd.f32 %v1509_v37, %v1285_v44  ;;  %v1660_v55 = vsel %vm1649_vm1, %v1637_v10, %v1638_v2  ;;  %v1346_v34 = vmul.f32 1.442695, %v1321_v53  ;;  %v1510_v25 = vsel %vm1366_vm14, %v1421_v36, %v1494_v58 }
 0x2b0   : > { %v1831_v18 = vrot.slane %v1815_v24, 4  ;;  %v1719_v21 = vadd.f32 %v1660_v55, %v1269_v61  ;;  %v1286_v50 = vadd.f32 %v7788_v28, %v7621_v46  ;;  %v1639_v11 = vrot.slane %v7788_v28, 7 }
 0x2b1   : > { %6132 = vlog2.f32 %v7738_v35  ;;  %v1448_v32 = vadd.f32 1.0, %v6125_v56  ;;  %v1400_v46 = vadd.f32 0.5, %v1384_v48  ;;  %vm10175_vm0 = vcmp.ge.s32.totalorder %v7618_v40, 2 }
 0x2b2   : > { %v1855_v3 = vsel %vm1843_vm10, %v1830_v9, %v1831_v18  ;;  %v1735_v5 = vrot.slane %v1719_v21, 6  ;;  %v7803_v10 = vadd.f32 %v1510_v25, %v1286_v50  ;;  %v1659_v53 = vsel %vm1649_vm1, %v1638_v2, %v1639_v11 }
 0x2b3   : > { %v1896_v61 = vsel %vm10166_vm13, %v1855_v3, 0.0  ;;  %v1704_v39 = vsel %vm1575_vm15, %v1659_v53, 0.0  ;;  %6134 = vpow2.f32 %v1346_v34  ;;  %v1145_v38 = vand.u32 2147483647, %v7647_v4 }
 0x2b4   : > { %v7813_v35 = vadd.f32 %v1896_v61, %v1815_v24  ;;  %v1757_v9 = vsel %vm1746_vm6, %v1734_v45, %v1735_v5  ;;  %v7818_v36 = vadd.f32 %v1704_v39, %v7788_v28  ;;  %v6127_v13 = vpop.eup %6126  ;;  %v1306_v7 = vand.u32 2147483647, %v7660_v8 }
 0x2b5   : > { %v1816_v58 = vadd.f32 %v1757_v9, %v1719_v21  ;;  %v1127_v54 = vmax.f32 %v7628_v30, 0.0  ;;  %6136 = vlog2.f32 %v1448_v32  ;;  %v1545_v45 = vadd.s32 64, %v7465_v15 }
 0x2b6   : > { %10294 = vst [vmem:[#allocation52_spill] sm:$0xff] %v7813_v35  ;;  %v6129_v44 = vpop.eup %6128  ;;  %v1736_v2 = vrot.slane %v7818_v36, 6  ;;  %v1161_v37 = vsub.f32 0.0, %v1145_v38  ;;  %v1322_v48 = vsub.f32 0.0, %v1306_v7  ;;  %v1471_v34 = vmul.f32 0.6931472, %v6127_v13 }
 0x2b7   : > { %v1832_v56 = vrot.slane %v1816_v58, 4  ;;  %v1208_v24 = vadd.f32 1.0, %v6129_v44  ;;  %6138 = vlog2.f32 %v1400_v46  ;;  %v1146_v21 = vand.u32 2147483647, %v7664_v19 }
 0x2b8   : > { %v1756_v55 = vsel %vm1746_vm6, %v1735_v5, %v1736_v2  ;;  %v6131_v50 = vpop.eup %6130  ;;  %v1186_v3 = vmul.f32 1.442695, %v1161_v37  ;;  %v1348_v5 = vmul.f32 1.442695, %v1322_v48  ;;  %v1307_v13 = vand.u32 2147483647, %v7673_v22 }
 0x2b9   : > { %v1854_v25 = vsel %vm1843_vm10, %v1831_v18, %v1832_v56  ;;  %v1801_v32 = vsel %vm10175_vm0, %v1756_v55, 0.0  ;;  %6140 = vlog2.f32 %v1208_v24  ;;  %v1231_v39 = vmul.f32 0.6931472, %v6131_v50 }
 0x2ba   : > { %v7835_v53 = vadd.f32 %v1854_v25, %v1816_v58  ;;  %v7838_v61 = vadd.f32 %v1801_v32, %v7818_v36  ;;  %6142 = vpow2.f32 %v1186_v3  ;;  %v1162_v46 = vsub.f32 0.0, %v1146_v21 }
 0x2bb   : > { %v6133_v9 = vpop.eup %6132  ;;  %vm10163_vm2 = vcmp.ge.s32.totalorder %v7618_v40, 4  ;;  %v1255_v38 = vadd.f32 %v1231_v39, %v1127_v54  ;;  %v1495_v7 = vsub.f32 %v7625_v16, %v1471_v34  ;;  %6144 = vpow2.f32 %v1348_v5 }
 0x2bc   : > { %v10160_v18 = vrot.slane %v7838_v61, 4  ;;  %v1323_v58 = vsub.f32 0.0, %v1307_v13  ;;  %v7850_v48 = vand.u32 15, %v1545_v45  ;;  %v1188_v55 = vmul.f32 1.442695, %v1162_v46 }
 0x2bd   : > { %v6135_v44 = vpop.eup %6134  ;;  %v7848_v37 = vsub.f32 0.0, %v1255_v38  ;;  %vm1367_vm3 = vcmp.ge.f32.partialorder %v7625_v16, 0.0  ;;  %v1423_v54 = vmul.f32 0.6931472, %v6133_v9  ;;  %v1385_v45 = vmax.f32 %v7643_v1, 0.0 }
 0x2be   : > { %v1853_v24 = vsel %vm1843_vm10, %v1832_v56, %v10160_v18  ;;  %v1350_v34 = vmul.f32 1.442695, %v1323_v58  ;;  %v1449_v39 = vadd.f32 1.0, %v6135_v44  ;;  %v1547_v5 = vadd.s32 80, %v7465_v15 }
 0x2bf   : > { %v1898_v21 = vsel %vm10163_vm2, %v1853_v24, 0.0  ;;  %v6137_v50 = vpop.eup %6136  ;;  %v1287_v32 = vadd.f32 %v7848_v37, %v7628_v30  ;;  %v1640_v56 = vrot.slane %v7848_v37, 7  ;;  %v1511_v3 = vsel %vm1367_vm3, %v1423_v54, %v1495_v7 }
 0x2c0   : > { %v7856_v25 = vadd.f32 %v1898_v21, %v7838_v61  ;;  %v7864_v46 = vadd.s32 96, %v7465_v15  ;;  %vm1368_vm5 = vcmp.ge.f32.partialorder %v7636_v0, 0.0  ;;  %vm1577_vm8 = vcmp.ge.s32.totalorder %v7850_v48, 1 }
 0x2c1   : > { %v6139_v16 = vpop.eup %6138  ;;  %v7866_v9 = vadd.f32 %v1511_v3, %v1287_v32  ;;  %v1658_v13 = vsel %vm1649_vm1, %v1639_v11, %v1640_v56  ;;  %6146 = vpow2.f32 %v1188_v55  ;;  %v1473_v7 = vmul.f32 0.6931472, %v6137_v50 }
 0x2c2   : > { %10295 = vst [vmem:[#allocation53_spill] sm:$0xff] %v7856_v25  ;;  %v7875_v38 = vadd.f32 %v1658_v13, %v7848_v37  ;;  %6148 = vpow2.f32 %v1350_v34  ;;  %v1147_v58 = vand.u32 2147483647, %v7682_v23  ;;  %v1128_v44 = vmax.f32 %v7641_v12, 0.0 }
 0x2c3   : > { %v6141_v30 = vpop.eup %6140  ;;  %v1401_v28 = vadd.f32 0.5, %v1385_v45  ;;  %v1308_v21 = vand.u32 2147483647, %v7702_v60  ;;  %v1425_v32 = vmul.f32 0.6931472, %v6139_v16  ;;  %6150 = vlog2.f32 %v1449_v39 }
 0x2c4   : > { %v1233_v24 = vmul.f32 0.6931472, %v6141_v30  ;;  %v6143_v11 = vpop.eup %6142  ;;  %v1737_v54 = vrot.slane %v7875_v38, 6  ;;  %v1163_v55 = vsub.f32 0.0, %v1147_v58  ;;  %v1386_v37 = vmax.f32 %v7660_v8, 0.0 }
 0x2c5   : > { %v1209_v33 = vadd.f32 1.0, %v6143_v11  ;;  %v1324_v50 = vsub.f32 0.0, %v1308_v21  ;;  %v6145_v34 = vpop.eup %6144  ;;  %v1496_v45 = vsub.f32 %v7636_v0, %v1473_v7  ;;  %v1148_v18 = vand.u32 2147483647, %v7707_v41 }
 0x2c6   : > { %v1256_v3 = vadd.f32 %v1233_v24, %v1128_v44  ;;  %v1755_v13 = vsel %vm1746_vm6, %v1736_v2, %v1737_v54  ;;  %v1190_v30 = vmul.f32 1.442695, %v1163_v55  ;;  %v1450_v58 = vadd.f32 1.0, %v6145_v34 }
 0x2c7   : > { %v7889_v16 = vadd.f32 %v1755_v13, %v7875_v38  ;;  %6152 = vlog2.f32 %v1209_v33  ;;  %v1352_v44 = vmul.f32 1.442695, %v1324_v50  ;;  %v1164_v24 = vsub.f32 0.0, %v1148_v18 }
 0x2c8   : > { %v7891_v39 = vsub.f32 0.0, %v1256_v3  ;;  %6154 = vpow2.f32 %v1190_v30  ;;  %v1309_v36 = vand.u32 2147483647, %v7712_v6  ;;  %v1512_v38 = vsel %vm1368_vm5, %v1425_v32, %v1496_v45 }
 0x2c9   : > { %v1834_v21 = vrot.slane %v7889_v16, 4  ;;  %6156 = vlog2.f32 %v1401_v28  ;;  %v1402_v11 = vadd.f32 0.5, %v1386_v37  ;;  %v10296_v18 = vrot.slane %v7838_v61, 4 }
 0x2ca   : > { %v1288_v2 = vadd.f32 %v7891_v39, %v7641_v12  ;;  %v10162_v7 = vrot.slane %v7891_v39, 7  ;;  %6158 = vlog2.f32 %v1450_v58  ;;  %v1325_v33 = vsub.f32 0.0, %v1309_v36 }
 0x2cb   : > { %v6147_v55 = vpop.eup %6146  ;;  %v1852_v3 = vsel %vm1843_vm10, %v10296_v18, %v1834_v21  ;;  %v1192_v0 = vmul.f32 1.442695, %v1164_v24  ;;  %6160 = vpow2.f32 %v1352_v44  ;;  %vm10177_vm12 = vcmp.ge.s32.totalorder %v7850_v48, 2 }
 0x2cc   : > { %v7906_v50 = vadd.f32 %v1512_v38, %v1288_v2  ;;  %v1657_v12 = vsel %vm1649_vm1, %v1640_v56, %v10162_v7  ;;  %v6149_v28 = vpop.eup %6148  ;;  %v7913_v32 = vadd.f32 %v1852_v3, %v7889_v16  ;;  %v1210_v34 = vadd.f32 1.0, %v6147_v55 }
 0x2cd   : > { %v1706_v37 = vsel %vm1577_vm8, %v1657_v12, 0.0  ;;  %vm10174_vm14 = vcmp.ge.s32.totalorder %v7850_v48, 4  ;;  %v6151_v13 = vpop.eup %6150  ;;  %v7922_v56 = vand.u32 15, %v1547_v5  ;;  %v1451_v45 = vadd.f32 1.0, %v6149_v28 }
 0x2ce   : > { %v7920_v61 = vadd.f32 %v1706_v37, %v7891_v39  ;;  %6162 = vlog2.f32 %v1210_v34  ;;  %v1354_v30 = vmul.f32 1.442695, %v1325_v33  ;;  %v1387_v24 = vmax.f32 %v7673_v22, 0.0 }
 0x2cf   : > { %6164 = vlog2.f32 %v1402_v11  ;;  %v7927_v44 = vand.u32 15, %v7864_v46  ;;  %v7931_v36 = vadd.f32 %v7835_v53, %v7813_v35  ;;  %vm1369_vm3 = vcmp.ge.f32.partialorder %v7643_v1, 0.0 }
 0x2d0   : > { %v10161_v58 = vrot.slane %v7920_v61, 6  ;;  %v1129_v2 = vmax.f32 %v7647_v4, 0.0  ;;  %6166 = vpow2.f32 %v1192_v0  ;;  %v1149_v5 = vand.u32 2147483647, %v7718_v57 }
 0x2d1   : > { %10297 = vst [vmem:[#allocation54_spill] sm:$0xff] %v7931_v36  ;;  %v6153_v38 = vpop.eup %6152  ;;  %v1475_v33 = vmul.f32 0.6931472, %v6151_v13  ;;  %6168 = vpow2.f32 %v1354_v30  ;;  %v1310_v46 = vand.u32 2147483647, %v7745_v51  ;;  %v7945_v0 = vsub.f32 %v7756_v31, %v7813_v35 }
 0x2d2   : > { %v1754_v11 = vsel %vm1746_vm6, %v1737_v54, %v10161_v58  ;;  %v6155_v55 = vpop.eup %6154  ;;  %v1235_v18 = vmul.f32 0.6931472, %v6153_v38  ;;  %6170 = vlog2.f32 %v1451_v45  ;;  %v1165_v3 = vsub.f32 0.0, %v1149_v5 }
 0x2d3   : > { %v1803_v53 = vsel %vm10177_vm12, %v1754_v11, 0.0  ;;  %v6157_v12 = vpop.eup %6156  ;;  %v1403_v54 = vadd.f32 0.5, %v1387_v24  ;;  %v1211_v37 = vadd.f32 1.0, %v6155_v55  ;;  %v1130_v30 = vmax.f32 %v7664_v19, 0.0 }
 0x2d4   : > { %v7948_v28 = vadd.f32 %v1803_v53, %v7920_v61  ;;  %v6159_v34 = vpop.eup %6158  ;;  %v1257_v13 = vadd.f32 %v1235_v18, %v1129_v2  ;;  %v1194_v58 = vmul.f32 1.442695, %v1165_v3  ;;  %v1326_v7 = vsub.f32 0.0, %v1310_v46 }
 0x2d5   : > { %v7953_v45 = vsub.f32 %v7791_v52, %v7931_v36  ;;  %v1497_v31 = vsub.f32 %v7643_v1, %v1475_v33  ;;  %6172 = vlog2.f32 %v1211_v37  ;;  %v6161_v38 = vpop.eup %6160  ;;  %v1427_v11 = vmul.f32 0.6931472, %v6157_v12 }
 0x2d6   : > { %v10164_v5 = vrot.slane %v7948_v28, 4  ;;  %v1273_v53 = vsub.f32 0.0, %v1257_v13  ;;  %v1388_v24 = vmax.f32 %v7702_v60, 0.0  ;;  %6174 = vpow2.f32 %v1194_v58 }
 0x2d7   : > { %vm1370_vm5 = vcmp.ge.f32.partialorder %v7660_v8, 0.0  ;;  %v1477_v52 = vmul.f32 0.6931472, %v6159_v34  ;;  %vm1579_vm2 = vcmp.ge.s32.totalorder %v7922_v56, 1  ;;  %6176 = vlog2.f32 %v1403_v54 }
 0x2d8   : > { %v1851_v2 = vsel %vm1843_vm10, %v1834_v21, %v10164_v5  ;;  %v1452_v33 = vadd.f32 1.0, %v6161_v38  ;;  %v6163_v46 = vpop.eup %6162  ;;  %v1289_v58 = vadd.f32 %v1273_v53, %v7647_v4  ;;  %v1642_v18 = vrot.slane %v1273_v53, 7 }
 0x2d9   : > { %v1900_v55 = vsel %vm10174_vm14, %v1851_v2, 0.0  ;;  %v1356_v3 = vmul.f32 1.442695, %v1326_v7  ;;  %v6165_v12 = vpop.eup %6164  ;;  %v2004_v16 = vmax.f32 %v7953_v45, %v7945_v0  ;;  %v1513_v37 = vsel %vm1369_vm3, %v1427_v11, %v1497_v31 }
 0x2da   : > { %v7972_v21 = vadd.f32 %v1900_v55, %v7948_v28  ;;  %v1237_v54 = vmul.f32 0.6931472, %v6163_v46  ;;  %v6167_v34 = vpop.eup %6166  ;;  %v7976_v13 = vadd.f32 %v1513_v37, %v1289_v58  ;;  %v10298_v38 = vrot.slane %v7891_v39, 7 }
 0x2db   : > { %v1404_v7 = vadd.f32 0.5, %v1388_v24  ;;  %6178 = vlog2.f32 %v1452_v33  ;;  %v6169_v2 = vpop.eup %6168  ;;  %v7984_v5 = vsub.f32 %v7803_v10, %v7856_v25  ;;  %v1212_v1 = vadd.f32 1.0, %v6167_v34 }
 0x2dc   : > { %v1656_v4 = vsel %vm1649_vm1, %v10298_v38, %v1642_v18  ;;  %v1258_v36 = vadd.f32 %v1237_v54, %v1130_v30  ;;  %v6171_v31 = vpop.eup %6170  ;;  %v1498_v11 = vsub.f32 %v7660_v8, %v1477_v52  ;;  %v1453_v46 = vadd.f32 1.0, %v6169_v2 }
 0x2dd   : > { %v1723_v55 = vadd.f32 %v1656_v4, %v1273_v53  ;;  %6180 = vpow2.f32 %v1356_v3  ;;  %v1150_v39 = vand.u32 2147483647, %v7753_v27  ;;  %vm10176_vm3 = vcmp.ge.s32.totalorder %v7922_v56, 2 }
 0x2de   : > { %v1274_v37 = vsub.f32 0.0, %v1258_v36  ;;  %v1131_v24 = vmax.f32 %v7682_v23, 0.0  ;;  %6182 = vlog2.f32 %v1212_v1  ;;  %v1429_v33 = vmul.f32 0.6931472, %v6165_v12 }
 0x2df   : > { %v1739_v58 = vrot.slane %v1723_v55, 6  ;;  %vm1371_vm13 = vcmp.ge.f32.partialorder %v7673_v22, 0.0  ;;  %6184 = vlog2.f32 %v1404_v7  ;;  %v1389_v10 = vmax.f32 %v7712_v6, 0.0  ;;  %v6173_v53 = vpop.eup %6172 }
 0x2e0   : > { %v1166_v30 = vsub.f32 0.0, %v1150_v39  ;;  %v10299_v52 = vrot.slane %v7920_v61, 6  ;;  %v1290_v36 = vadd.f32 %v1274_v37, %v7664_v19  ;;  %v1643_v54 = vrot.slane %v1274_v37, 7  ;;  %v6175_v38 = vpop.eup %6174 }
 0x2e1   : > { %v1479_v34 = vmul.f32 0.6931472, %v6171_v31  ;;  %v1514_v12 = vsel %vm1370_vm5, %v1429_v33, %v1498_v11  ;;  %v1239_v7 = vmul.f32 0.6931472, %v6173_v53  ;;  %6186 = vlog2.f32 %v1453_v46  ;;  %v6177_v2 = vpop.eup %6176 }
 0x2e2   : > { %v1753_v3 = vsel %vm1746_vm6, %v10299_v52, %v1739_v58  ;;  %v8001_v1 = vadd.f32 %v1514_v12, %v1290_v36  ;;  %v1655_v61 = vsel %vm1649_vm1, %v1642_v18, %v1643_v54  ;;  %v1213_v39 = vadd.f32 1.0, %v6175_v38 }
 0x2e3   : > { %v7997_v4 = vadd.f32 %v1753_v3, %v1723_v55  ;;  %v1196_v52 = vmul.f32 1.442695, %v1166_v30  ;;  %v1708_v31 = vsel %vm1579_vm2, %v1655_v61, 0.0  ;;  %v1259_v55 = vadd.f32 %v1239_v7, %v1131_v24 }
 0x2e4   : > { %v1405_v3 = vadd.f32 0.5, %v1389_v10  ;;  %vm10173_vm11 = vcmp.ge.s32.totalorder %v7922_v56, 4  ;;  %v1724_v8 = vadd.f32 %v1708_v31, %v1274_v37  ;;  %v1499_v11 = vsub.f32 %v7673_v22, %v1479_v34 }
 0x2e5   : > { %v1836_v19 = vrot.slane %v7997_v4, 4  ;;  %6188 = vlog2.f32 %v1213_v39  ;;  %v1311_v46 = vand.u32 2147483647, %v7760_v59  ;;  %v6179_v33 = vpop.eup %6178  ;;  %v8012_v18 = vmax.f32 %v7984_v5, %v2004_v16 }
 0x2e6   : > { %v8016_v30 = vadd.f32 %v7913_v32, %v7856_v25  ;;  %v10301_v53 = vrot.slane %v7948_v28, 4  ;;  %v1275_v10 = vsub.f32 0.0, %v1259_v55  ;;  %v1740_v36 = vrot.slane %v1724_v8, 6 }
 0x2e7   : > { %v1431_v34 = vmul.f32 0.6931472, %v6177_v2  ;;  %6190 = vpow2.f32 %v1196_v52  ;;  %v6181_v38 = vpop.eup %6180  ;;  %v1132_v7 = vmax.f32 %v7707_v41, 0.0  ;;  %vm1581_vm5 = vcmp.ge.s32.totalorder %v7927_v44, 1 }
 0x2e8   : > { %10300 = vst [vmem:[#allocation55_spill] sm:$0xff] %v8016_v30  ;;  %v1850_v24 = vsel %vm1843_vm10, %v10301_v53, %v1836_v19  ;;  %v1291_v16 = vadd.f32 %v1275_v10, %v7682_v23  ;;  %v1644_v12 = vrot.slane %v1275_v10, 7  ;;  %v1327_v32 = vsub.f32 0.0, %v1311_v46  ;;  %v6183_v28 = vpop.eup %6182 }
 0x2e9   : > { %v8023_v37 = vadd.f32 %v1850_v24, %v7997_v4  ;;  %v1752_v61 = vsel %vm1746_vm6, %v1739_v58, %v1740_v36  ;;  %v1515_v4 = vsel %vm1371_vm13, %v1431_v34, %v1499_v11  ;;  %v1481_v39 = vmul.f32 0.6931472, %v6179_v33  ;;  %v6185_v2 = vpop.eup %6184 }
 0x2ea   : > { %6192 = vlog2.f32 %v1405_v3  ;;  %v1805_v52 = vsel %vm10176_vm3, %v1752_v61, 0.0  ;;  %v8034_v23 = vadd.f32 %v1515_v4, %v1291_v16  ;;  %v1654_v31 = vsel %vm1649_vm1, %v1643_v54, %v1644_v12  ;;  %v5916_v4 = vld [vmem:[%s7302_s2 + $0xc] ss:$16 sps:$4 sm:$0xff]  }
 0x2eb   : > { %v1241_v55 = vmul.f32 0.6931472, %v6183_v28  ;;  %v8040_v46 = vsub.f32 %v7866_v9, %v8016_v30  ;;  %v1821_v58 = vadd.f32 %v1805_v52, %v1724_v8  ;;  %v8042_v22 = vadd.f32 %v1654_v31, %v1275_v10  ;;  %v6187_v3 = vpop.eup %6186  ;;  %v5914_v28 = vld [vmem:[%s7302_s2 + $0x8] ss:$16 sps:$4 sm:$0xff]   ;;  %2760 = vmatprep.subr.bf16.mxu0 %v5916_v4 }
 0x2ec   : > { %vm1372_vm13 = vcmp.ge.f32.partialorder %v7702_v60, 0.0  ;;  %v1133_v33 = vmax.f32 %v7718_v57, 0.0  ;;  %v1454_v53 = vadd.f32 1.0, %v6181_v38  ;;  %v1358_v24 = vmul.f32 1.442695, %v1327_v32  ;;  %2761 = vmatpush1.bf16.msra.mxu0 %v5914_v28 }
 0x2ed   : > { %v1260_v11 = vadd.f32 %v1241_v55, %v1132_v7  ;;  %v1837_v34 = vrot.slane %v1821_v58, 4  ;;  %v1741_v54 = vrot.slane %v8042_v22, 6  ;;  %v1500_v16 = vsub.f32 %v7702_v60, %v1481_v39 }
 0x2ee   : > { %v1151_v9 = vand.u32 2147483647, %v7769_v26  ;;  %v1433_v8 = vmul.f32 0.6931472, %v6185_v2  ;;  %v1390_v61 = vmax.f32 %v7745_v51, 0.0  ;;  %6194 = vpow2.f32 %v1358_v24 }
 0x2ef   : > { %v1276_v10 = vsub.f32 0.0, %v1260_v11  ;;  %v6189_v52 = vpop.eup %6188  ;;  %v1849_v7 = vsel %vm1843_vm10, %v1836_v19, %v1837_v34  ;;  %v1751_v38 = vsel %vm1746_vm6, %v1740_v36, %v1741_v54  ;;  %v1483_v32 = vmul.f32 0.6931472, %v6187_v3 }
 0x2f0   : > { %v1167_v31 = vsub.f32 0.0, %v1151_v9  ;;  %v1902_v39 = vsel %vm10173_vm11, %v1849_v7, 0.0  ;;  %v8059_v55 = vadd.f32 %v1751_v38, %v8042_v22  ;;  %v1516_v19 = vsel %vm1372_vm13, %v1433_v8, %v1500_v16 }
 0x2f1   : > { %v1292_v2 = vadd.f32 %v1276_v10, %v7707_v41  ;;  %v1645_v11 = vrot.slane %v1276_v10, 7  ;;  %v6191_v24 = vpop.eup %6190  ;;  %v8062_v30 = vadd.f32 %v1902_v39, %v1821_v58  ;;  %v1243_v25 = vmul.f32 0.6931472, %v6189_v52  ;;  %v5919_v52 = vld [vmem:[%s7302_s2 + $0x2c] ss:$16 sps:$4 sm:$0xff]  }
 0x2f2   : > { %6196 = vlog2.f32 %v1454_v53  ;;  %v1838_v36 = vrot.slane %v8059_v55, 4  ;;  %v1214_v41 = vadd.f32 1.0, %v6191_v24  ;;  %v1501_v60 = vsub.f32 %v7712_v6, %v1483_v32  ;;  %v5917_v32 = vld [vmem:[%s7302_s2 + $0x28] ss:$16 sps:$4 sm:$0xff]   ;;  %2762 = vmatprep.subr.bf16.mxu0 %v5919_v52 }
 0x2f3   : > { %v8067_v3 = vadd.f32 %v1516_v19, %v1292_v2  ;;  %v1653_v22 = vsel %vm1649_vm1, %v1644_v12, %v1645_v11  ;;  %v1261_v16 = vadd.f32 %v1243_v25, %v1133_v33  ;;  %v1406_v8 = vadd.f32 0.5, %v1390_v61  ;;  %2763 = vmatpush1.bf16.msra.mxu0 %v5917_v32 }
 0x2f4   : > { %v6193_v9 = vpop.eup %6192  ;;  %v1710_v58 = vsel %vm1581_vm5, %v1653_v22, 0.0  ;;  %v1848_v53 = vsel %vm1843_vm10, %v1837_v34, %v1838_v36  ;;  %6198 = vlog2.f32 %v1214_v41  ;;  %v1198_v4 = vmul.f32 1.442695, %v1167_v31  ;;  %v5920_v41 = vld [vmem:[%s7302_s2 + $0x48] ss:$16 sps:$4 sm:$0xff]  }
 0x2f5   : > { %v1726_v28 = vadd.f32 %v1710_v58, %v1276_v10  ;;  %v8079_v12 = vsub.f32 %v7906_v50, %v7972_v21  ;;  %v1919_v7 = vadd.f32 %v1848_v53, %v8059_v55  ;;  %vm1597_vm13 = vcmp.ge.s32.totalorder %v7927_v44, 2 }
 0x2f6   : > { %v8083_v38 = vsub.f32 0.0, %v1261_v16  ;;  %v8088_v25 = vadd.f32 %v8023_v37, %v7972_v21  ;;  %v1435_v34 = vmul.f32 0.6931472, %v6193_v9  ;;  %6200 = vpow2.f32 %v1198_v4  ;;  %v5922_v9 = vld [vmem:[%s7302_s2 + $0x4c] ss:$16 sps:$4 sm:$0xff]  }
 0x2f7   : > { %v1742_v33 = vrot.slane %v1726_v28, 6  ;;  %vm1373_vm7 = vcmp.ge.f32.partialorder %v7712_v6, 0.0  ;;  %6202 = vlog2.f32 %v1406_v8  ;;  %v2006_v37 = vmax.f32 %v8040_v46, %v8012_v18  ;;  %v5925_v16 = vld [vmem:[%s7302_s2 + $0x6c] ss:$16 sps:$4 sm:$0xff]   ;;  %v5926_v8 = vld [vmem:[%s7302_s2 + $0x4] ss:$16 sps:$4 sm:$0xff]   ;;  %2764 = vmatprep.subr.bf16.mxu0 %v5922_v9 }
 0x2f8   : > { %v1293_v50 = vadd.f32 %v8083_v38, %v7718_v57  ;;  %v1646_v10 = vrot.slane %v8083_v38, 7  ;;  %v6195_v61 = vpop.eup %6194  ;;  %v1517_v39 = vsel %vm1373_vm7, %v1435_v34, %v1501_v60  ;;  %v8109_v18 = vsub.f32 %v7976_v13, %v8088_v25  ;;  %v5928_v4 = vld [vmem:[%s7302_s2] ss:$16 sps:$4 sm:$0xff]   ;;  %2765 = vmatpush1.bf16.msra.mxu0 %v5920_v41  ;;  %2647 = vmatprep.subr.bf16.mxu1 %v5926_v8 }
 0x2f9   : > { %v1750_v31 = vsel %vm1746_vm6, %v1741_v54, %v1742_v33  ;;  %v2007_v2 = vmax.f32 %v8079_v12, %v2006_v37  ;;  %vm10172_vm7 = vcmp.ge.s32.totalorder %v7927_v44, 4  ;;  %v1455_v22 = vadd.f32 1.0, %v6195_v61  ;;  %2766 = vmatprep.subr.bf16.mxu0 %v5925_v16  ;;  %2648 = vmatpush1.bf16.msra.mxu1 %v5928_v4  ;;  %v5934_v4 = vld [vmem:[%s7302_s2 + $0x20] ss:$16 sps:$4 sm:$0xff]  }
 0x2fa   : > { %v1807_v6 = vsel %vm1597_vm13, %v1750_v31, 0.0  ;;  %v8100_v55 = vadd.f32 %v1517_v39, %v1293_v50  ;;  %v1652_v57 = vsel %vm1649_vm1, %v1645_v11, %v1646_v10  ;;  %v8119_v11 = vsub.f32 %v8001_v1, %v8062_v30  ;;  %v5923_v50 = vld [vmem:[%s7302_s2 + $0x68] ss:$16 sps:$4 sm:$0xff]  }
 0x2fb   : > { %v1823_v54 = vadd.f32 %v1807_v6, %v1726_v28  ;;  %v8112_v24 = vadd.f32 %v1652_v57, %v8083_v38  ;;  %v8122_v58 = vadd.f32 %v1919_v7, %v8062_v30  ;;  %v1551_v53 = vadd.s32 112, %v7465_v15 }
 0x2fc   : > { %v6197_v19 = vpop.eup %6196  ;;  %v1391_v28 = vmax.f32 %v7760_v59, 0.0  ;;  %v2008_v32 = vmax.f32 %v8109_v18, %v2007_v2  ;;  %v1134_v31 = vmax.f32 %v7753_v27, 0.0  ;;  %6204 = vlog2.f32 %v1455_v22  ;;  %v5932_v2 = vld [vmem:[%s7302_s2 + $0x24] ss:$16 sps:$4 sm:$0xff]   ;;  %2767 = vmatpush1.bf16.msra.mxu0 %v5923_v50 }
 0x2fd   : > { %v1839_v13 = vrot.slane %v1823_v54, 4  ;;  %v1743_v60 = vrot.slane %v8112_v24, 6  ;;  %v1485_v34 = vmul.f32 0.6931472, %v6197_v19  ;;  %v8147_v6 = vsub.f32 %v8034_v23, %v8122_v58  ;;  %2649 = vmatprep.subr.bf16.mxu1 %v5932_v2 }
 0x2fe   : > { %v6199_v52 = vpop.eup %6198  ;;  %v8153_v8 = vand.u32 15, %v1551_v53  ;;  %2650 = vmatpush1.bf16.msra.mxu1 %v5934_v4  ;;  %vm1374_vm9 = vcmp.ge.f32.partialorder %v7745_v51, 0.0  ;;  %vm1375_vm14 = vcmp.ge.f32.partialorder %v7760_v59, 0.0  ;;  %vm1603_vm3 = vcmp.ge.s32.totalorder %v7608_v47, 4 }
 0x2ff   : > { %v1847_v1 = vsel %vm1843_vm10, %v1838_v36, %v1839_v13  ;;  %v1749_v7 = vsel %vm1746_vm6, %v1742_v33, %v1743_v60  ;;  %v1245_v36 = vmul.f32 0.6931472, %v6199_v52  ;;  %v2009_v33 = vmax.f32 %v8119_v11, %v2008_v32 }
 0x300   : > { %v1904_v61 = vsel %vm10172_vm7, %v1847_v1, 0.0  ;;  %v8141_v37 = vadd.f32 %v1749_v7, %v8112_v24  ;;  %v6201_v39 = vpop.eup %6200  ;;  %v1502_v23 = vsub.f32 %v7745_v51, %v1485_v34  ;;  %v5935_v7 = vld [vmem:[%s7302_s2 + $0x44] ss:$16 sps:$4 sm:$0xff]   ;;  %vm1583_vm7 = vcmp.ge.s32.totalorder %v8153_v8, 1  ;;  %v5937_v34 = vld [vmem:[%s7302_s2 + $0x40] ss:$16 sps:$4 sm:$0xff]  }
 0x301   : > { %v8149_v57 = vadd.f32 %v1904_v61, %v1823_v54  ;;  %v6203_v19 = vpop.eup %6202  ;;  %v1262_v9 = vadd.f32 %v1245_v36, %v1134_v31  ;;  %v1215_v16 = vadd.f32 1.0, %v6201_v39  ;;  %v1407_v54 = vadd.f32 0.5, %v1391_v28  ;;  %2651 = vmatprep.subr.bf16.mxu1 %v5935_v7 }
 0x302   : > { %v1840_v41 = vrot.slane %v8141_v37, 4  ;;  %v2010_v53 = vmax.f32 %v8147_v6, %v2009_v33  ;;  %v1437_v1 = vmul.f32 0.6931472, %v6203_v19  ;;  %2652 = vmatpush1.bf16.msra.mxu1 %v5937_v34  ;;  %v5941_v33 = vld [vmem:[%s7302_s2 + $0x64] ss:$16 sps:$4 sm:$0xff]   ;;  %vm1615_vm11 = vcmp.ge.s32.totalorder %v8153_v8, 4 }
 0x303   : > { %v8158_v52 = vsub.f32 %v8067_v3, %v8149_v57  ;;  %v8165_v32 = vsub.f32 0.0, %v1262_v9  ;;  %6206 = vlog2.f32 %v1215_v16  ;;  %v5943_v19 = vld [vmem:[%s7302_s2 + $0x60] ss:$16 sps:$4 sm:$0xff]   ;;  %2653 = vmatprep.subr.bf16.mxu1 %v5941_v33  ;;  %v5944_v16 = vld [vmem:[%s7302_s2 + $0x84] ss:$16 sps:$4 sm:$0xff]  }
 0x304   : > { %v1846_v22 = vsel %vm1843_vm10, %v1839_v13, %v1840_v41  ;;  %v1518_v31 = vsel %vm1374_vm9, %v1437_v1, %v1502_v23  ;;  %6208 = vlog2.f32 %v1407_v54  ;;  %vm1599_vm9 = vcmp.ge.s32.totalorder %v8153_v8, 2  ;;  %v5940_v34 = vld [vmem:[%s7302_s2 + $0xac] ss:$16 sps:$4 sm:$0xff]   ;;  %v5950_v33 = vld [vmem:[%s7302_s2 + $0xa4] ss:$16 sps:$4 sm:$0xff]  }
 0x305   : > { %v1921_v3 = vadd.f32 %v1846_v22, %v8141_v37  ;;  %v1294_v28 = vadd.f32 %v8165_v32, %v7753_v27  ;;  %v1647_v13 = vrot.slane %v8165_v32, 7  ;;  %v8177_v50 = vmax.f32 %v8158_v52, %v2010_v53  ;;  %v5929_v22 = vld [vmem:[%s7302_s2 + $0x88] ss:$16 sps:$4 sm:$0xff]   ;;  %v5946_v53 = vld [vmem:[%s7302_s2 + $0x80] ss:$16 sps:$4 sm:$0xff]  }
 0x306   : > { %v6205_v9 = vpop.eup %6204  ;;  %2654 = vmatpush1.bf16.msra.mxu1 %v5943_v19  ;;  %v1135_v1 = vmax.f32 %v7769_v26, 0.0  ;;  %v5952_v19 = vld [vmem:[%s7302_s2 + $0xa0] ss:$16 sps:$4 sm:$0xff]   ;;  %v5959_v37 = vld [vmem:[%s7302_s2 + $0xe4] ss:$16 sps:$4 sm:$0xff]  }
 0x307   : > { %v8180_v61 = vadd.f32 %v1921_v3, %v8149_v57  ;;  %v8182_v51 = vadd.f32 %v1518_v31, %v1294_v28  ;;  %v1651_v27 = vsel %vm1649_vm1, %v1646_v10, %v1647_v13  ;;  %v1487_v54 = vmul.f32 0.6931472, %v6205_v9  ;;  %2655 = vmatprep.subr.bf16.mxu1 %v5944_v16  ;;  %v5949_v31 = vld [vmem:[%s7302_s2 + $0xcc] ss:$16 sps:$4 sm:$0xff]   ;;  %v5953_v9 = vld [vmem:[%s7302_s2 + $0xc4] ss:$16 sps:$4 sm:$0xff]  }
 0x308   : > { %v1712_v39 = vsel %vm1583_vm7, %v1651_v27, 0.0  ;;  %v8219_v28 = vand.u32 15, %v7465_v15 }
 0x309   : > { %v8192_v36 = vsub.f32 %v8100_v55, %v8180_v61  ;;  %v8198_v2 = vadd.f32 %v1712_v39, %v8165_v32  ;;  %v5931_v55 = vld [vmem:[%s7302_s2 + $0x8c] ss:$16 sps:$4 sm:$0xff]   ;;  %v1503_v16 = vsub.f32 %v7760_v59, %v1487_v54  ;;  %v5961_v32 = vld [vmem:[%s7302_s2 + $0xe0] ss:$16 sps:$4 sm:$0xff]  }
 0x30a   : > { %2768 = vmatprep.subr.bf16.mxu0 %v5931_v55  ;;  %2656 = vmatpush1.bf16.msra.mxu1 %v5946_v53  ;;  %vm1569_vm0 = vcmp.ge.s32.totalorder %v8219_v28, 1  ;;  %v5947_v53 = vld [vmem:[%s7302_s2 + $0xc8] ss:$16 sps:$4 sm:$0xff]   ;;  %vm1601_vm12 = vcmp.ge.s32.totalorder %v8219_v28, 4 }
 0x30b   : > { %v2012_v38 = vmax.f32 %v8192_v36, %v8177_v50  ;;  %v1744_v10 = vrot.slane %v8198_v2, 6  ;;  %2769 = vmatpush1.bf16.msra.mxu0 %v5929_v22  ;;  %2657 = vmatprep.subr.bf16.mxu1 %v5950_v33 }
 0x30c   : > { %2770 = vmatprep.subr.bf16.mxu0 %v5940_v34  ;;  %v5958_v34 = vld [vmem:[%s7302_s2 + $0xec] ss:$16 sps:$4 sm:$0xff]  }
 0x30d   : > { %v6207_v4 = vpop.eup %6206  ;;  %v1748_v23 = vsel %vm1746_vm6, %v1743_v60, %v1744_v10  ;;  %v5938_v60 = vld [vmem:[%s7302_s2 + $0xa8] ss:$16 sps:$4 sm:$0xff]  }
 0x30e   : > { %v1809_v3 = vsel %vm1599_vm9, %v1748_v23, 0.0  ;;  %v1247_v7 = vmul.f32 0.6931472, %v6207_v4  ;;  %v6209_v27 = vpop.eup %6208  ;;  %2658 = vmatpush1.bf16.msra.mxu1 %v5952_v19  ;;  %v5956_v19 = vld [vmem:[%s7302_s2 + $0xe8] ss:$16 sps:$4 sm:$0xff]  }
 0x30f   : > { %v8222_v24 = vadd.f32 %v1809_v3, %v8198_v2  ;;  %v1439_v22 = vmul.f32 0.6931472, %v6209_v27  ;;  %2771 = vmatpush1.bf16.msra.mxu0 %v5938_v60  ;;  %v5955_v3 = vld [vmem:[%s7302_s2 + $0xc0] ss:$16 sps:$4 sm:$0xff]   ;;  %2659 = vmatprep.subr.bf16.mxu1 %v5953_v9 }
 0x310   : > { %v1263_v39 = vadd.f32 %v1247_v7, %v1135_v1  ;;  %2772 = vmatprep.subr.bf16.mxu0 %v5949_v31 }
 0x311   : > { %v1841_v55 = vrot.slane %v8222_v24, 4 }
 0x312   : > { %v1279_v4 = vsub.f32 0.0, %v1263_v39  ;;  %2660 = vmatpush1.bf16.msra.mxu1 %v5955_v3 }
 0x313   : > { %v1845_v23 = vsel %vm1843_vm10, %v1840_v41, %v1841_v55  ;;  %v1519_v41 = vsel %vm1375_vm14, %v1439_v22, %v1503_v16  ;;  %2773 = vmatpush1.bf16.msra.mxu0 %v5947_v53  ;;  %2661 = vmatprep.subr.bf16.mxu1 %v5959_v37  ;;  %vm1585_vm14 = vcmp.ge.s32.totalorder %v8219_v28, 2 }
 0x314   : > { %v1906_v54 = vsel %vm1615_vm11, %v1845_v23, 0.0  ;;  %v1295_v1 = vadd.f32 %v1279_v4, %v7769_v26  ;;  %v1648_v7 = vrot.slane %v1279_v4, 7  ;;  %v10302_v26 = vrot.slane %v7649_v29, 7  ;;  %2774 = vmatprep.subr.bf16.mxu0 %v5958_v34 }
 0x315   : > { %v8247_v39 = vadd.f32 %v1906_v54, %v8222_v24 }
 0x316   : > { %v1535_v60 = vadd.f32 %v1519_v41, %v1295_v1  ;;  %v1650_v27 = vsel %vm1649_vm1, %v1647_v13, %v1648_v7  ;;  %v1665_v31 = vsel %vm1649_vm1, %v1648_v7, %v10302_v26  ;;  %2662 = vmatpush1.bf16.msra.mxu1 %v5961_v32  ;;  %v10304_v7 = vrot.slane %v7740_v42, 4 }
 0x317   : > { %v8261_v33 = vsub.f32 %v8182_v51, %v8247_v39  ;;  %v1698_v24 = vsel %vm1569_vm0, %v1665_v31, 0.0  ;;  %v1729_v59 = vadd.f32 %v1650_v27, %v1279_v4  ;;  %2775 = vmatpush1.bf16.msra.mxu0 %v5956_v19 }
 0x318   : > { %v1714_v9 = vadd.f32 %v1698_v24, %v7649_v29  ;;  %v10303_v29 = vrot.slane %v7684_v20, 6 }
 0x319   : > { %v2013_v13 = vmax.f32 %v8261_v33, %v2012_v38  ;;  %v1745_v16 = vrot.slane %v1729_v59, 6 }
 0x31a   : > { %v1730_v51 = vrot.slane %v1714_v9, 6 }
 0x31b   : > { %v1747_v4 = vsel %vm1746_vm6, %v1744_v10, %v1745_v16 }
 0x31c   : > { %v1761_v23 = vsel %vm1746_vm6, %v1730_v51, %v10303_v29  ;;  %v1762_v50 = vsel %vm1746_vm6, %v1745_v16, %v1730_v51  ;;  %v1826_v38 = vadd.f32 %v1747_v4, %v1729_v59 }
 0x31d   : > { %v1795_v22 = vsel %vm1585_vm14, %v1762_v50, 0.0  ;;  %v1812_v53 = vadd.f32 %v1761_v23, %v7684_v20 }
 0x31e   : > { %v1811_v2 = vadd.f32 %v1795_v22, %v1714_v9  ;;  %v1842_v3 = vrot.slane %v1826_v38, 4 }
 0x31f   : > { %v1828_v10 = vrot.slane %v1812_v53, 4 }
 0x320   : > { %v1827_v54 = vrot.slane %v1811_v2, 4  ;;  %v1844_v1 = vsel %vm1843_vm10, %v1841_v55, %v1842_v3 }
 0x321   : > { %v1857_v34 = vsel %vm1843_vm10, %v1828_v10, %v10304_v7  ;;  %v1923_v37 = vadd.f32 %v1844_v1, %v1826_v38 }
 0x322   : > { %v1858_v20 = vsel %vm1843_vm10, %v1827_v54, %v1828_v10  ;;  %v1859_v41 = vsel %vm1843_vm10, %v1842_v3, %v1827_v54  ;;  %v1894_v27 = vsel %vm1603_vm3, %v1857_v34, 0.0 }
 0x323   : > { %v1892_v26 = vsel %vm1601_vm12, %v1859_v41, 0.0  ;;  %v1909_v31 = vadd.f32 %v1858_v20, %v1812_v53  ;;  %v8303_v55 = vadd.f32 %v1894_v27, %v7740_v42  ;;  %v1987_v24 = vadd.f32 %v1923_v37, %v8247_v39 }
 0x324   : > { %v8306_v59 = vadd.f32 %v1892_v26, %v1811_v2 }
 0x325   : > { %v1975_v19 = vadd.f32 %v7778_v62, %v8303_v55  ;;  %v1990_v32 = vsub.f32 %v7696_v63, %v8303_v55  ;;  %v2003_v9 = vsub.f32 %v1535_v60, %v1987_v24 }
 0x326   : > { %v8313_v16 = vadd.f32 %v1909_v31, %v8306_v59  ;;  %v1988_v51 = vsub.f32 %v7658_v43, %v8306_v59 }
 0x327   : > { %v1991_v42 = vsub.f32 %v7720_v49, %v1975_v19 }
 0x328   : > { %v2014_v4 = vmax.f32 %v1988_v51, %v2013_v13  ;;  %v1989_v29 = vsub.f32 %v7675_v14, %v8313_v16 }
 0x32a   : > { %v2015_v23 = vmax.f32 %v1989_v29, %v2014_v4 }
 0x32c   : > { %v2016_v50 = vmax.f32 %v1990_v32, %v2015_v23 }
 0x32e   : > { %v2017_v38 = vmax.f32 %v1991_v42, %v2016_v50 }
 0x330   : > { %v2018_v62 = vmax.f32 %v2003_v9, %v2017_v38 }
 0x332   : > { %v2019_v22 = vrot.slane %v2018_v62, 4 }
 0x334   : > { %v2020_v53 = vmax.f32 %v2018_v62, %v2019_v22 }
 0x336   : > { %v2021_v63 = vrot.slane %v2020_v53, 2 }
 0x338   : > { %v2022_v60 = vmax.f32 %v2020_v53, %v2021_v63 }
 0x33a   : > { %v2023_v2 = vrot.slane %v2022_v60, 1 }
 0x33c   : > { %v8320_v3 = vmax.f32 %v2022_v60, %v2023_v2 }
 0x33e   : > { %v2025_v10 = vsub.f32 %v1988_v51, %v8320_v3  ;;  %v2026_v43 = vsub.f32 %v1989_v29, %v8320_v3  ;;  %v2027_v49 = vsub.f32 %v1990_v32, %v8320_v3  ;;  %v2028_v13 = vsub.f32 %v1991_v42, %v8320_v3 }
 0x33f   : > { %v2036_v14 = vsub.f32 %v8147_v6, %v8320_v3  ;;  %v2037_v54 = vsub.f32 %v8158_v52, %v8320_v3  ;;  %v2038_v1 = vsub.f32 %v8192_v36, %v8320_v3  ;;  %v2039_v7 = vsub.f32 %v8261_v33, %v8320_v3 }
 0x340   : > { %v2040_v34 = vsub.f32 %v2003_v9, %v8320_v3  ;;  %v2041_v37 = vmul.f32 1.442695, %v2025_v10  ;;  %v2043_v20 = vmul.f32 1.442695, %v2026_v43  ;;  %v2045_v41 = vmul.f32 1.442695, %v2027_v49 }
 0x341   : > { %v2047_v27 = vmul.f32 1.442695, %v2028_v13  ;;  %v8336_v26 = vadd.f32 %v8320_v3, %v1975_v19  ;;  %v2063_v6 = vmul.f32 1.442695, %v2036_v14  ;;  %v2065_v31 = vmul.f32 1.442695, %v2037_v54 }
 0x342   : > { %6210 = vpow2.f32 %v2041_v37  ;;  %v8339_v52 = vadd.f32 %v8320_v3, %v1987_v24  ;;  %v2067_v36 = vmul.f32 1.442695, %v2038_v1  ;;  %v2069_v33 = vmul.f32 1.442695, %v2039_v7 }
 0x343   : > { %6212 = vpow2.f32 %v2043_v20  ;;  %v2029_v32 = vsub.f32 %v7945_v0, %v8320_v3  ;;  %v2030_v9 = vsub.f32 %v7953_v45, %v8320_v3  ;;  %v2071_v19 = vmul.f32 1.442695, %v2040_v34 }
 0x344   : > { %6214 = vpow2.f32 %v2045_v41  ;;  %v2031_v51 = vsub.f32 %v7984_v5, %v8320_v3  ;;  %v2032_v42 = vsub.f32 %v8040_v46, %v8320_v3  ;;  %v2033_v24 = vsub.f32 %v8079_v12, %v8320_v3 }
 0x345   : > { %6216 = vpow2.f32 %v2047_v27  ;;  %v2034_v4 = vsub.f32 %v8109_v18, %v8320_v3  ;;  %v2035_v0 = vsub.f32 %v8119_v11, %v8320_v3  ;;  %v8357_v45 = vadd.f32 %v8320_v3, %v8180_v61 }
 0x346   : > { %6218 = vpow2.f32 %v2063_v6  ;;  %v8361_v5 = vadd.f32 %v8320_v3, %v8247_v39  ;;  %v2049_v46 = vmul.f32 1.442695, %v2029_v32  ;;  %v2051_v29 = vmul.f32 1.442695, %v2030_v9 }
 0x347   : > { %6220 = vpow2.f32 %v2065_v31  ;;  %v2053_v12 = vmul.f32 1.442695, %v2031_v51  ;;  %v2055_v23 = vmul.f32 1.442695, %v2032_v42  ;;  %v2057_v50 = vmul.f32 1.442695, %v2033_v24 }
 0x348   : > { %6222 = vpow2.f32 %v2067_v36  ;;  %v8365_v18 = vadd.f32 %v8320_v3, %v8306_v59  ;;  %v2059_v38 = vmul.f32 1.442695, %v2034_v4  ;;  %v8369_v61 = vadd.f32 %v8320_v3, %v8313_v16 }
 0x349   : > { %6224 = vpow2.f32 %v2069_v33  ;;  %v8373_v39 = vadd.f32 %v8320_v3, %v8303_v55  ;;  %v2061_v53 = vmul.f32 1.442695, %v2035_v0 }
 0x34a   : > { %6226 = vpow2.f32 %v2071_v19 }
 0x34b   : > { %6228 = vpow2.f32 %v2049_v46 }
 0x34c   : > { %v6211_v11 = vpop.eup %6210  ;;  %6230 = vpow2.f32 %v2051_v29 }
 0x34d   : > { %v6213_v62 = vpop.eup %6212  ;;  %v2073_v22 = vrot.slane %v6211_v11, 7  ;;  %6232 = vpow2.f32 %v2053_v12 }
 0x34e   : > { %v6215_v63 = vpop.eup %6214  ;;  %v2074_v60 = vrot.slane %v6213_v62, 7  ;;  %6234 = vpow2.f32 %v2055_v23 }
 0x34f   : > { %v8375_v59 = vpop.eup %6216  ;;  %v2075_v2 = vrot.slane %v6215_v63, 7  ;;  %6236 = vpow2.f32 %v2057_v50 }
 0x350   : > { %v8377_v10 = vpop.eup %6218  ;;  %v10178_v16 = vrot.slane %v8375_v59, 7  ;;  %v2103_v43 = vsel %vm1649_vm1, %v2073_v22, %v2074_v60  ;;  %6238 = vpow2.f32 %v2059_v38 }
 0x351   : > { %v6221_v55 = vpop.eup %6220  ;;  %v2084_v49 = vrot.slane %v8377_v10, 7  ;;  %v8383_v13 = vadd.f32 %v6213_v62, %v2103_v43  ;;  %6240 = vpow2.f32 %v2061_v53  ;;  %v2102_v14 = vsel %vm1649_vm1, %v2074_v60, %v2075_v2  ;;  %v5964_v43 = vld [vmem:[%s7308_s9 + $0xc0] sm:$0xff]  }
 0x352   : > { %v6223_v54 = vpop.eup %6222  ;;  %v2085_v1 = vrot.slane %v6221_v55, 7  ;;  %v2101_v7 = vsel %vm1649_vm1, %v2075_v2, %v10178_v16  ;;  %v2107_v34 = vsel %vm1571_vm4, %v2102_v14, 0.0  ;;  %v5962_v2 = vld [vmem:[%s7308_s9 + $0x40] sm:$0xff]   ;;  %5606 = vmatprep.subr.bf16.mxu0 %v5964_v43  ;;  %vm10307_vm4 = vcmp.ge.s32.totalorder %v7850_v48, 2 }
 0x353   : > { %v6225_v37 = vpop.eup %6224  ;;  %v2086_v20 = vrot.slane %v6223_v54, 7  ;;  %v8394_v41 = vadd.f32 %v8375_v59, %v2101_v7  ;;  %v8396_v27 = vadd.f32 %v6215_v63, %v2107_v34  ;;  %5542 = vmatprep.subr.bf16.mxu1 %v5962_v2 }
 0x354   : > { %v6227_v6 = vpop.eup %6226  ;;  %v2087_v31 = vrot.slane %v6225_v37, 7  ;;  %v2092_v36 = vsel %vm1649_vm1, %v2084_v49, %v2085_v1 }
 0x355   : > { %v8402_v33 = vpop.eup %6228  ;;  %v2088_v32 = vrot.slane %v6227_v6, 7  ;;  %v2091_v9 = vsel %vm1649_vm1, %v2085_v1, %v2086_v20  ;;  %v2117_v19 = vsel %vm1581_vm5, %v2092_v36, 0.0  ;;  %vm10318_vm5 = vcmp.ge.s32.totalorder %v7608_v47, 2 }
 0x356   : > { %v8408_v51 = vpop.eup %6230  ;;  %v2090_v42 = vsel %vm1649_vm1, %v2086_v20, %v2087_v31  ;;  %v8412_v24 = vadd.f32 %v6221_v55, %v2117_v19  ;;  %v2134_v4 = vadd.f32 %v6223_v54, %v2091_v9  ;;  %v10179_v0 = vrot.slane %v8402_v33, 7 }
 0x357   : > { %v8415_v46 = vpop.eup %6232  ;;  %v2089_v29 = vsel %vm1649_vm1, %v2087_v31, %v2088_v32  ;;  %v2104_v12 = vsel %vm1649_vm1, %v2088_v32, %v2073_v22  ;;  %v2119_v23 = vsel %vm1583_vm7, %v2090_v42, 0.0  ;;  %v2078_v50 = vrot.slane %v8408_v51, 7 }
 0x358   : > { %v6235_v38 = vpop.eup %6234  ;;  %v2105_v62 = vsel %vm1569_vm0, %v2104_v12, 0.0  ;;  %v2135_v53 = vadd.f32 %v6225_v37, %v2119_v23  ;;  %v2136_v63 = vadd.f32 %v6227_v6, %v2089_v29  ;;  %v10181_v60 = vrot.slane %v8412_v24, 6 }
 0x359   : > { %v6237_v55 = vpop.eup %6236  ;;  %v2121_v14 = vadd.f32 %v6211_v11, %v2105_v62  ;;  %v10180_v54 = vrot.slane %v8383_v13, 6  ;;  %v2150_v22 = vrot.slane %v2134_v4, 6  ;;  %v2079_v1 = vrot.slane %v8415_v46, 7 }
 0x35a   : > { %v6239_v7 = vpop.eup %6238  ;;  %v2151_v34 = vrot.slane %v2135_v53, 6  ;;  %v2152_v20 = vrot.slane %v2136_v63, 6  ;;  %v2080_v31 = vrot.slane %v6235_v38, 7  ;;  %v2081_v36 = vrot.slane %v6237_v55, 7 }
 0x35b   : > { %v6241_v37 = vpop.eup %6240  ;;  %v2137_v6 = vrot.slane %v2121_v14, 6  ;;  %v2155_v32 = vsel %vm1746_vm6, %v10181_v60, %v2150_v22  ;;  %v2082_v11 = vrot.slane %v6239_v7, 7  ;;  %v2099_v9 = vsel %vm1649_vm1, %v10179_v0, %v2078_v50 }
 0x35c   : > { %v2153_v19 = vsel %vm1746_vm6, %v2151_v34, %v2152_v20  ;;  %v2154_v42 = vsel %vm1746_vm6, %v2150_v22, %v2151_v34  ;;  %v8443_v29 = vadd.f32 %v2155_v32, %v2134_v4  ;;  %v2083_v12 = vrot.slane %v6241_v37, 7 }
 0x35d   : > { %v2167_v23 = vsel %vm1746_vm6, %v2137_v6, %v10180_v54  ;;  %v2168_v62 = vsel %vm1746_vm6, %v2152_v20, %v2137_v6  ;;  %v2183_v2 = vsel %vm1599_vm9, %v2154_v42, 0.0  ;;  %v2200_v43 = vadd.f32 %v2153_v19, %v2136_v63 }
 0x35e   : > { %v2169_v16 = vsel %vm1585_vm14, %v2168_v62, 0.0  ;;  %v8456_v22 = vadd.f32 %v2167_v23, %v8383_v13  ;;  %v2199_v4 = vadd.f32 %v2183_v2, %v2135_v53  ;;  %v10182_v34 = vrot.slane %v8443_v29, 4 }
 0x35f   : > { %v2185_v32 = vadd.f32 %v2169_v16, %v2121_v14  ;;  %v2216_v0 = vrot.slane %v2200_v43, 4  ;;  %v2094_v54 = vsel %vm1649_vm1, %v2082_v11, %v2083_v12  ;;  %v2097_v20 = vsel %vm1649_vm1, %v2079_v1, %v2080_v31 }
 0x360   : > { %v2215_v63 = vrot.slane %v2199_v4, 4  ;;  %v2093_v19 = vsel %vm1649_vm1, %v2083_v12, %v2084_v49  ;;  %v2096_v53 = vsel %vm1649_vm1, %v2080_v31, %v2081_v36  ;;  %v2095_v16 = vsel %vm1649_vm1, %v2081_v36, %v2082_v11 }
 0x361   : > { %v2201_v42 = vrot.slane %v2185_v32, 4  ;;  %v2098_v14 = vsel %vm1649_vm1, %v2078_v50, %v2079_v1  ;;  %v2113_v23 = vsel %vm1577_vm8, %v2096_v53, 0.0  ;;  %v2115_v36 = vsel %vm1579_vm2, %v2094_v54, 0.0 }
 0x362   : > { %v2217_v62 = vsel %vm1843_vm10, %v2215_v63, %v2216_v0  ;;  %v2218_v49 = vsel %vm1843_vm10, %v10182_v34, %v2215_v63  ;;  %v2111_v31 = vsel %vm1575_vm15, %v2098_v14, 0.0  ;;  %v2128_v12 = vadd.f32 %v6235_v38, %v2097_v20 }
 0x363   : > { %v2232_v50 = vsel %vm1843_vm10, %v2216_v0, %v2201_v42  ;;  %v2247_v1 = vsel %vm1615_vm11, %v2218_v49, 0.0  ;;  %v2264_v11 = vadd.f32 %v2217_v62, %v2200_v43  ;;  %v2130_v60 = vadd.f32 %v6239_v7, %v2095_v16 }
 0x364   : > { %v2233_v2 = vsel %vm1601_vm12, %v2232_v50, 0.0  ;;  %v2263_v53 = vadd.f32 %v2247_v1, %v2199_v4  ;;  %v2132_v63 = vadd.f32 %v8377_v10, %v2093_v19  ;;  %v8494_v14 = vadd.f32 %v8415_v46, %v2111_v31 }
 0x365   : > { %v2249_v34 = vadd.f32 %v2233_v2, %v2185_v32  ;;  %v2129_v54 = vadd.f32 %v6237_v55, %v2113_v23  ;;  %v2131_v6 = vadd.f32 %v6241_v37, %v2115_v36  ;;  %v8497_v0 = vadd.f32 %v8408_v51, %v2099_v9 }
 0x366   : > { %v2296_v35 = vadd.f32 %v2264_v11, %v2263_v53  ;;  %v2144_v8 = vrot.slane %v2128_v12, 6  ;;  %v2146_v43 = vrot.slane %v2130_v60, 6  ;;  %v2148_v38 = vrot.slane %v2132_v63, 6 }
 0x367   : > { %v2143_v28 = vrot.slane %v8494_v14, 6  ;;  %v2145_v20 = vrot.slane %v2129_v54, 6  ;;  %v2327_v7 = vmax.f32 %v2263_v53, 1e-30  ;;  %v2147_v16 = vrot.slane %v2131_v6, 6 }
 0x368   : > { %v2328_v4 = vmax.f32 %v2296_v35, 1e-30  ;;  %v10305_v10 = vrot.slane %v8456_v22, 4  ;;  %v10306_v55 = vrot.slane %v8412_v24, 6  ;;  %v2142_v32 = vrot.slane %v8497_v0, 6 }
 0x369   : > { %v2159_v37 = vsel %vm1746_vm6, %v2145_v20, %v2146_v43  ;;  %v2160_v9 = vsel %vm1746_vm6, %v2144_v8, %v2145_v20  ;;  %v2161_v35 = vsel %vm1746_vm6, %v2143_v28, %v2144_v8  ;;  %v2157_v19 = vsel %vm1746_vm6, %v2147_v16, %v2148_v38 }
 0x36a   : > { %v2231_v46 = vsel %vm1843_vm10, %v2201_v42, %v10305_v10  ;;  %v2156_v51 = vsel %vm1746_vm6, %v2148_v38, %v10306_v55  ;;  %6242 = vlog2.f32 %v2328_v4  ;;  %v2158_v42 = vsel %vm1746_vm6, %v2146_v43, %v2147_v16 }
 0x36b   : > { %v2181_v23 = vsel %vm1597_vm13, %v2156_v51, 0.0  ;;  %v2177_v62 = vsel %vm10307_vm4, %v2160_v9, 0.0  ;;  %vm10308_vm11 = vcmp.ge.s32.totalorder %v7922_v56, 2  ;;  %6244 = vlog2.f32 %v2327_v7 }
 0x36c   : > { %v2179_v49 = vsel %vm10308_vm11, %v2158_v42, 0.0  ;;  %v8525_v31 = vadd.f32 %v2161_v35, %v2128_v12  ;;  %v2193_v36 = vadd.f32 %v2177_v62, %v2129_v54  ;;  %v2194_v50 = vadd.f32 %v2159_v37, %v2130_v60 }
 0x36d   : > { %v2195_v1 = vadd.f32 %v2179_v49, %v2131_v6  ;;  %v2196_v11 = vadd.f32 %v2157_v19, %v2132_v63  ;;  %v2197_v2 = vadd.f32 %v2181_v23, %v8412_v24  ;;  %v2250_v53 = vadd.f32 %v2231_v46, %v8456_v22 }
 0x36e   : > { %v2162_v8 = vsel %vm1746_vm6, %v2142_v32, %v2143_v28  ;;  %v2208_v43 = vrot.slane %v8525_v31, 4  ;;  %v2209_v38 = vrot.slane %v2193_v36, 4  ;;  %v2210_v20 = vrot.slane %v2194_v50, 4 }
 0x36f   : > { %v2211_v4 = vrot.slane %v2195_v1, 4  ;;  %v2212_v12 = vrot.slane %v2196_v11, 4  ;;  %v2213_v7 = vrot.slane %v2197_v2, 4  ;;  %v2282_v54 = vadd.f32 %v2250_v53, %v2249_v34 }
 0x370   : > { %v2140_v60 = vrot.slane %v8394_v41, 6  ;;  %v2223_v24 = vsel %vm1843_vm10, %v2209_v38, %v2210_v20  ;;  %v2224_v6 = vsel %vm1843_vm10, %v2208_v43, %v2209_v38  ;;  %v2313_v63 = vmax.f32 %v2249_v34, 1e-30 }
 0x371   : > { %v10309_v28 = vrot.slane %v8443_v29, 4  ;;  %v2220_v10 = vsel %vm1843_vm10, %v2212_v12, %v2213_v7  ;;  %v2221_v46 = vsel %vm1843_vm10, %v2211_v4, %v2212_v12  ;;  %v2222_v55 = vsel %vm1843_vm10, %v2210_v20, %v2211_v4 }
 0x372   : > { %vm10310_vm15 = vcmp.ge.s32.totalorder %v7618_v40, 2  ;;  %vm10311_vm0 = vcmp.ge.s32.totalorder %v7850_v48, 4  ;;  %vm10312_vm2 = vcmp.ge.s32.totalorder %v7922_v56, 4  ;;  %vm10313_vm8 = vcmp.ge.s32.totalorder %v7927_v44, 4 }
 0x373   : > { %v2219_v16 = vsel %vm1843_vm10, %v2213_v7, %v10309_v28  ;;  %v2175_v51 = vsel %vm10310_vm15, %v2162_v8, 0.0  ;;  %v2241_v34 = vsel %vm10311_vm0, %v2224_v6, 0.0  ;;  %v2243_v37 = vsel %vm10312_vm2, %v2222_v55, 0.0 }
 0x374   : > { %v2245_v9 = vsel %vm10313_vm8, %v2220_v10, 0.0  ;;  %v2257_v35 = vadd.f32 %v2241_v34, %v2193_v36  ;;  %v2258_v19 = vadd.f32 %v2223_v24, %v2194_v50  ;;  %v2259_v42 = vadd.f32 %v2243_v37, %v2195_v1  ;;  %v6243_v62 = vpop.eup %6242 }
 0x375   : > { %v2260_v23 = vadd.f32 %v2221_v46, %v2196_v11  ;;  %v2261_v49 = vadd.f32 %v2245_v9, %v2197_v2  ;;  %v2262_v53 = vadd.f32 %v2219_v16, %v8443_v29  ;;  %v2314_v38 = vmax.f32 %v2282_v54, 1e-30  ;;  %v6245_v12 = vpop.eup %6244 }
 0x376   : > { %6246 = vlog2.f32 %v2313_v63  ;;  %v2360_v8 = vmul.f32 0.6931472, %v6243_v62  ;;  %v2290_v20 = vadd.f32 %v2258_v19, %v2257_v35  ;;  %v2321_v4 = vmax.f32 %v2257_v35, 1e-30 }
 0x377   : > { %v2292_v48 = vadd.f32 %v2260_v23, %v2259_v42  ;;  %v8561_v56 = vadd.f32 %v2175_v51, %v8494_v14  ;;  %v2294_v44 = vadd.f32 %v2262_v53, %v2261_v49  ;;  %v2323_v7 = vmax.f32 %v2259_v42, 1e-30 }
 0x378   : > { %6248 = vlog2.f32 %v2314_v38  ;;  %v8564_v36 = vadd.f32 %v2360_v8, %v8339_v52  ;;  %v2322_v50 = vmax.f32 %v2290_v20, 1e-30  ;;  %v2325_v29 = vmax.f32 %v2261_v49, 1e-30 }
 0x379   : > { %v2324_v1 = vmax.f32 %v2292_v48, 1e-30  ;;  %6250 = vlog2.f32 %v2321_v4  ;;  %v2139_v11 = vrot.slane %v8396_v27, 6  ;;  %v10314_v2 = vrot.slane %v8402_v33, 7 }
 0x37a   : > { %6252 = vlog2.f32 %v2323_v7  ;;  %v10315_v54 = vrot.slane %v8375_v59, 7  ;;  %v2326_v24 = vmax.f32 %v2294_v44, 1e-30  ;;  %vm10316_vm12 = vcmp.ge.s32.totalorder %v7612_v17, 1 }
 0x37b   : > { %6254 = vlog2.f32 %v2322_v50  ;;  %v2358_v6 = vmul.f32 0.6931472, %v6245_v12  ;;  %v2165_v63 = vsel %vm1746_vm6, %v2139_v11, %v2140_v60  ;;  %v10317_v28 = vrot.slane %v8383_v13, 6 }
 0x37c   : > { %v2100_v14 = vsel %vm1649_vm1, %v10315_v54, %v10314_v2  ;;  %6256 = vlog2.f32 %v2324_v1  ;;  %v2188_v46 = vadd.f32 %v2165_v63, %v8394_v41  ;;  %v2305_v37 = vadd.f32 %v8320_v3, %v7972_v21 }
 0x37d   : > { %v2109_v52 = vsel %vm10316_vm12, %v2100_v14, 0.0  ;;  %v2166_v16 = vsel %vm1746_vm6, %v10317_v28, %v2139_v11  ;;  %v8586_v55 = vadd.f32 %v2358_v6, %v8361_v5  ;;  %v2207_v13 = vrot.slane %v8561_v56, 4 }
 0x37e   : > { %v2125_v59 = vadd.f32 %v8402_v33, %v2109_v52  ;;  %v2171_v10 = vsel %vm10318_vm5, %v2166_v16, 0.0  ;;  %6258 = vlog2.f32 %v2326_v24  ;;  %v2204_v9 = vrot.slane %v2188_v46, 4 }
 0x37f   : > { %v2187_v51 = vadd.f32 %v2171_v10, %v8396_v27  ;;  %6260 = vlog2.f32 %v2325_v29  ;;  %v2306_v27 = vadd.f32 %v8320_v3, %v8088_v25  ;;  %vm10319_vm1 = vcmp.ge.s32.totalorder %v7612_v17, 2 }
 0x380   : > { %v2141_v34 = vrot.slane %v2125_v59, 6  ;;  %v6247_v35 = vpop.eup %6246  ;;  %v2308_v62 = vadd.f32 %v8320_v3, %v8122_v58  ;;  %v2225_v58 = vsel %vm1843_vm10, %v2207_v13, %v2208_v43 }
 0x381   : > { %v2203_v33 = vrot.slane %v2187_v51, 4  ;;  %v2330_v19 = vmul.f32 0.6931472, %v6247_v35 }
 0x382   : > { %v2163_v41 = vsel %vm1746_vm6, %v2141_v34, %v2142_v32  ;;  %v2164_v5 = vsel %vm1746_vm6, %v2140_v60, %v2141_v34  ;;  %v6249_v23 = vpop.eup %6248  ;;  %v10320_v32 = vrot.slane %v8456_v22, 4  ;;  %vm10321_vm6 = vcmp.ge.s32.totalorder %v7612_v17, 4 }
 0x383   : > { %v2173_v21 = vsel %vm10319_vm1, %v2164_v5, 0.0  ;;  %v2190_v42 = vadd.f32 %v2163_v41, %v8497_v0  ;;  %v2229_v49 = vsel %vm1843_vm10, %v2203_v33, %v2204_v9  ;;  %v6251_v25 = vpop.eup %6250  ;;  %v2332_v38 = vmul.f32 0.6931472, %v6249_v23 }
 0x384   : > { %v2230_v60 = vsel %vm1843_vm10, %v10320_v32, %v2203_v33  ;;  %v2189_v53 = vadd.f32 %v2173_v21, %v2125_v59  ;;  %v2361_v8 = vadd.f32 %v2330_v19, %v8365_v18  ;;  %v2252_v20 = vadd.f32 %v2229_v49, %v2188_v46  ;;  %v6253_v48 = vpop.eup %6252  ;;  %v10323_v49 = vld [vmem:[#allocation36_spill] sm:$0xff] }
 0x385   : > { %v2235_v0 = vsel %vm1603_vm3, %v2230_v60, 0.0  ;;  %v2206_v12 = vrot.slane %v2190_v42, 4  ;;  %v6255_v44 = vpop.eup %6254  ;;  %v2362_v7 = vadd.f32 %v2332_v38, %v8369_v61  ;;  %v2346_v1 = vmul.f32 0.6931472, %v6251_v25  ;;  %v10325_v60 = vld [vmem:[#allocation37_spill] sm:$0xff] }
 0x386   : > { %v2251_v4 = vadd.f32 %v2235_v0, %v2187_v51  ;;  %v2205_v22 = vrot.slane %v2189_v53, 4  ;;  %v2377_v50 = vmul.f32 1.442695, %v2361_v8  ;;  %v2350_v29 = vmul.f32 0.6931472, %v6253_v48  ;;  %v6257_v18 = vpop.eup %6256  ;;  %v5963_v0 = vld [vmem:[%s7308_s9] sm:$0xff]  }
 0x387   : > { %v2348_v11 = vmul.f32 0.6931472, %v6255_v44  ;;  %v2352_v14 = vmul.f32 0.6931472, %v6257_v18  ;;  %v2379_v24 = vmul.f32 1.442695, %v2362_v7  ;;  %v2256_v46 = vadd.f32 %v2225_v58, %v8525_v31 }
 0x388   : > { %v2284_v47 = vadd.f32 %v2252_v20, %v2251_v4  ;;  %v2315_v2 = vmax.f32 %v2251_v4, 1e-30  ;;  %v2227_v54 = vsel %vm1843_vm10, %v2205_v22, %v2206_v12  ;;  %6262 = vpow2.f32 %v2377_v50  ;;  %v6259_v63 = vpop.eup %6258  ;;  %v5965_v20 = vld [vmem:[%s7308_s9 + $0x80] sm:$0xff]   ;;  %v5966_v4 = vld [vmem:[%s7308_s9 + $0x48] sm:$0xff]   ;;  %v10327_v7 = vld [vmem:[#allocation52_spill] sm:$0xff] }
 0x389   : > { %v2228_v43 = vsel %vm1843_vm10, %v2204_v9, %v2205_v22  ;;  %v8623_v52 = vadd.f32 %v2348_v11, %v2306_v27  ;;  %v8627_v28 = vadd.f32 %v2352_v14, %v2308_v62  ;;  %v2254_v59 = vadd.f32 %v2227_v54, %v2190_v42  ;;  %v6261_v10 = vpop.eup %6260  ;;  %v5968_v22 = vld [vmem:[%s7308_s9 + $0xc8] sm:$0xff]  }
 0x38a   : > { %v2316_v6 = vmax.f32 %v2284_v47, 1e-30  ;;  %6264 = vlog2.f32 %v2315_v2  ;;  %v2237_v61 = vsel %vm10321_vm6, %v2228_v43, 0.0  ;;  %v2356_v51 = vmul.f32 0.6931472, %v6259_v63  ;;  %v5967_v47 = vld [vmem:[%s7308_s9 + $0x8] sm:$0xff]  }
 0x38b   : > { %6266 = vpow2.f32 %v2379_v24  ;;  %v2253_v16 = vadd.f32 %v2237_v61, %v2189_v53  ;;  %v2226_v34 = vsel %vm1843_vm10, %v2206_v12, %v2207_v13  ;;  %v2307_v9 = vadd.f32 %v8320_v3, %v8062_v30  ;;  %v5969_v2 = vld [vmem:[%s7308_s9 + $0x88] sm:$0xff]   ;;  %v5970_v24 = vld [vmem:[%s7308_s9 + $0x50] sm:$0xff]   ;;  %v10330_v61 = vld [vmem:[#allocation53_spill] sm:$0xff] }
 0x38c   : > { %6268 = vlog2.f32 %v2316_v6  ;;  %vm10322_vm3 = vcmp.ge.s32.totalorder %v7618_v40, 4  ;;  %v8637_v41 = vadd.f32 %v2356_v51, %v8357_v45  ;;  %v8640_v27 = vadd.f32 %v2346_v1, %v2305_v37  ;;  %v5972_v43 = vld [vmem:[%s7308_s9 + $0xd0] sm:$0xff]  }
 0x38d   : > { %v2286_v35 = vadd.f32 %v2254_v59, %v2253_v16  ;;  %v2317_v17 = vmax.f32 %v2253_v16, 1e-30  ;;  %v2239_v33 = vsel %vm10322_vm3, %v2226_v34, 0.0  ;;  %v2309_v31 = vadd.f32 %v8320_v3, %v8149_v57 }
 0x38e   : > { %v2255_v5 = vadd.f32 %v2239_v33, %v8561_v56  ;;  %v8644_v13 = vadd.f32 %v2350_v29, %v2307_v9  ;;  %v2354_v21 = vmul.f32 0.6931472, %v6261_v10  ;;  %v2301_v50 = vadd.f32 %v8320_v3, %v10327_v7  ;;  %v10329_v29 = vld [vmem:[#allocation54_spill] sm:$0xff]  ;;  %v10331_v10 = vld [vmem:[#allocation55_spill] sm:$0xff] }
 0x38f   : > { %v2318_v19 = vmax.f32 %v2286_v35, 1e-30  ;;  %6270 = vlog2.f32 %v2317_v17  ;;  %v2302_v18 = vadd.f32 %v8320_v3, %v10329_v29  ;;  %v2303_v63 = vadd.f32 %v8320_v3, %v10330_v61  ;;  %v5971_v17 = vld [vmem:[%s7308_s9 + $0x10] sm:$0xff]  }
 0x390   : > { %v2288_v30 = vadd.f32 %v2256_v46, %v2255_v5  ;;  %v2319_v42 = vmax.f32 %v2255_v5, 1e-30  ;;  %v8646_v40 = vadd.f32 %v2354_v21, %v2309_v31  ;;  %v2304_v46 = vadd.f32 %v8320_v3, %v10331_v10  ;;  %v5973_v33 = vld [vmem:[%s7308_s9 + $0x90] sm:$0xff]   ;;  %v5974_v31 = vld [vmem:[%s7308_s9 + $0x58] sm:$0xff]  }
 0x391   : > { %6272 = vlog2.f32 %v2318_v19  ;;  %v5976_v19 = vld [vmem:[%s7308_s9 + $0xd8] sm:$0xff]   ;;  %v2397_v29 = vmul.f32 1.442695, %v8644_v13  ;;  %v2405_v10 = vmul.f32 1.442695, %v8586_v55 }
 0x392   : > { %v2320_v45 = vmax.f32 %v2288_v30, 1e-30  ;;  %v6263_v23 = vpop.eup %6262  ;;  %6274 = vlog2.f32 %v2319_v42  ;;  %v5975_v3 = vld [vmem:[%s7308_s9 + $0x18] sm:$0xff]  }
 0x393   : > { %v8649_v32 = vadd.f32 %v6263_v23, %v10323_v49  ;;  %v5977_v21 = vld [vmem:[%s7308_s9 + $0x98] sm:$0xff]   ;;  %v5980_v23 = vld [vmem:[%s7308_s9 + $0xe0] sm:$0xff]   ;;  %v10334_v49 = vld [vmem:[#allocation39_spill] sm:$0xff] }
 0x394   : > { %v6265_v56 = vpop.eup %6264  ;;  %6276 = vlog2.f32 %v2320_v45  ;;  %v5978_v45 = vld [vmem:[%s7308_s9 + $0x60] sm:$0xff]   ;;  %v10354_v55 = vld [vmem:[#allocation48_spill] sm:$0xff] }
 0x395   : > { %v6267_v57 = vpop.eup %6266  ;;  %v2334_v37 = vmul.f32 0.6931472, %v6265_v56  ;;  %10324 = vst [vmem:[#allocation36_spill] sm:$0xff] %v8649_v32 }
 0x396   : > { %v6269_v62 = vpop.eup %6268  ;;  %v8652_v53 = vadd.f32 %v6267_v57, %v10325_v60 }
 0x397   : > { %v2336_v25 = vmul.f32 0.6931472, %v6269_v62  ;;  %v2363_v38 = vadd.f32 %v2334_v37, %v8373_v39  ;;  %v10328_v39 = vmov 0   ;;  %v10332_v37 = vld [vmem:[#allocation38_spill] sm:$0xff] }
 0x398   : > { %10326 = vst [vmem:[#allocation37_spill] sm:$0xff] %v8652_v53  ;;  %v2425_v8 = vpack.c.bf16 %v8652_v53, %v8649_v32 }
 0x399   : > { %v2364_v48 = vadd.f32 %v2336_v25, %v8336_v26  ;;  %v2381_v58 = vmul.f32 1.442695, %v2363_v38  ;;  %v6271_v12 = vpop.eup %6270  ;;  %v5979_v38 = vld [vmem:[%s7308_s9 + $0x20] sm:$0xff]  }
 0x39a   : > { %2680 = vmatmul.mubr.bf16.vlgmr.msra.gmra.mrb[0].mxu1 %v2425_v8  ;;  %2793 = vmatmul.mubr.bf16.vlgmr.msra.gmra.mrb[32].mxu0 %v2425_v8  ;;  %v2338_v1 = vmul.f32 0.6931472, %v6271_v12  ;;  %v5981_v8 = vld [vmem:[%s7308_s9 + $0xa0] sm:$0xff]   ;;  %v10338_v12 = vld [vmem:[#allocation40_spill] sm:$0xff] }
 0x39b   : > { %v6273_v44 = vpop.eup %6272  ;;  %2689 = vmatprep.mubr.bf16.mxu1 %v10328_v39  ;;  %2802 = vmatprep.mubr.bf16.mxu0 %v10328_v39  ;;  %6278 = vpow2.f32 %v2381_v58  ;;  %v2383_v26 = vmul.f32 1.442695, %v2364_v48  ;;  %v2395_v48 = vmul.f32 1.442695, %v8623_v52  ;;  %v10336_v58 = vld [vmem:[#allocation41_spill] sm:$0xff] }
 0x39c   : > { %v2340_v11 = vmul.f32 0.6931472, %v6273_v44  ;;  %5543 = vmatpush3.bf16.msra.mxu1 %v5963_v0  ;;  %5607 = vmatpush3.bf16.msra.mxu0 %v5965_v20  ;;  %v6275_v54 = vpop.eup %6274  ;;  %v2365_v14 = vadd.f32 %v2338_v1, %v2301_v50  ;;  %v10340_v1 = vld [vmem:[#allocation43_spill] sm:$0xff] }
 0x39d   : > { %6280 = vpow2.f32 %v2383_v26  ;;  %5544 = vmatprep.subr.bf16.mxu1 %v5966_v4  ;;  %5608 = vmatprep.subr.bf16.mxu0 %v5968_v22  ;;  %v2342_v59 = vmul.f32 0.6931472, %v6275_v54  ;;  %v2393_v22 = vmul.f32 1.442695, %v8640_v27  ;;  %v2399_v26 = vmul.f32 1.442695, %v8627_v28 }
 0x39e   : > { %v6277_v6 = vpop.eup %6276  ;;  %v2366_v16 = vadd.f32 %v2340_v11, %v2302_v18  ;;  %v2385_v51 = vmul.f32 1.442695, %v2365_v14  ;;  %v10342_v18 = vld [vmem:[#allocation42_spill] sm:$0xff]  ;;  %v2403_v54 = vmul.f32 1.442695, %v8637_v41  ;;  %v10344_v14 = vld [vmem:[#allocation45_spill] sm:$0xff] }
 0x39f   : > { %v2344_v34 = vmul.f32 0.6931472, %v6277_v6  ;;  %v2367_v35 = vadd.f32 %v2342_v59, %v2303_v63  ;;  %v10348_v59 = vld [vmem:[#allocation47_spill] sm:$0xff] }
 0x3a0   : > { %v2387_v9 = vmul.f32 1.442695, %v2366_v16  ;;  %5545 = vmatpush3.bf16.msra.mxu1 %v5967_v47  ;;  %5609 = vmatpush3.bf16.msra.mxu0 %v5969_v2  ;;  %v2407_v16 = vmul.f32 1.442695, %v8564_v36 }
 0x3a1   : > { %v2368_v5 = vadd.f32 %v2344_v34, %v2304_v46  ;;  %5546 = vmatprep.subr.bf16.mxu1 %v5970_v24  ;;  %5610 = vmatprep.subr.bf16.mxu0 %v5972_v43  ;;  %v2389_v57 = vmul.f32 1.442695, %v2367_v35  ;;  %v2401_v24 = vmul.f32 1.442695, %v8646_v40  ;;  %v10346_v43 = vld [vmem:[#allocation44_spill] sm:$0xff]  ;;  %v10350_v46 = vld [vmem:[#allocation46_spill] sm:$0xff] }
 0x3a2   : > { %6282 = vpow2.f32 %v2387_v9  ;;  %v10352_v35 = vld [vmem:[#allocation49_spill] sm:$0xff] }
 0x3a3   : > { %6284 = vpow2.f32 %v2385_v51  ;;  %v2391_v42 = vmul.f32 1.442695, %v2368_v5 }
 0x3a4   : > { %5547 = vmatpush3.bf16.msra.mxu1 %v5971_v17  ;;  %5611 = vmatpush3.bf16.msra.mxu0 %v5973_v33 }
 0x3a5   : > { %v6279_v30 = vpop.eup %6278  ;;  %5548 = vmatprep.subr.bf16.mxu1 %v5974_v31  ;;  %5612 = vmatprep.subr.bf16.mxu0 %v5976_v19  ;;  %6286 = vpow2.f32 %v2391_v42 }
 0x3a6   : > { %v8685_v62 = vadd.f32 %v6279_v30, %v10332_v37  ;;  %6288 = vpow2.f32 %v2389_v57  ;;  %v10358_v30 = vld [vmem:[#allocation50_spill] sm:$0xff] }
 0x3a7   : > { %v6281_v56 = vpop.eup %6280  ;;  %6290 = vpow2.f32 %v2395_v48  ;;  %v5984_v57 = vld [vmem:[%s7308_s9 + $0xe8] sm:$0xff]   ;;  %v5991_v48 = vld [vmem:[%s7308_s9 + $0x38] sm:$0xff]  }
 0x3a8   : > { %10333 = vst [vmem:[#allocation52_spill] sm:$0xff] %v8685_v62  ;;  %v8688_v60 = vadd.f32 %v6281_v56, %v10334_v49  ;;  %5549 = vmatpush3.bf16.msra.mxu1 %v5975_v3  ;;  %5613 = vmatpush3.bf16.msra.mxu0 %v5977_v21  ;;  %6292 = vpow2.f32 %v2393_v22  ;;  %v10356_v3 = vld [vmem:[#allocation51_spill] sm:$0xff]  ;;  %v5983_v56 = vld [vmem:[%s7308_s9 + $0x28] sm:$0xff]   ;;  %v2477_v22 = vsub.s32 2, %v7465_v15 }
 0x3a9   : > { %5550 = vmatprep.subr.bf16.mxu1 %v5978_v45  ;;  %5614 = vmatprep.subr.bf16.mxu0 %v5980_v23  ;;  %6294 = vpow2.f32 %v2399_v26  ;;  %v5982_v23 = vld [vmem:[%s7308_s9 + $0x68] sm:$0xff]   ;;  %v5986_v49 = vld [vmem:[%s7308_s9 + $0x70] sm:$0xff]  }
 0x3aa   : > { %10335 = vst [vmem:[#allocation54_spill] sm:$0xff] %v8688_v60  ;;  %v2426_v25 = vpack.c.bf16 %v8688_v60, %v8685_v62  ;;  %6296 = vpow2.f32 %v2397_v29  ;;  %v5985_v37 = vld [vmem:[%s7308_s9 + $0xa8] sm:$0xff]  }
 0x3ab   : > { %6298 = vpow2.f32 %v2403_v54 }
 0x3ac   : > { %v6283_v0 = vpop.eup %6282  ;;  %2690 = vmatmul.mubr.bf16.gmra.mrb[4].mxu1 %v2426_v25  ;;  %2803 = vmatmul.mubr.bf16.gmra.mrb[36].mxu0 %v2426_v25  ;;  %6300 = vpow2.f32 %v2401_v24  ;;  %v5988_v25 = vld [vmem:[%s7308_s9 + $0xf0] sm:$0xff]  }
 0x3ad   : > { %v6285_v20 = vpop.eup %6284  ;;  %2699 = vmatprep.mubr.bf16.mxu1 %v10328_v39  ;;  %2812 = vmatprep.mubr.bf16.mxu0 %v10328_v39  ;;  %v8698_v4 = vadd.f32 %v6283_v0, %v10336_v58  ;;  %6302 = vpow2.f32 %v2407_v16  ;;  %v5990_v0 = vld [vmem:[%s7308_s9 + $0x78] sm:$0xff]  }
 0x3ae   : > { %5551 = vmatpush3.bf16.msra.mxu1 %v5979_v38  ;;  %5615 = vmatpush3.bf16.msra.mxu0 %v5981_v8  ;;  %v8702_v44 = vadd.f32 %v6285_v20, %v10338_v12  ;;  %6304 = vpow2.f32 %v2405_v10  ;;  %v5987_v38 = vld [vmem:[%s7308_s9 + $0x30] sm:$0xff]   ;;  %v5992_v20 = vld [vmem:[%s7308_s9 + $0xf8] sm:$0xff]   ;;  %v2465_v12 = vld [vmem:[%s7335_s8] sm:$0xf] }
 0x3af   : > { %10337 = vst [vmem:[#allocation53_spill] sm:$0xff] %v8698_v4  ;;  %v6287_v50 = vpop.eup %6286  ;;  %5552 = vmatprep.subr.bf16.mxu1 %v5982_v23  ;;  %5616 = vmatprep.subr.bf16.mxu0 %v5984_v57  ;;  %v5989_v8 = vld [vmem:[%s7308_s9 + $0xb0] sm:$0xff]   ;;  %v5993_v58 = vld [vmem:[%s7308_s9 + $0xb8] sm:$0xff]  }
 0x3b0   : > { %10339 = vst [vmem:[#allocation55_spill] sm:$0xff] %v8702_v44  ;;  %v2427_v7 = vpack.c.bf16 %v8698_v4, %v8702_v44  ;;  %v6289_v52 = vpop.eup %6288  ;;  %v8710_v27 = vadd.f32 %v6287_v50, %v10340_v1  ;;  %v2481_v50 = vsub.s32 3, %v7465_v15  ;;  %v8781_v1 = vrot.slane %v2465_v12, %v2477_v22 }
 0x3b1   : > { %v8714_v11 = vadd.f32 %v6289_v52, %v10342_v18  ;;  %v6291_v2 = vpop.eup %6290  ;;  %v10360_v52 = vld [vmem:[#allocation35_spill] sm:$0xff] }
 0x3b2   : > { %10341 = vst [vmem:[#allocation38_spill] sm:$0xff] %v8710_v27  ;;  %v6293_v28 = vpop.eup %6292  ;;  %v8722_v13 = vadd.f32 %v6291_v2, %v10344_v14  ;;  %5553 = vmatpush3.bf16.msra.mxu1 %v5983_v56  ;;  %5617 = vmatpush3.bf16.msra.mxu0 %v5985_v37  ;;  %v8779_v26 = vrot.slane %v2465_v12, %v10360_v52 }
 0x3b3   : > { %10343 = vst [vmem:[#allocation39_spill] sm:$0xff] %v8714_v11  ;;  %v2428_v47 = vpack.c.bf16 %v8710_v27, %v8714_v11  ;;  %v8726_v6 = vadd.f32 %v6293_v28, %v10346_v43  ;;  %v6295_v63 = vpop.eup %6294  ;;  %5554 = vmatprep.subr.bf16.mxu1 %v5986_v49  ;;  %5618 = vmatprep.subr.bf16.mxu0 %v5988_v25 }
 0x3b4   : > { %2700 = vmatmul.mubr.bf16.gmra.mrb[8].mxu1 %v2427_v7  ;;  %2813 = vmatmul.mubr.bf16.gmra.mrb[40].mxu0 %v2427_v7  ;;  %10345 = vst [vmem:[#allocation41_spill] sm:$0xff] %v8722_v13  ;;  %v6297_v41 = vpop.eup %6296  ;;  %v8734_v40 = vadd.f32 %v6295_v63, %v10348_v59  ;;  %v2473_v7 = vsub.s32 1, %v7465_v15  ;;  %v8785_v18 = vrot.slane %v2465_v12, %v2481_v50 }
 0x3b5   : > { %2709 = vmatprep.mubr.bf16.mxu1 %v10328_v39  ;;  %2822 = vmatprep.mubr.bf16.mxu0 %v10328_v39  ;;  %10347 = vst [vmem:[#allocation40_spill] sm:$0xff] %v8726_v6  ;;  %v2429_v61 = vpack.c.bf16 %v8722_v13, %v8726_v6  ;;  %v8738_v51 = vadd.f32 %v6297_v41, %v10350_v46  ;;  %v6299_v9 = vpop.eup %6298 }
 0x3b6   : > { %10349 = vst [vmem:[#allocation43_spill] sm:$0xff] %v8734_v40  ;;  %v6301_v36 = vpop.eup %6300  ;;  %v8745_v17 = vadd.f32 %v6299_v9, %v10352_v35  ;;  %5555 = vmatpush3.bf16.msra.mxu1 %v5987_v38  ;;  %5619 = vmatpush3.bf16.msra.mxu0 %v5989_v8  ;;  %v8783_v29 = vrot.slane %v2465_v12, %v2473_v7 }
 0x3b7   : > { %10351 = vst [vmem:[#allocation42_spill] sm:$0xff] %v8738_v51  ;;  %v2430_v34 = vpack.c.bf16 %v8734_v40, %v8738_v51  ;;  %v8748_v33 = vadd.f32 %v6301_v36, %v10354_v55  ;;  %v6303_v31 = vpop.eup %6302  ;;  %5556 = vmatprep.subr.bf16.mxu1 %v5990_v0  ;;  %5620 = vmatprep.subr.bf16.mxu0 %v5992_v20 }
 0x3b8   : > { %10353 = vst [vmem:[#allocation45_spill] sm:$0xff] %v8745_v17  ;;  %v6305_v19 = vpop.eup %6304  ;;  %v8755_v21 = vadd.f32 %v6303_v31, %v10356_v3 }
 0x3b9   : > { %10355 = vst [vmem:[#allocation44_spill] sm:$0xff] %v8748_v33  ;;  %v2431_v5 = vpack.c.bf16 %v8745_v17, %v8748_v33  ;;  %v8758_v42 = vadd.f32 %v6305_v19, %v10358_v30 }
 0x3ba   : > { %10357 = vst [vmem:[#allocation47_spill] sm:$0xff] %v8755_v21  ;;  %5557 = vmatpush3.bf16.msra.mxu1 %v5991_v48  ;;  %5621 = vmatpush3.bf16.msra.mxu0 %v5993_v58 }
 0x3bb   : > { %10359 = vst [vmem:[#allocation46_spill] sm:$0xff] %v8758_v42  ;;  %v2432_v45 = vpack.c.bf16 %v8755_v21, %v8758_v42 }
 0x3bc   : > { %2710 = vmatmul.mubr.bf16.gmra.mrb[12].mxu1 %v2428_v47  ;;  %2823 = vmatmul.mubr.bf16.gmra.mrb[44].mxu0 %v2428_v47 }
 0x3bd   : > { %2719 = vmatprep.mubr.bf16.mxu1 %v10328_v39  ;;  %2832 = vmatprep.mubr.bf16.mxu0 %v10328_v39 }
 0x3c4   : > { %2720 = vmatmul.mubr.bf16.gmra.mrb[16].mxu1 %v2429_v61  ;;  %2833 = vmatmul.mubr.bf16.gmra.mrb[48].mxu0 %v2429_v61 }
 0x3c5   : > { %2729 = vmatprep.mubr.bf16.mxu1 %v10328_v39  ;;  %2842 = vmatprep.mubr.bf16.mxu0 %v10328_v39 }
 0x3cc   : > { %2730 = vmatmul.mubr.bf16.gmra.mrb[20].mxu1 %v2430_v34  ;;  %2843 = vmatmul.mubr.bf16.gmra.mrb[52].mxu0 %v2430_v34 }
 0x3cd   : > { %2739 = vmatprep.mubr.bf16.mxu1 %v10328_v39  ;;  %2852 = vmatprep.mubr.bf16.mxu0 %v10328_v39 }
 0x3d4   : > { %2740 = vmatmul.mubr.bf16.gmra.mrb[24].mxu1 %v2431_v5  ;;  %2853 = vmatmul.mubr.bf16.gmra.mrb[56].mxu0 %v2431_v5 }
 0x3d5   : > { %2749 = vmatprep.mubr.bf16.mxu1 %v10328_v39  ;;  %2862 = vmatprep.mubr.bf16.mxu0 %v10328_v39 }
 0x3dc   : > { %2750 = vmatmul.mubr.bf16.gmra.mrb[28].mxu1 %v2432_v45  ;;  %2863 = vmatmul.mubr.bf16.gmra.mrb[60].mxu0 %v2432_v45 }
 0x46d   : > { %v2681_v47 = vpop.f32.mrb[0].mxu1  ;;  %v2794_v2 = vpop.f32.mrb[32].mxu0 }
 0x46e   : > { %v2682_v28 = vadd.f32 %v2681_v47, %v8779_v26  ;;  %v2795_v54 = vadd.f32 %v2794_v2, %v8781_v1  ;;  %v2683_v14 = vpop.f32.mrb[1].mxu1  ;;  %v2796_v24 = vpop.f32.mrb[33].mxu0 }
 0x46f   : > { %v2684_v43 = vadd.f32 %v2683_v14, %v8783_v29  ;;  %v2685_v15 = vpop.f32.mrb[2].mxu1  ;;  %v2798_v61 = vpop.f32.mrb[34].mxu0  ;;  %v2797_v16 = vadd.f32 %v2796_v24, %v8785_v18 }
 0x470   : > { %v2937_v63 = vmul.f32 0.70710677, %v2682_v28  ;;  %v2939_v41 = vmul.f32 0.70710677, %v2795_v54  ;;  %v2686_v10 = vadd.f32 %v2685_v15, %v8779_v26  ;;  %v2799_v46 = vadd.f32 %v2798_v61, %v8781_v1  ;;  %v2687_v34 = vpop.f32.mrb[3].mxu1  ;;  %v2800_v9 = vpop.f32.mrb[35].mxu0 }
 0x471   : > { %v2938_v59 = vmul.f32 0.70710677, %v2684_v43  ;;  %v2940_v36 = vmul.f32 0.70710677, %v2797_v16  ;;  %v2688_v5 = vadd.f32 %v2687_v34, %v8783_v29  ;;  %v2801_v31 = vadd.f32 %v2800_v9, %v8785_v18 }
 0x472   : > { %6306 = verf.f32 %v2937_v63  ;;  %v2941_v35 = vmul.f32 0.70710677, %v2686_v10  ;;  %v2943_v55 = vmul.f32 0.70710677, %v2799_v46  ;;  %v2873_v56 = vmul.f32 0.5, %v2682_v28 }
 0x473   : > { %6308 = verf.f32 %v2939_v41  ;;  %v2942_v19 = vmul.f32 0.70710677, %v2688_v5  ;;  %v2944_v3 = vmul.f32 0.70710677, %v2801_v31  ;;  %v2875_v38 = vmul.f32 0.5, %v2795_v54 }
 0x474   : > { %6310 = verf.f32 %v2938_v59  ;;  %v2874_v12 = vmul.f32 0.5, %v2684_v43  ;;  %v2877_v7 = vmul.f32 0.5, %v2686_v10  ;;  %v2879_v24 = vmul.f32 0.5, %v2799_v46 }
 0x475   : > { %6312 = verf.f32 %v2941_v35  ;;  %v2876_v34 = vmul.f32 0.5, %v2797_v16 }
 0x476   : > { %6314 = verf.f32 %v2943_v55  ;;  %v2878_v55 = vmul.f32 0.5, %v2688_v5 }
 0x477   : > { %6316 = verf.f32 %v2940_v36 }
 0x478   : > { %6318 = verf.f32 %v2942_v19 }
 0x479   : > { %6320 = verf.f32 %v2944_v3 }
 0x47c   : > { %v6307_v30 = vpop.eup %6306 }
 0x47d   : > { %v6309_v45 = vpop.eup %6308  ;;  %v3065_v57 = vadd.f32 1.0, %v6307_v30 }
 0x47e   : > { %v6311_v23 = vpop.eup %6310  ;;  %v3067_v8 = vadd.f32 1.0, %v6309_v45  ;;  %v2880_v45 = vmul.f32 0.5, %v2801_v31 }
 0x47f   : > { %v2691_v37 = vpop.f32.mrb[4].mxu1  ;;  %v2804_v49 = vpop.f32.mrb[36].mxu0  ;;  %v8801_v59 = vmul.f32 %v3065_v57, %v2873_v56  ;;  %v3066_v36 = vadd.f32 1.0, %v6311_v23 }
 0x480   : > { %v6313_v25 = vpop.eup %6312  ;;  %v2692_v0 = vadd.f32 %v2691_v37, %v8779_v26  ;;  %v2805_v20 = vadd.f32 %v2804_v49, %v8781_v1  ;;  %v2693_v48 = vpop.f32.mrb[5].mxu1  ;;  %v8805_v10 = vmul.f32 %v3067_v8, %v2875_v38 }
 0x481   : > { %v2806_v58 = vpop.f32.mrb[37].mxu0  ;;  %v6315_v22 = vpop.eup %6314  ;;  %v3069_v50 = vadd.f32 1.0, %v6313_v25  ;;  %v2694_v47 = vadd.f32 %v2693_v48, %v8783_v29  ;;  %v8817_v38 = vmul.f32 %v3066_v36, %v2874_v12 }
 0x482   : > { %v2695_v2 = vpop.f32.mrb[6].mxu1  ;;  %v2808_v28 = vpop.f32.mrb[38].mxu0  ;;  %v3071_v15 = vadd.f32 1.0, %v6315_v22  ;;  %v2945_v61 = vmul.f32 0.70710677, %v2692_v0  ;;  %v8799_v54 = vadd.f32 %v2806_v58, %v8785_v18 }
 0x483   : > { %v6317_v14 = vpop.eup %6316  ;;  %v2697_v63 = vpop.f32.mrb[7].mxu1  ;;  %v8803_v9 = vmul.f32 %v3069_v50, %v2877_v7  ;;  %v2947_v43 = vmul.f32 0.70710677, %v2805_v20  ;;  %v2946_v3 = vmul.f32 0.70710677, %v2694_v47  ;;  %v2696_v23 = vadd.f32 %v2695_v2, %v8779_v26 }
 0x484   : > { %v2810_v41 = vpop.f32.mrb[39].mxu0  ;;  %v8807_v35 = vmul.f32 %v3071_v15, %v2879_v24  ;;  %v3068_v46 = vadd.f32 1.0, %v6317_v14  ;;  %6322 = verf.f32 %v2945_v61  ;;  %v2948_v16 = vmul.f32 0.70710677, %v8799_v54  ;;  %v6319_v56 = vpop.eup %6318 }
 0x485   : > { %6324 = verf.f32 %v2947_v43  ;;  %v2809_v57 = vadd.f32 %v2808_v28, %v8781_v1  ;;  %v2698_v5 = vadd.f32 %v2697_v63, %v8783_v29  ;;  %v6321_v25 = vpop.eup %6320  ;;  %v2811_v8 = vadd.f32 %v2810_v41, %v8785_v18 }
 0x486   : > { %6326 = verf.f32 %v2946_v3  ;;  %v8824_v7 = vmul.f32 %v3068_v46, %v2876_v34  ;;  %v2949_v50 = vmul.f32 0.70710677, %v2696_v23  ;;  %v3070_v28 = vadd.f32 1.0, %v6319_v56 }
 0x487   : > { %v2701_v37 = vpop.f32.mrb[8].mxu1  ;;  %v2814_v49 = vpop.f32.mrb[40].mxu0  ;;  %6328 = verf.f32 %v2948_v16  ;;  %v2951_v2 = vmul.f32 0.70710677, %v2809_v57  ;;  %v8826_v14 = vmul.f32 0.5, %v2692_v0  ;;  %v3072_v15 = vadd.f32 1.0, %v6321_v25 }
 0x488   : > { %v2702_v31 = vadd.f32 %v2701_v37, %v8779_v26  ;;  %v8822_v48 = vadd.f32 %v2814_v49, %v8781_v1  ;;  %v2703_v58 = vpop.f32.mrb[9].mxu1  ;;  %v2816_v22 = vpop.f32.mrb[41].mxu0  ;;  %v2950_v24 = vmul.f32 0.70710677, %v2698_v5  ;;  %v2952_v12 = vmul.f32 0.70710677, %v2811_v8 }
 0x489   : > { %v8828_v61 = vmul.f32 0.5, %v2805_v20  ;;  %6330 = verf.f32 %v2949_v50  ;;  %v2705_v41 = vpop.f32.mrb[10].mxu1  ;;  %v2818_v43 = vpop.f32.mrb[42].mxu0  ;;  %v2704_v34 = vadd.f32 %v2703_v58, %v8783_v29  ;;  %v2817_v46 = vadd.f32 %v2816_v22, %v8785_v18 }
 0x48a   : > { %v2953_v63 = vmul.f32 0.70710677, %v2702_v31  ;;  %6332 = verf.f32 %v2951_v2  ;;  %v2955_v36 = vmul.f32 0.70710677, %v8822_v48  ;;  %v2707_v3 = vpop.f32.mrb[11].mxu1  ;;  %v2820_v16 = vpop.f32.mrb[43].mxu0  ;;  %v2706_v56 = vadd.f32 %v2705_v41, %v8779_v26 }
 0x48b   : > { %v8833_v0 = vmul.f32 0.5, %v2694_v47  ;;  %6334 = verf.f32 %v2950_v24  ;;  %v2819_v20 = vadd.f32 %v2818_v43, %v8781_v1  ;;  %v8837_v37 = vmul.f32 %v3070_v28, %v2878_v55 }
 0x48c   : > { %6336 = verf.f32 %v2952_v12  ;;  %v2954_v49 = vmul.f32 0.70710677, %v2704_v34  ;;  %v2708_v25 = vadd.f32 %v2707_v3, %v8783_v29  ;;  %v8840_v2 = vmul.f32 %v3072_v15, %v2880_v45 }
 0x48d   : > { %v8843_v58 = vmul.f32 0.5, %v8799_v54  ;;  %6338 = verf.f32 %v2953_v63  ;;  %v2956_v47 = vmul.f32 0.70710677, %v2817_v46  ;;  %v8845_v41 = vmul.f32 0.5, %v2696_v23 }
 0x48e   : > { %v6323_v50 = vpop.eup %6322  ;;  %v8847_v43 = vmul.f32 0.5, %v2809_v57  ;;  %6340 = verf.f32 %v2955_v36  ;;  %v2957_v55 = vmul.f32 0.70710677, %v2706_v56  ;;  %v8849_v19 = vmul.f32 0.5, %v2698_v5 }
 0x48f   : > { %v2711_v22 = vpop.f32.mrb[12].mxu1  ;;  %v2824_v24 = vpop.f32.mrb[44].mxu0  ;;  %v8851_v45 = vmul.f32 0.5, %v2811_v8  ;;  %6342 = verf.f32 %v2954_v49  ;;  %v2959_v54 = vmul.f32 0.70710677, %v2819_v20  ;;  %v3073_v52 = vadd.f32 1.0, %v6323_v50 }
 0x490   : > { %v6325_v30 = vpop.eup %6324  ;;  %v2713_v28 = vpop.f32.mrb[13].mxu1  ;;  %v8857_v23 = vmul.f32 0.5, %v2702_v31  ;;  %6344 = verf.f32 %v2956_v47  ;;  %v2958_v57 = vmul.f32 0.70710677, %v2708_v25  ;;  %v2821_v8 = vadd.f32 %v2820_v16, %v8785_v18 }
 0x491   : > { %v2826_v12 = vpop.f32.mrb[45].mxu0  ;;  %v6327_v3 = vpop.eup %6326  ;;  %v3075_v5 = vadd.f32 1.0, %v6325_v30  ;;  %6346 = verf.f32 %v2957_v55  ;;  %v2712_v49 = vadd.f32 %v2711_v22, %v8779_v26  ;;  %v2825_v33 = vadd.f32 %v2824_v24, %v8781_v1 }
 0x492   : > { %v8853_v15 = vpop.f32.mrb[14].mxu1  ;;  %v8855_v63 = vpop.f32.mrb[46].mxu0  ;;  %v3074_v17 = vadd.f32 1.0, %v6327_v3  ;;  %6348 = verf.f32 %v2959_v54  ;;  %v2714_v31 = vadd.f32 %v2713_v28, %v8783_v29  ;;  %v8868_v47 = vmul.f32 0.5, %v8822_v48 }
 0x493   : > { %v8859_v36 = vpop.f32.mrb[15].mxu1  ;;  %v8861_v21 = vpop.f32.mrb[47].mxu0  ;;  %v8870_v40 = vmul.f32 0.5, %v2704_v34  ;;  %6350 = verf.f32 %v2958_v57  ;;  %v2960_v51 = vmul.f32 0.70710677, %v2821_v8  ;;  %v8872_v13 = vmul.f32 0.5, %v2817_v46 }
 0x494   : > { %v6329_v42 = vpop.eup %6328  ;;  %v8874_v16 = vmul.f32 0.5, %v2706_v56  ;;  %v2961_v22 = vmul.f32 0.70710677, %v2712_v49  ;;  %v8877_v24 = vmul.f32 %v3073_v52, %v8826_v14  ;;  %v8879_v28 = vmul.f32 0.5, %v2819_v20 }
 0x495   : > { %v6331_v50 = vpop.eup %6330  ;;  %v3076_v55 = vadd.f32 1.0, %v6329_v42  ;;  %v8881_v54 = vmul.f32 0.5, %v2708_v25  ;;  %v2963_v48 = vmul.f32 0.70710677, %v2825_v33  ;;  %v8888_v42 = vmul.f32 %v3075_v5, %v8828_v61 }
 0x496   : > { %v6333_v30 = vpop.eup %6332  ;;  %v8891_v46 = vmul.f32 %v3074_v17, %v8833_v0  ;;  %6352 = verf.f32 %v2960_v51  ;;  %v2962_v56 = vmul.f32 0.70710677, %v2714_v31  ;;  %v3077_v25 = vadd.f32 1.0, %v6331_v50 }
 0x497   : > { %v6335_v3 = vpop.eup %6334  ;;  %v8883_v34 = vpop.f32.mrb[16].mxu1  ;;  %v3079_v27 = vadd.f32 1.0, %v6333_v30  ;;  %6354 = verf.f32 %v2961_v22  ;;  %v2827_v11 = vadd.f32 %v2826_v12, %v8785_v18  ;;  %v8903_v17 = vmul.f32 %v3076_v55, %v8843_v58 }
 0x498   : > { %v8885_v57 = vpop.f32.mrb[48].mxu0  ;;  %v6337_v6 = vpop.eup %6336  ;;  %v3078_v51 = vadd.f32 1.0, %v6335_v3  ;;  %6356 = verf.f32 %v2963_v48  ;;  %v3194_v0 = vpack.c.bf16 %v8837_v37, %v8817_v38  ;;  %v8911_v22 = vmul.f32 0.5, %v2821_v8 }
 0x499   : > { %v8893_v52 = vpop.f32.mrb[17].mxu1  ;;  %v8895_v14 = vpop.f32.mrb[49].mxu0  ;;  %v8913_v12 = vmul.f32 0.5, %v2712_v49  ;;  %6358 = verf.f32 %v2962_v56  ;;  %v2964_v60 = vmul.f32 0.70710677, %v2827_v11  ;;  %v8915_v53 = vmul.f32 0.5, %v2825_v33 }
 0x49a   : > { %v6339_v20 = vpop.eup %6338  ;;  %v8898_v4 = vpop.f32.mrb[18].mxu1  ;;  %v8917_v58 = vmul.f32 0.5, %v2714_v31  ;;  %3520 = vmatprep.mubr.bf16.mxu1 %v3194_v0  ;;  %v3196_v38 = vpack.c.bf16 %v8840_v2, %v8824_v7  ;;  %v2716_v37 = vadd.f32 %v8853_v15, %v8779_v26  ;;  %v8924_v8 = vmul.f32 %v3077_v25, %v8845_v41 }
 0x49b   : > { %v8900_v44 = vpop.f32.mrb[50].mxu0  ;;  %v6341_v61 = vpop.eup %6340  ;;  %v8927_v49 = vmul.f32 %v3079_v27, %v8847_v43  ;;  %v3080_v3 = vadd.f32 1.0, %v6337_v6  ;;  %v2829_v33 = vadd.f32 %v8855_v63, %v8781_v1  ;;  %v10361_v31 = vpack.c.bf16 %v8803_v9, %v8801_v59 }
 0x49c   : > { %v8907_v5 = vpop.f32.mrb[19].mxu1  ;;  %v8909_v50 = vpop.f32.mrb[51].mxu0  ;;  %v8935_v7 = vmul.f32 %v3078_v51, %v8849_v19  ;;  %v3081_v2 = vadd.f32 1.0, %v6339_v20  ;;  %v3083_v15 = vadd.f32 1.0, %v6341_v61  ;;  %3617 = vmatprep.mubr.bf16.mxu0 %v3196_v38  ;;  %v2965_v41 = vmul.f32 0.70710677, %v2716_v37 }
 0x49d   : > { %v6343_v30 = vpop.eup %6342  ;;  %3521 = vmatmul.mubr.bf16.vlgmr.msra.gmra.mrb[32].mxu1 %v10361_v31  ;;  %6360 = verf.f32 %v2964_v60  ;;  %v2967_v6 = vmul.f32 0.70710677, %v2829_v33  ;;  %v10362_v43 = vpack.c.bf16 %v8807_v35, %v8805_v10  ;;  %v2718_v20 = vadd.f32 %v8859_v36, %v8783_v29 }
 0x49e   : > { %v6345_v62 = vpop.eup %6344  ;;  %v3082_v25 = vadd.f32 1.0, %v6343_v30  ;;  %6362 = verf.f32 %v2965_v41  ;;  %v2831_v60 = vadd.f32 %v8861_v21, %v8785_v18  ;;  %v2722_v10 = vadd.f32 %v8883_v34, %v8779_v26 }
 0x49f   : > { %v6347_v55 = vpop.eup %6346  ;;  %v3084_v27 = vadd.f32 1.0, %v6345_v62  ;;  %3618 = vmatmul.mubr.bf16.vlgmr.msra.gmra.mrb[64].mxu0 %v10362_v43  ;;  %v8940_v63 = vpop.f32.mrb[20].mxu1  ;;  %6364 = verf.f32 %v2967_v6  ;;  %v3144_v38 = vmul.f32 %v3080_v3, %v8851_v45  ;;  %v8960_v36 = vmul.f32 %v3081_v2, %v8857_v23 }
 0x4a0   : > { %v6349_v48 = vpop.eup %6348  ;;  %v8942_v59 = vpop.f32.mrb[52].mxu0  ;;  %v3085_v9 = vadd.f32 1.0, %v6347_v55  ;;  %v8962_v55 = vmul.f32 0.5, %v2827_v11  ;;  %v2966_v31 = vmul.f32 0.70710677, %v2718_v20  ;;  %v8969_v34 = vmul.f32 %v3083_v15, %v8868_v47 }
 0x4a1   : > { %v6351_v56 = vpop.eup %6350  ;;  %v3087_v19 = vadd.f32 1.0, %v6349_v48  ;;  %v8946_v61 = vpop.f32.mrb[21].mxu1  ;;  %v8974_v6 = vmul.f32 0.5, %v2716_v37  ;;  %v2968_v45 = vmul.f32 0.70710677, %v2831_v60  ;;  %v8977_v23 = vmul.f32 %v3084_v27, %v8872_v13 }
 0x4a2   : > { %v8948_v51 = vpop.f32.mrb[53].mxu0  ;;  %v3086_v62 = vadd.f32 1.0, %v6351_v56  ;;  %v8954_v35 = vpop.f32.mrb[22].mxu1  ;;  %v8972_v56 = vmul.f32 %v3082_v25, %v8870_v40  ;;  %v8980_v11 = vmul.f32 %v3085_v9, %v8874_v16  ;;  %v8985_v43 = vmul.f32 0.5, %v2829_v33 }
 0x4a3   : > { %v8956_v0 = vpop.f32.mrb[54].mxu0  ;;  %v6353_v30 = vpop.eup %6352  ;;  %v8983_v2 = vmul.f32 %v3087_v19, %v8879_v28  ;;  %6366 = verf.f32 %v2966_v31  ;;  %v2969_v40 = vmul.f32 0.70710677, %v2722_v10  ;;  %v2835_v37 = vadd.f32 %v8885_v57, %v8781_v1 }
 0x4a4   : > { %v8964_v48 = vpop.f32.mrb[23].mxu1  ;;  %v8966_v41 = vpop.f32.mrb[55].mxu0  ;;  %v8988_v15 = vmul.f32 %v3086_v62, %v8881_v54  ;;  %v3088_v25 = vadd.f32 1.0, %v6353_v30  ;;  %6368 = verf.f32 %v2968_v45  ;;  %v2724_v13 = vadd.f32 %v8893_v52, %v8783_v29 }
 0x4a5   : > { %v6355_v21 = vpop.eup %6354  ;;  %v2837_v16 = vadd.f32 %v8895_v14, %v8785_v18  ;;  %v8996_v33 = vmul.f32 0.5, %v2718_v20  ;;  %v2971_v27 = vmul.f32 0.70710677, %v2835_v37  ;;  %v3198_v54 = vpack.c.bf16 %v8935_v7, %v8891_v46 }
 0x4a6   : > { %v6357_v3 = vpop.eup %6356  ;;  %v3089_v28 = vadd.f32 1.0, %v6355_v21  ;;  %v9004_v30 = vmul.f32 0.5, %v2831_v60  ;;  %v2970_v31 = vmul.f32 0.70710677, %v2724_v13  ;;  %6370 = verf.f32 %v2969_v40 }
 0x4a7   : > { %v6359_v47 = vpop.eup %6358  ;;  %v9000_v9 = vpop.f32.mrb[24].mxu1  ;;  %v3091_v57 = vadd.f32 1.0, %v6357_v3  ;;  %v2972_v14 = vmul.f32 0.70710677, %v2837_v16  ;;  %3528 = vmatprep.mubr.bf16.mxu1 %v3198_v54  ;;  %v3200_v20 = vpack.c.bf16 %v3144_v38, %v8903_v17  ;;  %v2726_v46 = vadd.f32 %v8898_v4, %v8779_v26 }
 0x4a8   : > { %v9002_v19 = vpop.f32.mrb[56].mxu0  ;;  %v3090_v62 = vadd.f32 1.0, %v6359_v47  ;;  %v9006_v52 = vpop.f32.mrb[25].mxu1  ;;  %v9015_v47 = vmul.f32 0.5, %v2722_v10  ;;  %6372 = verf.f32 %v2971_v27  ;;  %v2839_v60 = vadd.f32 %v8900_v44, %v8781_v1 }
 0x4a9   : > { %v6361_v45 = vpop.eup %6360  ;;  %v9011_v7 = vpop.f32.mrb[57].mxu0  ;;  %v3197_v40 = vpack.c.bf16 %v8924_v8, %v8877_v24  ;;  %v9026_v4 = vmul.f32 %v3088_v25, %v8911_v22  ;;  %v9029_v32 = vmul.f32 %v3089_v28, %v8913_v12  ;;  %6374 = verf.f32 %v2970_v31  ;;  %3625 = vmatprep.mubr.bf16.mxu0 %v3200_v20 }
 0x4aa   : > { %v9013_v21 = vpop.f32.mrb[26].mxu1  ;;  %v6363_v3 = vpop.eup %6362  ;;  %v2973_v10 = vmul.f32 0.70710677, %v2726_v46  ;;  %v3092_v44 = vadd.f32 1.0, %v6361_v45  ;;  %6376 = verf.f32 %v2972_v14  ;;  %v2975_v39 = vmul.f32 0.70710677, %v2839_v60 }
 0x4ab   : > { %v9021_v54 = vpop.f32.mrb[58].mxu0  ;;  %v9023_v17 = vpop.f32.mrb[27].mxu1  ;;  %3529 = vmatmul.mubr.bf16.gmra.mrb[36].mxu1 %v3197_v40  ;;  %v3199_v24 = vpack.c.bf16 %v8927_v49, %v8888_v42  ;;  %v9036_v8 = vmul.f32 %v3091_v57, %v8915_v53  ;;  %v9039_v22 = vmul.f32 %v3090_v62, %v8917_v58  ;;  %v2728_v12 = vadd.f32 %v8907_v5, %v8783_v29 }
 0x4ac   : > { %v6365_v38 = vpop.eup %6364  ;;  %v9031_v27 = vpop.f32.mrb[59].mxu0  ;;  %v2841_v25 = vadd.f32 %v8909_v50, %v8785_v18  ;;  %v3093_v28 = vadd.f32 1.0, %v6363_v3  ;;  %6378 = verf.f32 %v2973_v10  ;;  %v2732_v45 = vadd.f32 %v8940_v63, %v8779_v26 }
 0x4ad   : > { %v3095_v31 = vadd.f32 1.0, %v6365_v38  ;;  %3626 = vmatmul.mubr.bf16.gmra.mrb[68].mxu0 %v3199_v24  ;;  %v6367_v42 = vpop.eup %6366  ;;  %v9047_v49 = vmul.f32 0.5, %v2835_v37  ;;  %6380 = verf.f32 %v2975_v39  ;;  %v2974_v53 = vmul.f32 0.70710677, %v2728_v12 }
 0x4ae   : > { %v2845_v58 = vadd.f32 %v8942_v59, %v8781_v1  ;;  %v6369_v5 = vpop.eup %6368  ;;  %v9054_v50 = vmul.f32 %v3092_v44, %v8962_v55  ;;  %v9056_v62 = vmul.f32 0.5, %v2724_v13  ;;  %v9058_v14 = vmul.f32 0.5, %v2837_v16 }
 0x4af   : > { %v9051_v57 = vpop.f32.mrb[28].mxu1  ;;  %v2976_v20 = vmul.f32 0.70710677, %v2841_v25  ;;  %v9060_v63 = vmul.f32 0.5, %v2726_v46  ;;  %v9062_v37 = vmul.f32 0.5, %v2839_v60  ;;  %6382 = verf.f32 %v2974_v53  ;;  %v9064_v3 = vpop.f32.mrb[60].mxu0 }
 0x4b0   : > { %v2977_v39 = vmul.f32 0.70710677, %v2732_v45  ;;  %v9066_v59 = vpop.f32.mrb[29].mxu1  ;;  %v9069_v40 = vmul.f32 %v3093_v28, %v8974_v6  ;;  %v9072_v55 = vmul.f32 %v3095_v31, %v8985_v43  ;;  %v3094_v13 = vadd.f32 1.0, %v6367_v42  ;;  %v9076_v46 = vpop.f32.mrb[61].mxu0 }
 0x4b1   : > { %v2734_v16 = vadd.f32 %v8946_v61, %v8783_v29  ;;  %10363 = vst [vmem:[#allocation49_spill] sm:$0xff] %v9076_v46  ;;  %v9078_v60 = vpop.f32.mrb[30].mxu1  ;;  %v6371_v38 = vpop.eup %6370  ;;  %v3096_v10 = vadd.f32 1.0, %v6369_v5  ;;  %v2979_v44 = vmul.f32 0.70710677, %v2845_v58  ;;  %v2847_v24 = vadd.f32 %v8948_v51, %v8785_v18 }
 0x4b2   : > { %10364 = vst [vmem:[#allocation48_spill] sm:$0xff] %v9078_v60  ;;  %v3202_v6 = vpack.c.bf16 %v8988_v15, %v8972_v56  ;;  %v9084_v28 = vpop.f32.mrb[62].mxu0  ;;  %v9086_v43 = vpop.f32.mrb[31].mxu1  ;;  %v9088_v42 = vmul.f32 0.5, %v2728_v12  ;;  %v9090_v61 = vmul.f32 0.5, %v2841_v25  ;;  %6384 = verf.f32 %v2976_v20 }
 0x4b3   : > { %10365 = vst [vmem:[#allocation51_spill] sm:$0xff] %v9086_v43  ;;  %v6373_v31 = vpop.eup %6372  ;;  %v2978_v53 = vmul.f32 0.70710677, %v2734_v16  ;;  %v9092_v60 = vpop.f32.mrb[63].mxu0  ;;  %v9094_v46 = vmul.f32 0.5, %v2732_v45  ;;  %6386 = verf.f32 %v2977_v39  ;;  %v3204_v56 = vpack.c.bf16 %v9026_v4, %v8977_v23 }
 0x4b4   : > { %10366 = vst [vmem:[#allocation50_spill] sm:$0xff] %v9092_v60  ;;  %v6375_v5 = vpop.eup %6374  ;;  %v2980_v51 = vmul.f32 0.70710677, %v2847_v24  ;;  %3536 = vmatprep.mubr.bf16.mxu1 %v3202_v6  ;;  %v9099_v43 = vmul.f32 %v3094_v13, %v8996_v33  ;;  %v3097_v12 = vadd.f32 1.0, %v6371_v38  ;;  %v9101_v25 = vmul.f32 0.5, %v2845_v58 }
 0x4b5   : > { %v6377_v15 = vpop.eup %6376  ;;  %v2736_v20 = vadd.f32 %v8954_v35, %v8779_v26  ;;  %v9106_v60 = vmul.f32 %v3096_v10, %v9004_v30  ;;  %6388 = verf.f32 %v2979_v44  ;;  %3633 = vmatprep.mubr.bf16.mxu0 %v3204_v56  ;;  %v2849_v45 = vadd.f32 %v8956_v0, %v8781_v1 }
 0x4b6   : > { %v3201_v23 = vpack.c.bf16 %v8980_v11, %v8960_v36  ;;  %v6379_v4 = vpop.eup %6378  ;;  %v3099_v33 = vadd.f32 1.0, %v6373_v31  ;;  %v3098_v39 = vadd.f32 1.0, %v6375_v5  ;;  %6390 = verf.f32 %v2978_v53 }
 0x4b7   : > { %v2981_v58 = vmul.f32 0.70710677, %v2736_v20  ;;  %v6381_v13 = vpop.eup %6380  ;;  %v3100_v38 = vadd.f32 1.0, %v6377_v15  ;;  %6392 = verf.f32 %v2980_v51  ;;  %v2983_v35 = vmul.f32 0.70710677, %v2849_v45 }
 0x4b8   : > { %3537 = vmatmul.mubr.bf16.gmra.mrb[40].mxu1 %v3201_v23  ;;  %v3203_v30 = vpack.c.bf16 %v8983_v2, %v8969_v34  ;;  %v9115_v10 = vmul.f32 %v3097_v12, %v9015_v47  ;;  %v9117_v0 = vmul.f32 0.5, %v2734_v16  ;;  %v2738_v36 = vadd.f32 %v8964_v48, %v8783_v29 }
 0x4b9   : > { %v2851_v11 = vadd.f32 %v8966_v41, %v8785_v18  ;;  %v6383_v44 = vpop.eup %6382  ;;  %v3101_v6 = vadd.f32 1.0, %v6379_v4  ;;  %6394 = verf.f32 %v2981_v58  ;;  %v2742_v31 = vadd.f32 %v9000_v9, %v8779_v26 }
 0x4ba   : > { %3634 = vmatmul.mubr.bf16.gmra.mrb[72].mxu0 %v3203_v30  ;;  %v2855_v34 = vadd.f32 %v9002_v19, %v8781_v1  ;;  %v3103_v2 = vadd.f32 1.0, %v6381_v13  ;;  %v9127_v47 = vmul.f32 0.5, %v2847_v24  ;;  %6396 = verf.f32 %v2983_v35 }
 0x4bb   : > { %v2982_v16 = vmul.f32 0.70710677, %v2738_v36  ;;  %v9130_v48 = vmul.f32 %v3099_v33, %v9047_v49  ;;  %v9133_v41 = vmul.f32 %v3098_v39, %v9056_v62  ;;  %v9136_v53 = vmul.f32 %v3100_v38, %v9058_v14 }
 0x4bc   : > { %v2984_v5 = vmul.f32 0.70710677, %v2851_v11  ;;  %v6385_v51 = vpop.eup %6384  ;;  %v3102_v9 = vadd.f32 1.0, %v6383_v44  ;;  %v9138_v56 = vmul.f32 0.5, %v2736_v20  ;;  %v2985_v19 = vmul.f32 0.70710677, %v2742_v31 }
 0x4bd   : > { %6398 = verf.f32 %v2982_v16  ;;  %v6387_v24 = vpop.eup %6386  ;;  %v9141_v15 = vmul.f32 %v3101_v6, %v9060_v63  ;;  %v9143_v12 = vmul.f32 0.5, %v2849_v45  ;;  %v2987_v49 = vmul.f32 0.70710677, %v2855_v34 }
 0x4be   : > { %6400 = verf.f32 %v2984_v5  ;;  %v9146_v62 = vmul.f32 %v3103_v2, %v9062_v37  ;;  %v9148_v14 = vmul.f32 0.5, %v2738_v36  ;;  %v2744_v23 = vadd.f32 %v9006_v52, %v8783_v29 }
 0x4bf   : > { %v2857_v20 = vadd.f32 %v9011_v7, %v8785_v18  ;;  %v6389_v4 = vpop.eup %6388  ;;  %v3104_v33 = vadd.f32 1.0, %v6385_v51  ;;  %v9154_v39 = vmul.f32 0.5, %v2851_v11  ;;  %v9156_v63 = vmul.f32 0.5, %v2742_v31 }
 0x4c0   : > { %v3206_v45 = vpack.c.bf16 %v9099_v43, %v9039_v22  ;;  %v6391_v58 = vpop.eup %6390  ;;  %v9161_v37 = vmul.f32 %v3102_v9, %v9088_v42  ;;  %v3105_v13 = vadd.f32 1.0, %v6387_v24  ;;  %6402 = verf.f32 %v2985_v19 }
 0x4c1   : > { %v2986_v38 = vmul.f32 0.70710677, %v2744_v23  ;;  %v6393_v52 = vpop.eup %6392  ;;  %6404 = verf.f32 %v2987_v49  ;;  %v2988_v35 = vmul.f32 0.70710677, %v2857_v20  ;;  %v3208_v7 = vpack.c.bf16 %v9106_v60, %v9054_v50 }
 0x4c2   : > { %3544 = vmatprep.mubr.bf16.mxu1 %v3206_v45  ;;  %v2746_v30 = vadd.f32 %v9013_v21, %v8779_v26  ;;  %v3107_v36 = vadd.f32 1.0, %v6389_v4  ;;  %v2859_v22 = vadd.f32 %v9021_v54, %v8781_v1  ;;  %v3205_v43 = vpack.c.bf16 %v9069_v40, %v9029_v32 }
 0x4c3   : > { %6406 = verf.f32 %v2986_v38  ;;  %v6395_v42 = vpop.eup %6394  ;;  %v3168_v11 = vmul.f32 %v3104_v33, %v9090_v61  ;;  %v9172_v44 = vmul.f32 0.5, %v2855_v34  ;;  %3641 = vmatprep.mubr.bf16.mxu0 %v3208_v7  ;;  %v3106_v60 = vadd.f32 1.0, %v6391_v58  ;;  %v10367_v58 = vld [vmem:[#allocation49_spill] sm:$0xff] }
 0x4c4   : > { %6408 = verf.f32 %v2988_v35  ;;  %v2989_v6 = vmul.f32 0.70710677, %v2746_v30  ;;  %v6397_v50 = vpop.eup %6396  ;;  %v3108_v31 = vadd.f32 1.0, %v6393_v52  ;;  %v2991_v21 = vmul.f32 0.70710677, %v2859_v22  ;;  %3545 = vmatmul.mubr.bf16.gmra.mrb[44].mxu1 %v3205_v43 }
 0x4c5   : > { %v3207_v2 = vpack.c.bf16 %v9072_v55, %v9036_v8  ;;  %v9177_v54 = vmul.f32 %v3105_v13, %v9094_v46  ;;  %v2748_v32 = vadd.f32 %v9023_v17, %v8783_v29  ;;  %v2861_v40 = vadd.f32 %v9031_v27, %v8785_v18 }
 0x4c6   : > { %6410 = verf.f32 %v2989_v6  ;;  %v9184_v34 = vmul.f32 %v3107_v36, %v9101_v25  ;;  %v3109_v16 = vadd.f32 1.0, %v6395_v42  ;;  %v9188_v8 = vadd.f32 %v9051_v57, %v8779_v26  ;;  %v10368_v42 = vld [vmem:[#allocation48_spill] sm:$0xff] }
 0x4c7   : > { %v6399_v61 = vpop.eup %6398  ;;  %6412 = verf.f32 %v2991_v21  ;;  %3642 = vmatmul.mubr.bf16.gmra.mrb[76].mxu0 %v3207_v2  ;;  %v3111_v46 = vadd.f32 1.0, %v6397_v50  ;;  %v9190_v5 = vmul.f32 0.5, %v2744_v23  ;;  %v2990_v51 = vmul.f32 0.70710677, %v2748_v32  ;;  %v10369_v2 = vld [vmem:[#allocation51_spill] sm:$0xff] }
 0x4c8   : > { %v6401_v55 = vpop.eup %6400  ;;  %v9194_v17 = vadd.f32 %v9064_v3, %v8781_v1  ;;  %v9197_v27 = vmul.f32 %v3106_v60, %v9117_v0  ;;  %v9200_v25 = vmul.f32 %v3108_v31, %v9127_v47  ;;  %v9202_v9 = vmul.f32 0.5, %v2857_v20 }
 0x4c9   : > { %v2992_v19 = vmul.f32 0.70710677, %v2861_v40  ;;  %v3110_v57 = vadd.f32 1.0, %v6399_v61  ;;  %v3112_v24 = vadd.f32 1.0, %v6401_v55  ;;  %v2925_v49 = vmul.f32 0.5, %v2746_v30 }
 0x4ca   : > { %6414 = verf.f32 %v2990_v51  ;;  %v6403_v23 = vpop.eup %6402  ;;  %v9205_v4 = vmul.f32 %v3109_v16, %v9138_v56  ;;  %v2927_v33 = vmul.f32 0.5, %v2859_v22  ;;  %v2993_v3 = vmul.f32 0.70710677, %v9188_v8 }
 0x4cb   : > { %6416 = verf.f32 %v2992_v19  ;;  %v6405_v0 = vpop.eup %6404  ;;  %v9209_v45 = vmul.f32 %v3111_v46, %v9143_v12  ;;  %v2995_v47 = vmul.f32 0.70710677, %v9194_v17  ;;  %v9214_v20 = vadd.f32 %v9066_v59, %v8783_v29 }
 0x4cc   : > { %v9218_v13 = vadd.f32 %v10367_v58, %v8785_v18  ;;  %v2926_v38 = vmul.f32 0.5, %v2748_v32  ;;  %v2928_v52 = vmul.f32 0.5, %v2861_v40  ;;  %v3210_v35 = vpack.c.bf16 %v9161_v37, %v9133_v41 }
 0x4cd   : > { %v6407_v56 = vpop.eup %6406  ;;  %v3212_v7 = vpack.c.bf16 %v3168_v11, %v9136_v53  ;;  %v3174_v30 = vmul.f32 %v3110_v57, %v9148_v14  ;;  %v3176_v36 = vmul.f32 %v3112_v24, %v9154_v39  ;;  %v3113_v22 = vadd.f32 1.0, %v6403_v23 }
 0x4ce   : > { %v6409_v12 = vpop.eup %6408  ;;  %v2994_v59 = vmul.f32 0.70710677, %v9214_v20  ;;  %6418 = verf.f32 %v2993_v3  ;;  %v2996_v43 = vmul.f32 0.70710677, %v9218_v13  ;;  %3552 = vmatprep.mubr.bf16.mxu1 %v3210_v35  ;;  %v2756_v6 = vadd.f32 %v10368_v42, %v8779_v26 }
 0x4cf   : > { %3649 = vmatprep.mubr.bf16.mxu0 %v3212_v7  ;;  %v9231_v41 = vadd.f32 %v9084_v28, %v8781_v1  ;;  %v3115_v37 = vadd.f32 1.0, %v6405_v0  ;;  %6420 = verf.f32 %v2995_v47  ;;  %v3209_v14 = vpack.c.bf16 %v9141_v15, %v9115_v10  ;;  %v10370_v10 = vld [vmem:[#allocation50_spill] sm:$0xff] }
 0x4d0   : > { %v6411_v53 = vpop.eup %6410  ;;  %v3211_v39 = vpack.c.bf16 %v9146_v62, %v9130_v48  ;;  %v3114_v50 = vadd.f32 1.0, %v6407_v56  ;;  %v3116_v60 = vadd.f32 1.0, %v6409_v12  ;;  %6422 = verf.f32 %v2994_v59 }
 0x4d1   : > { %v6413_v11 = vpop.eup %6412  ;;  %v3117_v31 = vadd.f32 1.0, %v6411_v53  ;;  %6424 = verf.f32 %v2996_v43  ;;  %v2997_v26 = vmul.f32 0.70710677, %v2756_v6  ;;  %v2999_v1 = vmul.f32 0.70710677, %v9231_v41  ;;  %3553 = vmatmul.mubr.bf16.gmra.mrb[48].mxu1 %v3209_v14 }
 0x4d2   : > { %v3119_v21 = vadd.f32 1.0, %v6413_v11  ;;  %3650 = vmatmul.mubr.bf16.gmra.mrb[80].mxu0 %v3211_v39  ;;  %v2758_v32 = vadd.f32 %v10369_v2, %v8783_v29  ;;  %v2871_v15 = vadd.f32 %v10370_v10, %v8785_v18  ;;  %v3214_v48 = vpack.c.bf16 %v3174_v30, %v9197_v27  ;;  %v5999_v2 = vld [vmem:[%s7311_s11 + $0x14] ss:$8 sps:$4 sm:$0xff]   ;;  %v6002_v10 = vld [vmem:[%s7311_s11 + $0x24] ss:$8 sps:$4 sm:$0xff]  }
 0x4d3   : > { %v3181_v28 = vmul.f32 %v3117_v31, %v2925_v49  ;;  %6426 = verf.f32 %v2997_v26  ;;  %v3216_v61 = vpack.c.bf16 %v3176_v36, %v9200_v25  ;;  %v3213_v16 = vpack.c.bf16 %v9205_v4, %v9177_v54 }
 0x4d4   : > { %v6415_v62 = vpop.eup %6414  ;;  %v3183_v40 = vmul.f32 %v3119_v21, %v2927_v33  ;;  %v3177_v46 = vmul.f32 %v3113_v22, %v9156_v63  ;;  %6428 = verf.f32 %v2999_v1  ;;  %v2998_v19 = vmul.f32 0.70710677, %v2758_v32  ;;  %3560 = vmatprep.mubr.bf16.mxu1 %v3214_v48  ;;  %v5994_v1 = vld [vmem:[%s7311_s11] ss:$8 sps:$4 sm:$0xff]   ;;  %v6005_v48 = vld [vmem:[%s7311_s11 + $0x34] ss:$8 sps:$4 sm:$0xff]  }
 0x4d5   : > { %v6417_v55 = vpop.eup %6416  ;;  %v3118_v51 = vadd.f32 1.0, %v6415_v62  ;;  %v3179_v29 = vmul.f32 %v3115_v37, %v9172_v44  ;;  %v3000_v57 = vmul.f32 0.70710677, %v2871_v15  ;;  %3657 = vmatprep.mubr.bf16.mxu0 %v3216_v61  ;;  %v3215_v27 = vpack.c.bf16 %v9209_v45, %v9184_v34  ;;  %v6003_v62 = vld [vmem:[%s7311_s11 + $0x30] ss:$8 sps:$4 sm:$0xff]  }
 0x4d6   : > { %v3120_v18 = vadd.f32 1.0, %v6417_v55  ;;  %v3178_v25 = vmul.f32 %v3114_v50, %v9190_v5  ;;  %6430 = verf.f32 %v2998_v19  ;;  %v3217_v54 = vpack.c.bf16 %v3181_v28, %v3177_v46  ;;  %v5996_v28 = vld [vmem:[%s7311_s11 + $0x4] ss:$8 sps:$4 sm:$0xff]   ;;  %v6006_v61 = vld [vmem:[%s7311_s11 + $0x40] ss:$8 sps:$4 sm:$0xff]  }
 0x4d7   : > { %v3182_v24 = vmul.f32 %v3118_v51, %v2926_v38  ;;  %v3180_v49 = vmul.f32 %v3116_v60, %v9202_v9  ;;  %6432 = verf.f32 %v3000_v57  ;;  %v3219_v23 = vpack.c.bf16 %v3183_v40, %v3179_v29  ;;  %3938 = vmatprep.subr.bf16.mxu1 %v5996_v28  ;;  %v6008_v40 = vld [vmem:[%s7311_s11 + $0x44] ss:$8 sps:$4 sm:$0xff]   ;;  %v6009_v55 = vld [vmem:[%s7311_s11 + $0x50] ss:$8 sps:$4 sm:$0xff]   ;;  %v9275_v51 = vld [vmem:[%s708_s0] ss:$0 sm:$0xff] }
 0x4d8   : > { %v3184_v63 = vmul.f32 %v3120_v18, %v2928_v52  ;;  %v6419_v4 = vpop.eup %6418  ;;  %v2929_v56 = vmul.f32 0.5, %v9188_v8  ;;  %v2933_v9 = vmul.f32 0.5, %v2756_v6  ;;  %v2931_v52 = vmul.f32 0.5, %v9194_v17  ;;  %3939 = vmatpush1.bf16.msra.mxu1 %v5994_v1 }
 0x4d9   : > { %v3218_v33 = vpack.c.bf16 %v3182_v24, %v3178_v25  ;;  %v6421_v3 = vpop.eup %6420  ;;  %3561 = vmatmul.mubr.bf16.gmra.mrb[52].mxu1 %v3213_v16  ;;  %v3121_v34 = vadd.f32 1.0, %v6419_v4  ;;  %v2935_v7 = vmul.f32 0.5, %v9231_v41  ;;  %v2930_v22 = vmul.f32 0.5, %v9214_v20  ;;  %3940 = vmatprep.subr.bf16.mxu1 %v5999_v2  ;;  %v6011_v16 = vld [vmem:[%s7311_s11 + $0x54] ss:$8 sps:$4 sm:$0xff]  }
 0x4da   : > { %3658 = vmatmul.mubr.bf16.gmra.mrb[84].mxu0 %v3215_v27  ;;  %v3220_v44 = vpack.c.bf16 %v3184_v63, %v3180_v49  ;;  %v6423_v0 = vpop.eup %6422  ;;  %v3123_v45 = vadd.f32 1.0, %v6421_v3  ;;  %v2934_v14 = vmul.f32 0.5, %v2758_v32  ;;  %v2932_v8 = vmul.f32 0.5, %v9218_v13  ;;  %v5997_v32 = vld [vmem:[%s7311_s11 + $0x10] ss:$8 sps:$4 sm:$0xff]  }
 0x4db   : > { %3568 = vmatprep.mubr.bf16.mxu1 %v3218_v33  ;;  %v6425_v47 = vpop.eup %6424  ;;  %v3122_v35 = vadd.f32 1.0, %v6423_v0  ;;  %v3185_v36 = vmul.f32 %v3121_v34, %v2929_v56  ;;  %v2936_v17 = vmul.f32 0.5, %v2871_v15  ;;  %v10371_v13 = vmov 0   ;;  %v6000_v15 = vld [vmem:[%s7311_s11 + $0x20] ss:$8 sps:$4 sm:$0xff]   ;;  %v10373_v0 = vld [vmem:[#allocation36_spill] sm:$0xff] }
 0x4dc   : > { %3665 = vmatprep.mubr.bf16.mxu0 %v3220_v44  ;;  %v3124_v59 = vadd.f32 1.0, %v6425_v47  ;;  %v3187_v53 = vmul.f32 %v3123_v45, %v2931_v52  ;;  %3941 = vmatpush1.bf16.msra.mxu1 %v5997_v32 }
 0x4dd   : > { %v6427_v5 = vpop.eup %6426  ;;  %v3186_v11 = vmul.f32 %v3122_v35, %v2930_v22  ;;  %3942 = vmatprep.subr.bf16.mxu1 %v6002_v10 }
 0x4de   : > { %v6429_v58 = vpop.eup %6428  ;;  %v3125_v38 = vadd.f32 1.0, %v6427_v5  ;;  %v3188_v60 = vmul.f32 %v3124_v59, %v2932_v8  ;;  %v10374_v5 = vld [vmem:[#allocation37_spill] sm:$0xff] }
 0x4df   : > { %v3127_v12 = vadd.f32 1.0, %v6429_v58 }
 0x4e0   : > { %v6431_v30 = vpop.eup %6430  ;;  %v3189_v43 = vmul.f32 %v3125_v38, %v2933_v9  ;;  %3943 = vmatpush1.bf16.msra.mxu1 %v6000_v15 }
 0x4e1   : > { %v6433_v42 = vpop.eup %6432  ;;  %v3191_v37 = vmul.f32 %v3127_v12, %v2935_v7  ;;  %v3126_v39 = vadd.f32 1.0, %v6431_v30  ;;  %3569 = vmatmul.mubr.bf16.gmra.mrb[56].mxu1 %v3217_v54  ;;  %3944 = vmatprep.subr.bf16.mxu1 %v6005_v48 }
 0x4e2   : > { %3666 = vmatmul.mubr.bf16.gmra.mrb[88].mxu0 %v3219_v23  ;;  %v3128_v6 = vadd.f32 1.0, %v6433_v42  ;;  %v3221_v41 = vpack.c.bf16 %v3189_v43, %v3185_v36 }
 0x4e3   : > { %v3190_v50 = vmul.f32 %v3126_v39, %v2934_v14  ;;  %v3223_v20 = vpack.c.bf16 %v3191_v37, %v3187_v53  ;;  %v10375_v39 = vld [vmem:[#allocation52_spill] sm:$0xff] }
 0x4e4   : > { %v3192_v31 = vmul.f32 %v3128_v6, %v2936_v17  ;;  %3945 = vmatpush1.bf16.msra.mxu1 %v6003_v62  ;;  %v10376_v6 = vld [vmem:[#allocation54_spill] sm:$0xff] }
 0x4e5   : > { %v3222_v21 = vpack.c.bf16 %v3190_v50, %v3186_v11  ;;  %3946 = vmatprep.subr.bf16.mxu1 %v6008_v40 }
 0x4e6   : > { %v3224_v26 = vpack.c.bf16 %v3192_v31, %v3188_v60 }
 0x4e7   : > { %3576 = vmatprep.mubr.bf16.mxu1 %v3222_v21 }
 0x4e8   : > { %3673 = vmatprep.mubr.bf16.mxu0 %v3224_v26  ;;  %3947 = vmatpush1.bf16.msra.mxu1 %v6006_v61 }
 0x4e9   : > { %3577 = vmatmul.mubr.bf16.gmra.mrb[60].mxu1 %v3221_v41  ;;  %3948 = vmatprep.subr.bf16.mxu1 %v6011_v16  ;;  %v10377_v16 = vld [vmem:[#allocation55_spill] sm:$0xff] }
 0x4ea   : > { %3674 = vmatmul.mubr.bf16.gmra.mrb[92].mxu0 %v3223_v20  ;;  %3970 = vmatprep.mubr.bf16.mxu1 %v10371_v13 }
 0x4ec   : > { %3949 = vmatpush1.bf16.msra.mxu1 %v6009_v55 }
 0x570   : > { %v5558_v46 = vpop.f32.mrb[32].mxu1 }
 0x571   : > { %v5559_v19 = vpop.f32.mrb[33].mxu1 }
 0x572   : > { %v5622_v29 = vpop.f32.mrb[64].mxu0  ;;  %v5560_v18 = vadd.f32 %v5559_v19, %v5558_v46  ;;  %v5561_v57 = vpop.f32.mrb[34].mxu1  ;;  %v10378_v19 = vld [vmem:[#allocation53_spill] sm:$0xff] }
 0x573   : > { %v5623_v27 = vpop.f32.mrb[65].mxu0  ;;  %v5562_v25 = vpop.f32.mrb[35].mxu1 }
 0x574   : > { %v3523_v24 = vadd.f32 %v5560_v18, %v9275_v51  ;;  %v5624_v54 = vadd.f32 %v5623_v27, %v5622_v29  ;;  %v5625_v49 = vpop.f32.mrb[66].mxu0  ;;  %v5563_v63 = vadd.f32 %v5562_v25, %v5561_v57 }
 0x575   : > { %v5626_v23 = vpop.f32.mrb[67].mxu0 }
 0x576   : > { %v3620_v4 = vadd.f32 %v5624_v54, %v3523_v24  ;;  %v3526_v33 = vadd.f32 %v5563_v63, %v9275_v51  ;;  %v5627_v3 = vadd.f32 %v5626_v23, %v5625_v49 }
 0x578   : > { %v3623_v44 = vadd.f32 %v5627_v3, %v3526_v33  ;;  %v9280_v47 = vadd.f32 %v3620_v4, %v10373_v0 }
 0x57a   : > { %v3699_v34 = vmul.f32 %v9280_v47, %v9280_v47  ;;  %v9285_v45 = vadd.f32 %v3623_v44, %v10374_v5 }
 0x57c   : > { %3715 = vadd.xlane.f32.xlu0 %v3699_v34  ;;  %v3700_v58 = vmul.f32 %v9285_v45, %v9285_v45 }
 0x57e   : > { %3717 = vadd.xlane.f32.xlu1 %v3700_v58  ;;  %v5564_v56 = vpop.f32.mrb[36].mxu1  ;;  %v6012_v58 = vld [vmem:[%s7311_s11 + $0x60] ss:$8 sps:$4 sm:$0xff]  }
 0x57f   : > { %v5565_v9 = vpop.f32.mrb[37].mxu1 }
 0x580   : > { %v5628_v38 = vpop.f32.mrb[68].mxu0  ;;  %v5566_v52 = vadd.f32 %v5565_v9, %v5564_v56  ;;  %v5567_v35 = vpop.f32.mrb[38].mxu1  ;;  %v6014_v56 = vld [vmem:[%s7311_s11 + $0x64] ss:$8 sps:$4 sm:$0xff]  }
 0x581   : > { %v5629_v7 = vpop.f32.mrb[69].mxu0  ;;  %v5568_v12 = vpop.f32.mrb[39].mxu1  ;;  %3950 = vmatprep.subr.bf16.mxu1 %v6014_v56 }
 0x582   : > { %v3531_v30 = vadd.f32 %v5566_v52, %v9275_v51  ;;  %v5630_v36 = vadd.f32 %v5629_v7, %v5628_v38  ;;  %v5631_v22 = vpop.f32.mrb[70].mxu0  ;;  %v5569_v59 = vadd.f32 %v5568_v12, %v5567_v35  ;;  %v10379_v38 = vld [vmem:[#allocation39_spill] sm:$0xff]  ;;  %3951 = vmatpush1.bf16.msra.mxu1 %v6012_v58  ;;  %v10380_v7 = vld [vmem:[#allocation38_spill] sm:$0xff] }
 0x583   : > { %v5632_v43 = vpop.f32.mrb[71].mxu0 }
 0x584   : > { %v3628_v42 = vadd.f32 %v5630_v36, %v3531_v30  ;;  %v3534_v53 = vadd.f32 %v5569_v59, %v9275_v51  ;;  %v5633_v37 = vadd.f32 %v5632_v43, %v5631_v22 }
 0x586   : > { %v3631_v14 = vadd.f32 %v5633_v37, %v3534_v53  ;;  %v9292_v8 = vadd.f32 %v3628_v42, %v10375_v39 }
 0x588   : > { %v3701_v17 = vmul.f32 %v9292_v8, %v9292_v8  ;;  %v9297_v41 = vadd.f32 %v3631_v14, %v10376_v6 }
 0x58a   : > { %3719 = vadd.xlane.f32.xlu0 %v3701_v17  ;;  %v3702_v11 = vmul.f32 %v9297_v41, %v9297_v41 }
 0x58b   : > { %v5570_v50 = vpop.f32.mrb[40].mxu1 }
 0x58c   : > { %v5571_v20 = vpop.f32.mrb[41].mxu1  ;;  %3721 = vadd.xlane.f32.xlu1 %v3702_v11 }
 0x58d   : > { %v5634_v60 = vpop.f32.mrb[72].mxu0  ;;  %v5572_v31 = vadd.f32 %v5571_v20, %v5570_v50  ;;  %v5573_v21 = vpop.f32.mrb[42].mxu1  ;;  %v6015_v20 = vld [vmem:[%s7311_s11 + $0x70] ss:$8 sps:$4 sm:$0xff]  }
 0x58e   : > { %v5635_v26 = vpop.f32.mrb[73].mxu0  ;;  %v5574_v1 = vpop.f32.mrb[43].mxu1 }
 0x58f   : > { %v3539_v28 = vadd.f32 %v5572_v31, %v9275_v51  ;;  %v5636_v2 = vadd.f32 %v5635_v26, %v5634_v60  ;;  %v5637_v32 = vpop.f32.mrb[74].mxu0  ;;  %v5575_v10 = vadd.f32 %v5574_v1, %v5573_v21  ;;  %v6017_v60 = vld [vmem:[%s7311_s11 + $0x74] ss:$8 sps:$4 sm:$0xff]  }
 0x590   : > { %v5638_v15 = vpop.f32.mrb[75].mxu0  ;;  %3952 = vmatprep.subr.bf16.mxu1 %v6017_v60 }
 0x591   : > { %v3636_v48 = vadd.f32 %v5636_v2, %v3539_v28  ;;  %v3542_v62 = vadd.f32 %v5575_v10, %v9275_v51  ;;  %v5639_v40 = vadd.f32 %v5638_v15, %v5637_v32  ;;  %3953 = vmatpush1.bf16.msra.mxu1 %v6015_v20  ;;  %v10381_v2 = vld [vmem:[#allocation40_spill] sm:$0xff] }
 0x593   : > { %v3639_v61 = vadd.f32 %v5639_v40, %v3542_v62  ;;  %v9304_v55 = vadd.f32 %v3636_v48, %v10377_v16 }
 0x595   : > { %v3703_v46 = vmul.f32 %v9304_v55, %v9304_v55  ;;  %v9309_v29 = vadd.f32 %v3639_v61, %v10378_v19 }
 0x597   : > { %3723 = vadd.xlane.f32.xlu0 %v3703_v46  ;;  %v3704_v18 = vmul.f32 %v9309_v29, %v9309_v29  ;;  %v5576_v57 = vpop.f32.mrb[44].mxu1  ;;  %v10382_v46 = vld [vmem:[#allocation41_spill] sm:$0xff] }
 0x598   : > { %v5577_v27 = vpop.f32.mrb[45].mxu1 }
 0x599   : > { %3725 = vadd.xlane.f32.xlu1 %v3704_v18  ;;  %v5578_v24 = vadd.f32 %v5577_v27, %v5576_v57  ;;  %v5579_v54 = vpop.f32.mrb[46].mxu1 }
 0x59a   : > { %v5640_v25 = vpop.f32.mrb[76].mxu0  ;;  %v5580_v63 = vpop.f32.mrb[47].mxu1 }
 0x59b   : > { %v5641_v49 = vpop.f32.mrb[77].mxu0  ;;  %v3547_v23 = vadd.f32 %v5578_v24, %v9275_v51  ;;  %v5581_v3 = vadd.f32 %v5580_v63, %v5579_v54 }
 0x59c   : > { %v5642_v4 = vadd.f32 %v5641_v49, %v5640_v25  ;;  %v5643_v33 = vpop.f32.mrb[78].mxu0 }
 0x59d   : > { %v5644_v44 = vpop.f32.mrb[79].mxu0  ;;  %v3550_v34 = vadd.f32 %v5581_v3, %v9275_v51  ;;  %v10383_v3 = vld [vmem:[#allocation42_spill] sm:$0xff] }
 0x59e   : > { %v3644_v0 = vadd.f32 %v5642_v4, %v3547_v23  ;;  %v5645_v5 = vadd.f32 %v5644_v44, %v5643_v33 }
 0x5a0   : > { %v3647_v9 = vadd.f32 %v5645_v5, %v3550_v34  ;;  %v9318_v52 = vadd.f32 %v3644_v0, %v10379_v38 }
 0x5a2   : > { %v3705_v35 = vmul.f32 %v9318_v52, %v9318_v52  ;;  %v9323_v12 = vadd.f32 %v3647_v9, %v10380_v7 }
 0x5a4   : > { %3727 = vadd.xlane.f32.xlu0 %v3705_v35  ;;  %v3706_v30 = vmul.f32 %v9323_v12, %v9323_v12  ;;  %v5582_v36 = vpop.f32.mrb[48].mxu1  ;;  %v10384_v35 = vld [vmem:[#allocation43_spill] sm:$0xff] }
 0x5a5   : > { %v5646_v22 = vpop.f32.mrb[80].mxu0  ;;  %v5583_v59 = vpop.f32.mrb[49].mxu1 }
 0x5a6   : > { %v5647_v43 = vpop.f32.mrb[81].mxu0  ;;  %3729 = vadd.xlane.f32.xlu1 %v3706_v30  ;;  %v5584_v42 = vadd.f32 %v5583_v59, %v5582_v36  ;;  %v5585_v37 = vpop.f32.mrb[50].mxu1 }
 0x5a7   : > { %v5648_v53 = vadd.f32 %v5647_v43, %v5646_v22  ;;  %v5649_v14 = vpop.f32.mrb[82].mxu0  ;;  %v5586_v39 = vpop.f32.mrb[51].mxu1 }
 0x5a8   : > { %v5650_v17 = vpop.f32.mrb[83].mxu0  ;;  %v3555_v6 = vadd.f32 %v5584_v42, %v9275_v51  ;;  %v5587_v11 = vadd.f32 %v5586_v39, %v5585_v37 }
 0x5a9   : > { %v5651_v50 = vadd.f32 %v5650_v17, %v5649_v14 }
 0x5aa   : > { %v3652_v31 = vadd.f32 %v5648_v53, %v3555_v6  ;;  %v3558_v21 = vadd.f32 %v5587_v11, %v9275_v51  ;;  %v10385_v6 = vld [vmem:[#allocation44_spill] sm:$0xff] }
 0x5ac   : > { %v3655_v26 = vadd.f32 %v5651_v50, %v3558_v21  ;;  %v5588_v1 = vpop.f32.mrb[52].mxu1  ;;  %v9332_v32 = vadd.f32 %v3652_v31, %v10381_v2 }
 0x5ad   : > { %v5652_v28 = vpop.f32.mrb[84].mxu0  ;;  %v5589_v10 = vpop.f32.mrb[53].mxu1 }
 0x5ae   : > { %v5653_v15 = vpop.f32.mrb[85].mxu0  ;;  %v5590_v48 = vadd.f32 %v5589_v10, %v5588_v1  ;;  %v5591_v40 = vpop.f32.mrb[54].mxu1  ;;  %v3707_v16 = vmul.f32 %v9332_v32, %v9332_v32  ;;  %v9337_v19 = vadd.f32 %v3655_v26, %v10382_v46 }
 0x5af   : > { %v5654_v62 = vadd.f32 %v5653_v15, %v5652_v28  ;;  %v5655_v61 = vpop.f32.mrb[86].mxu0  ;;  %v5592_v18 = vpop.f32.mrb[55].mxu1  ;;  %v10386_v28 = vld [vmem:[#allocation45_spill] sm:$0xff] }
 0x5b0   : > { %v5656_v57 = vpop.f32.mrb[87].mxu0  ;;  %v3563_v27 = vadd.f32 %v5590_v48, %v9275_v51  ;;  %v5593_v25 = vadd.f32 %v5592_v18, %v5591_v40  ;;  %3731 = vadd.xlane.f32.xlu0 %v3707_v16  ;;  %v3708_v54 = vmul.f32 %v9337_v19, %v9337_v19 }
 0x5b1   : > { %v5657_v24 = vadd.f32 %v5656_v57, %v5655_v61  ;;  %v10387_v57 = vld [vmem:[#allocation46_spill] sm:$0xff] }
 0x5b2   : > { %v3660_v49 = vadd.f32 %v5654_v62, %v3563_v27  ;;  %v3566_v63 = vadd.f32 %v5593_v25, %v9275_v51  ;;  %3733 = vadd.xlane.f32.xlu1 %v3708_v54 }
 0x5b4   : > { %v3663_v23 = vadd.f32 %v5657_v24, %v3566_v63  ;;  %v5594_v4 = vpop.f32.mrb[56].mxu1  ;;  %v9344_v44 = vadd.f32 %v3660_v49, %v10383_v3  ;;  %v10388_v24 = vld [vmem:[#allocation47_spill] sm:$0xff]  ;;  %v4052_v63 = vld [vmem:[%s7345_s22 + $0x8] sm:$0xff]  ;;  %v4062_v3 = vld [vmem:[%s7345_s22 + $0x58] sm:$0xff] }
 0x5b5   : > { %v5658_v33 = vpop.f32.mrb[88].mxu0  ;;  %v5595_v0 = vpop.f32.mrb[57].mxu1 }
 0x5b6   : > { %v5659_v34 = vpop.f32.mrb[89].mxu0  ;;  %v5596_v5 = vadd.f32 %v5595_v0, %v5594_v4  ;;  %v5597_v56 = vpop.f32.mrb[58].mxu1  ;;  %v3709_v38 = vmul.f32 %v9344_v44, %v9344_v44  ;;  %v9349_v7 = vadd.f32 %v3663_v23, %v10384_v35  ;;  %v4053_v23 = vld [vmem:[%s7345_s22 + $0x10] sm:$0xff]  ;;  %v4060_v4 = vld [vmem:[%s7345_s22 + $0x48] sm:$0xff]  ;;  %v4055_v0 = vld [vmem:[%s7345_s22 + $0x20] sm:$0xff] }
 0x5b7   : > { %v5660_v58 = vadd.f32 %v5659_v34, %v5658_v33  ;;  %v5661_v9 = vpop.f32.mrb[90].mxu0  ;;  %v5598_v30 = vpop.f32.mrb[59].mxu1  ;;  %v4054_v33 = vld [vmem:[%s7345_s22 + $0x18] sm:$0xff]  ;;  %v4064_v34 = vld [vmem:[%s7345_s22 + $0x68] sm:$0xff] }
 0x5b8   : > { %v5662_v36 = vpop.f32.mrb[91].mxu0  ;;  %v3571_v22 = vadd.f32 %v5596_v5, %v9275_v51  ;;  %v5599_v59 = vadd.f32 %v5598_v30, %v5597_v56  ;;  %3735 = vadd.xlane.f32.xlu0 %v3709_v38  ;;  %v3710_v42 = vmul.f32 %v9349_v7, %v9349_v7  ;;  %v4056_v5 = vld [vmem:[%s7345_s22 + $0x28] sm:$0xff]  ;;  %v4058_v56 = vld [vmem:[%s7345_s22 + $0x38] sm:$0xff]  ;;  %v4059_v38 = vld [vmem:[%s7345_s22 + $0x40] sm:$0xff] }
 0x5b9   : > { %v5663_v43 = vadd.f32 %v5662_v36, %v5661_v9 }
 0x5ba   : > { %v3668_v53 = vadd.f32 %v5660_v58, %v3571_v22  ;;  %v3574_v37 = vadd.f32 %v5599_v59, %v9275_v51  ;;  %3737 = vadd.xlane.f32.xlu1 %v3710_v42  ;;  %v4057_v58 = vld [vmem:[%s7345_s22 + $0x30] sm:$0xff]  ;;  %v4063_v59 = vld [vmem:[%s7345_s22 + $0x60] sm:$0xff] }
 0x5bb   : > { %v4061_v22 = vld [vmem:[%s7345_s22 + $0x50] sm:$0xff] }
 0x5bc   : > { %v3671_v14 = vadd.f32 %v5663_v43, %v3574_v37  ;;  %v5600_v39 = vpop.f32.mrb[60].mxu1  ;;  %v9356_v11 = vadd.f32 %v3668_v53, %v10385_v6  ;;  %v3698_v43 = vld [vmem:[%s711_s23] sm:$0x1] }
 0x5bd   : > { %v5664_v17 = vpop.f32.mrb[92].mxu0  ;;  %v5601_v50 = vpop.f32.mrb[61].mxu1  ;;  %v3811_v42 = vadd.f32 1.0, %v3698_v43 }
 0x5be   : > { %v5665_v20 = vpop.f32.mrb[93].mxu0  ;;  %v5602_v60 = vadd.f32 %v5601_v50, %v5600_v39  ;;  %v5603_v21 = vpop.f32.mrb[62].mxu1  ;;  %v3711_v1 = vmul.f32 %v9356_v11, %v9356_v11  ;;  %v9361_v2 = vadd.f32 %v3671_v14, %v10386_v28 }
 0x5bf   : > { %v5666_v31 = vadd.f32 %v5665_v20, %v5664_v17  ;;  %v5667_v26 = vpop.f32.mrb[94].mxu0  ;;  %v5604_v10 = vpop.f32.mrb[63].mxu1  ;;  %v10390_v17 = vld [vmem:[#allocation35_spill] sm:$0xff] }
 0x5c0   : > { %v5668_v15 = vpop.f32.mrb[95].mxu0  ;;  %v3579_v48 = vadd.f32 %v5602_v60, %v9275_v51  ;;  %v5605_v62 = vadd.f32 %v5604_v10, %v5603_v21  ;;  %3739 = vadd.xlane.f32.xlu0 %v3711_v1  ;;  %v3712_v61 = vmul.f32 %v9361_v2, %v9361_v2  ;;  %v9397_v6 = vrot.slane %v3811_v42, %v10390_v17 }
 0x5c1   : > { %v5669_v40 = vadd.f32 %v5668_v15, %v5667_v26 }
 0x5c2   : > { %v3676_v16 = vadd.f32 %v5666_v31, %v3579_v48  ;;  %v3582_v46 = vadd.f32 %v5605_v62, %v9275_v51  ;;  %3741 = vadd.xlane.f32.xlu1 %v3712_v61  ;;  %v4051_v51 = vld [vmem:[%s7345_s22] sm:$0xff] }
 0x5c4   : > { %v3679_v18 = vadd.f32 %v5669_v40, %v3582_v46  ;;  %v9368_v27 = vadd.f32 %v3676_v16, %v10387_v57 }
 0x5c6   : > { %v3713_v25 = vmul.f32 %v9368_v27, %v9368_v27  ;;  %v9373_v54 = vadd.f32 %v3679_v18, %v10388_v24 }
 0x5c8   : > { %3743 = vadd.xlane.f32.xlu0 %v3713_v25  ;;  %v3714_v49 = vmul.f32 %v9373_v54, %v9373_v54 }
 0x5ca   : > { %3745 = vadd.xlane.f32.xlu1 %v3714_v49 }
 0x5db   : > { %4074 = vperm.xlu1 %5889, %v4052_v63  }
 0x5de   : > { %4071 = vperm.xlu0 %5888, %v4051_v51  }
 0x5df   : > { %4077 = vperm.xlu1 %5889, %v4053_v23  }
 0x5e2   : > { %4098 = vperm.xlu0 %5888, %v4060_v4  }
 0x5e3   : > { %4080 = vperm.xlu1 %5889, %v4054_v33  }
 0x5e6   : > { %4104 = vperm.xlu0 %5888, %v4062_v3  }
 0x5e7   : > { %4083 = vperm.xlu1 %5889, %v4055_v0  }
 0x5ea   : > { %4110 = vperm.xlu0 %5888, %v4064_v34  }
 0x5eb   : > { %4086 = vperm.xlu1 %5889, %v4056_v5  }
 0x5ef   : > { %4089 = vperm.xlu1 %5889, %v4057_v58  }
 0x5f3   : > { %4092 = vperm.xlu1 %5889, %v4058_v56  }
 0x5f7   : > { %4095 = vperm.xlu1 %5889, %v4059_v38  }
 0x5fb   : > { %4101 = vperm.xlu1 %5889, %v4061_v22  }
 0x5ff   : > { %4107 = vperm.xlu1 %5889, %v4063_v59  }
 0x609   : > { %v3716_v9 = vpop.xlane.xlu0 %3715 }
 0x60a   : > { %v3747_v35 = vmax.f32 %v3716_v9, 1e-24 }
 0x60b   : > { %v3718_v30 = vpop.xlane.xlu1 %3717 }
 0x60c   : > { %6434 = vrsqrt.f32 %v3747_v35  ;;  %v3748_v36 = vmax.f32 %v3718_v30, 1e-24 }
 0x60e   : > { %6436 = vrsqrt.f32 %v3748_v36 }
 0x616   : > { %v6435_v53 = vpop.eup %6434 }
 0x617   : > { %v3779_v37 = vmul.f32 11.313708, %v6435_v53  ;;  %v3720_v39 = vpop.xlane.xlu0 %3719 }
 0x618   : > { %v6437_v14 = vpop.eup %6436  ;;  %v3749_v60 = vmax.f32 %v3720_v39, 1e-24 }
 0x619   : > { %v3795_v50 = vmul.f32 %v3779_v37, %v9280_v47  ;;  %v3780_v20 = vmul.f32 11.313708, %v6437_v14  ;;  %v3722_v31 = vpop.xlane.xlu1 %3721 }
 0x61a   : > { %6438 = vrsqrt.f32 %v3749_v60  ;;  %v3750_v26 = vmax.f32 %v3722_v31, 1e-24 }
 0x61b   : > { %v3796_v21 = vmul.f32 %v3780_v20, %v9285_v45  ;;  %v3818_v1 = vmul.f32 %v9397_v6, %v3795_v50 }
 0x61c   : > { %6440 = vrsqrt.f32 %v3750_v26 }
 0x61d   : > { %v3819_v28 = vmul.f32 %v9397_v6, %v3796_v21 }
 0x61f   : > { %v3834_v10 = vpack.c.bf16 %v3819_v28, %v3818_v1 }
 0x621   : > { %3971 = vmatmul.mubr.bf16.vlgmr.msra.gmra.mrb[64].mxu1 %v3834_v10 }
 0x622   : > { %3980 = vmatprep.mubr.bf16.mxu1 %v10371_v13 }
 0x624   : > { %v6439_v15 = vpop.eup %6438  ;;  %v3724_v48 = vpop.xlane.xlu0 %3723 }
 0x625   : > { %v3781_v62 = vmul.f32 11.313708, %v6439_v15  ;;  %v3751_v47 = vmax.f32 %v3724_v48, 1e-24 }
 0x626   : > { %v6441_v40 = vpop.eup %6440  ;;  %v3726_v61 = vpop.xlane.xlu1 %3725 }
 0x627   : > { %v3797_v16 = vmul.f32 %v3781_v62, %v9292_v8  ;;  %v3782_v45 = vmul.f32 11.313708, %v6441_v40  ;;  %6442 = vrsqrt.f32 %v3751_v47  ;;  %v3752_v46 = vmax.f32 %v3726_v61, 1e-24 }
 0x629   : > { %v3798_v18 = vmul.f32 %v3782_v45, %v9297_v41  ;;  %6444 = vrsqrt.f32 %v3752_v46  ;;  %v3820_v57 = vmul.f32 %v9397_v6, %v3797_v16 }
 0x62b   : > { %v3821_v25 = vmul.f32 %v9397_v6, %v3798_v18 }
 0x62d   : > { %v3835_v24 = vpack.c.bf16 %v3821_v25, %v3820_v57 }
 0x62f   : > { %3981 = vmatmul.mubr.bf16.gmra.mrb[68].mxu1 %v3835_v24 }
 0x630   : > { %3990 = vmatprep.mubr.bf16.mxu1 %v10371_v13 }
 0x631   : > { %v6443_v49 = vpop.eup %6442  ;;  %v3728_v51 = vpop.xlane.xlu0 %3727 }
 0x632   : > { %v3783_v63 = vmul.f32 11.313708, %v6443_v49  ;;  %v3753_v23 = vmax.f32 %v3728_v51, 1e-24 }
 0x633   : > { %v6445_v4 = vpop.eup %6444  ;;  %v3730_v8 = vpop.xlane.xlu1 %3729 }
 0x634   : > { %v3799_v33 = vmul.f32 %v3783_v63, %v9304_v55  ;;  %v3784_v3 = vmul.f32 11.313708, %v6445_v4  ;;  %6446 = vrsqrt.f32 %v3753_v23  ;;  %v3754_v41 = vmax.f32 %v3730_v8, 1e-24 }
 0x636   : > { %v3800_v0 = vmul.f32 %v3784_v3, %v9309_v29  ;;  %6448 = vrsqrt.f32 %v3754_v41  ;;  %v3822_v34 = vmul.f32 %v9397_v6, %v3799_v33 }
 0x638   : > { %v3823_v5 = vmul.f32 %v9397_v6, %v3800_v0 }
 0x63a   : > { %v3836_v58 = vpack.c.bf16 %v3823_v5, %v3822_v34 }
 0x63c   : > { %3991 = vmatmul.mubr.bf16.gmra.mrb[72].mxu1 %v3836_v58 }
 0x63d   : > { %4000 = vmatprep.mubr.bf16.mxu1 %v10371_v13  ;;  %v3732_v9 = vpop.xlane.xlu0 %3731 }
 0x63e   : > { %v6447_v56 = vpop.eup %6446  ;;  %v3755_v35 = vmax.f32 %v3732_v9, 1e-24  ;;  %v10391_v9 = vlaneseq }
 0x63f   : > { %v3785_v38 = vmul.f32 11.313708, %v6447_v56  ;;  %v3734_v55 = vpop.xlane.xlu1 %3733 }
 0x640   : > { %v6449_v30 = vpop.eup %6448  ;;  %6450 = vrsqrt.f32 %v3755_v35  ;;  %v3756_v29 = vmax.f32 %v3734_v55, 1e-24 }
 0x641   : > { %v3801_v36 = vmul.f32 %v3785_v38, %v9318_v52  ;;  %v3786_v22 = vmul.f32 11.313708, %v6449_v30  ;;  %v9439_v38 = vand.u32 127, %v10391_v9 }
 0x642   : > { %6452 = vrsqrt.f32 %v3756_v29 }
 0x643   : > { %v3802_v59 = vmul.f32 %v3786_v22, %v9323_v12  ;;  %v3824_v43 = vmul.f32 %v9397_v6, %v3801_v36  ;;  %10392 = vst [vmem:[#allocation49_spill] sm:$0xff] %v9439_v38  ;;  %v9442_v35 = vadd.s32 128, %v9439_v38 }
 0x645   : > { %v3825_v42 = vmul.f32 %v9397_v6, %v3802_v59  ;;  %v3736_v53 = vpop.xlane.xlu0 %3735  ;;  %10393 = vst [vmem:[#allocation48_spill] sm:$0xff] %v9442_v35 }
 0x646   : > { %v3757_v37 = vmax.f32 %v3736_v53, 1e-24 }
 0x647   : > { %v3837_v14 = vpack.c.bf16 %v3825_v42, %v3824_v43  ;;  %v3738_v39 = vpop.xlane.xlu1 %3737 }
 0x648   : > { %6454 = vrsqrt.f32 %v3757_v37  ;;  %v3758_v17 = vmax.f32 %v3738_v39, 1e-24 }
 0x649   : > { %4001 = vmatmul.mubr.bf16.gmra.mrb[76].mxu1 %v3837_v14 }
 0x64a   : > { %4010 = vmatprep.mubr.bf16.mxu1 %v10371_v13  ;;  %v6451_v52 = vpop.eup %6450  ;;  %6456 = vrsqrt.f32 %v3758_v17 }
 0x64b   : > { %v3787_v50 = vmul.f32 11.313708, %v6451_v52 }
 0x64c   : > { %v6453_v20 = vpop.eup %6452 }
 0x64d   : > { %v3803_v12 = vmul.f32 %v3787_v50, %v9332_v32  ;;  %v3788_v60 = vmul.f32 11.313708, %v6453_v20  ;;  %v3740_v31 = vpop.xlane.xlu0 %3739 }
 0x64e   : > { %v3759_v21 = vmax.f32 %v3740_v31, 1e-24 }
 0x64f   : > { %v3804_v26 = vmul.f32 %v3788_v60, %v9337_v19  ;;  %v3742_v1 = vpop.xlane.xlu1 %3741  ;;  %v3826_v10 = vmul.f32 %v9397_v6, %v3803_v12 }
 0x650   : > { %6458 = vrsqrt.f32 %v3759_v21  ;;  %v3760_v28 = vmax.f32 %v3742_v1, 1e-24 }
 0x651   : > { %v3827_v15 = vmul.f32 %v9397_v6, %v3804_v26 }
 0x652   : > { %v6455_v48 = vpop.eup %6454  ;;  %6460 = vrsqrt.f32 %v3760_v28 }
 0x653   : > { %v3789_v62 = vmul.f32 11.313708, %v6455_v48  ;;  %v3838_v47 = vpack.c.bf16 %v3827_v15, %v3826_v10 }
 0x654   : > { %v6457_v40 = vpop.eup %6456 }
 0x655   : > { %v3805_v61 = vmul.f32 %v3789_v62, %v9344_v44  ;;  %v3790_v32 = vmul.f32 11.313708, %v6457_v40  ;;  %4011 = vmatmul.mubr.bf16.gmra.mrb[80].mxu1 %v3838_v47  ;;  %v3744_v16 = vpop.xlane.xlu0 %3743 }
 0x656   : > { %v3761_v45 = vmax.f32 %v3744_v16, 1e-24  ;;  %4020 = vmatprep.mubr.bf16.mxu1 %v10371_v13 }
 0x657   : > { %v3806_v19 = vmul.f32 %v3790_v32, %v9349_v7  ;;  %v3746_v46 = vpop.xlane.xlu1 %3745  ;;  %v3828_v57 = vmul.f32 %v9397_v6, %v3805_v61 }
 0x658   : > { %6462 = vrsqrt.f32 %v3761_v45  ;;  %v3762_v18 = vmax.f32 %v3746_v46, 1e-24 }
 0x659   : > { %v3829_v25 = vmul.f32 %v9397_v6, %v3806_v19 }
 0x65a   : > { %v6459_v24 = vpop.eup %6458  ;;  %6464 = vrsqrt.f32 %v3762_v18 }
 0x65b   : > { %v3791_v49 = vmul.f32 11.313708, %v6459_v24  ;;  %v3839_v51 = vpack.c.bf16 %v3829_v25, %v3828_v57 }
 0x65c   : > { %v6461_v44 = vpop.eup %6460 }
 0x65d   : > { %v3807_v63 = vmul.f32 %v3791_v49, %v9356_v11  ;;  %v3792_v23 = vmul.f32 11.313708, %v6461_v44  ;;  %4021 = vmatmul.mubr.bf16.gmra.mrb[84].mxu1 %v3839_v51  ;;  %v4072_v30 = vpop.permute.xlu0 %4071 }
 0x65e   : > { %4030 = vmatprep.mubr.bf16.mxu1 %v10371_v13  ;;  %vm4118_vm10 = vcmp.eq.s32.totalorder %v9439_v38, %v4072_v30  ;;  %vm4119_vm13 = vcmp.eq.s32.totalorder %v9442_v35, %v4072_v30 }
 0x65f   : > { %v3808_v7 = vmul.f32 %v3792_v23, %v9361_v2  ;;  %v3830_v4 = vmul.f32 %v9397_v6, %v3807_v63 }
 0x661   : > { %v3831_v8 = vmul.f32 %v9397_v6, %v3808_v7 }
 0x662   : > { %v6463_v33 = vpop.eup %6462 }
 0x663   : > { %v3793_v3 = vmul.f32 11.313708, %v6463_v33  ;;  %v3840_v41 = vpack.c.bf16 %v3831_v8, %v3830_v4 }
 0x664   : > { %v6465_v0 = vpop.eup %6464 }
 0x665   : > { %v3809_v34 = vmul.f32 %v3793_v3, %v9368_v27  ;;  %v3794_v5 = vmul.f32 11.313708, %v6465_v0  ;;  %4031 = vmatmul.mubr.bf16.gmra.mrb[88].mxu1 %v3840_v41  ;;  %v4075_v27 = vpop.permute.xlu1 %4074 }
 0x666   : > { %4040 = vmatprep.mubr.bf16.mxu1 %v10371_v13  ;;  %vm4120_vm7 = vcmp.eq.s32.totalorder %v9439_v38, %v4075_v27  ;;  %vm4121_vm9 = vcmp.eq.s32.totalorder %v9442_v35, %v4075_v27 }
 0x667   : > { %v3810_v11 = vmul.f32 %v3794_v5, %v9373_v54  ;;  %v3832_v58 = vmul.f32 %v9397_v6, %v3809_v34 }
 0x669   : > { %v3833_v2 = vmul.f32 %v9397_v6, %v3810_v11  ;;  %v4078_v14 = vpop.permute.xlu1 %4077  ;;  %v4099_v11 = vpop.permute.xlu0 %4098 }
 0x66a   : > { %vm4122_vm14 = vcmp.eq.s32.totalorder %v9439_v38, %v4078_v14  ;;  %vm4123_vm4 = vcmp.eq.s32.totalorder %v9442_v35, %v4078_v14 }
 0x66b   : > { %v3841_v56 = vpack.c.bf16 %v3833_v2, %v3832_v58 }
 0x66d   : > { %4041 = vmatmul.mubr.bf16.gmra.mrb[92].mxu1 %v3841_v56  ;;  %v4081_v39 = vpop.permute.xlu1 %4080  ;;  %v4105_v14 = vpop.permute.xlu0 %4104 }
 0x66e   : > { %vm4124_vm11 = vcmp.eq.s32.totalorder %v9439_v38, %v4081_v39  ;;  %vm4125_vm15 = vcmp.eq.s32.totalorder %v9442_v35, %v4081_v39 }
 0x671   : > { %v4084_v1 = vpop.permute.xlu1 %4083 }
 0x672   : > { %vm4126_vm0 = vcmp.eq.s32.totalorder %v9439_v38, %v4084_v1  ;;  %vm4127_vm2 = vcmp.eq.s32.totalorder %v9442_v35, %v4084_v1 }
 0x675   : > { %v4087_v48 = vpop.permute.xlu1 %4086 }
 0x676   : > { %vm4128_vm8 = vcmp.eq.s32.totalorder %v9439_v38, %v4087_v48  ;;  %vm4129_vm12 = vcmp.eq.s32.totalorder %v9442_v35, %v4087_v48 }
 0x679   : > { %v4090_v18 = vpop.permute.xlu1 %4089 }
 0x67a   : > { %vm4130_vm5 = vcmp.eq.s32.totalorder %v9439_v38, %v4090_v18  ;;  %vm4131_vm1 = vcmp.eq.s32.totalorder %v9442_v35, %v4090_v18  ;;  %v4111_v18 = vpop.permute.xlu0 %4110 }
 0x67d   : > { %v4093_v49 = vpop.permute.xlu1 %4092 }
 0x67e   : > { %vm4132_vm6 = vcmp.eq.s32.totalorder %v9439_v38, %v4093_v49  ;;  %vm4133_vm3 = vcmp.eq.s32.totalorder %v9442_v35, %v4093_v49 }
 0x681   : > { %v4096_v5 = vpop.permute.xlu1 %4095 }
 0x6f4   : > { %v9446_v13 = vpop.f32.mrb[64].mxu1 }
 0x6f5   : > { %v9449_v54 = vpop.f32.mrb[65].mxu1  ;;  %v4150_v6 = vsel %vm4118_vm10, %v9446_v13, 0.0  ;;  %vm4134_vm10 = vcmp.eq.s32.totalorder %v9439_v38, %v4096_v5  ;;  %4514 = vst [vmem:[%s7358_s19] sm:$0xff] (!%p5445_p9), %v9446_v13 }
 0x6f6   : > { %v9453_v55 = vpop.f32.mrb[66].mxu1  ;;  %v4230_v36 = vmax.f32 %v9446_v13, %v9449_v54  ;;  %v4151_v22 = vsel %vm4119_vm13, %v9449_v54, 0.0  ;;  %vm4135_vm13 = vcmp.eq.s32.totalorder %v9442_v35, %v4096_v5  ;;  %4515 = vst [vmem:[%s7358_s19 + $0x8] sm:$0xff] (!%p5445_p9), %v9449_v54 }
 0x6f7   : > { %v9458_v29 = vpop.f32.mrb[67].mxu1  ;;  %v4152_v59 = vsel %vm4120_vm7, %v9453_v55, 0.0  ;;  %v9461_v43 = vadd.f32 %v4151_v22, %v4150_v6  ;;  %vm4136_vm7 = vcmp.eq.s32.totalorder %v9439_v38, %v4099_v11  ;;  %4516 = vst [vmem:[%s7358_s19 + $0x10] sm:$0xff] (!%p5445_p9), %v9453_v55 }
 0x6f8   : > { %4231 = vmax.xlane.f32.xlu0 %v4230_v36  ;;  %v4233_v42 = vmax.f32 %v9453_v55, %v9458_v29  ;;  %v4153_v53 = vsel %vm4121_vm9, %v9458_v29, 0.0  ;;  %vm4137_vm9 = vcmp.eq.s32.totalorder %v9442_v35, %v4099_v11  ;;  %v4102_v36 = vpop.permute.xlu1 %4101  ;;  %4517 = vst [vmem:[%s7358_s19 + $0x18] sm:$0xff] (!%p5445_p9), %v9458_v29 }
 0x6f9   : > { %v9466_v37 = vadd.f32 %v4153_v53, %v4152_v59 }
 0x6fa   : > { %4234 = vmax.xlane.f32.xlu1 %v4233_v42 }
 0x6fc   : > { %v4108_v48 = vpop.permute.xlu1 %4107 }
 0x702   : > { %v9470_v17 = vpop.f32.mrb[68].mxu1 }
 0x703   : > { %v9474_v52 = vpop.f32.mrb[69].mxu1  ;;  %v4154_v50 = vsel %vm4122_vm14, %v9470_v17, 0.0  ;;  %vm4138_vm14 = vcmp.eq.s32.totalorder %v9439_v38, %v4102_v36  ;;  %4518 = vst [vmem:[%s7358_s19 + $0x20] sm:$0xff] (!%p5445_p9), %v9470_v17 }
 0x704   : > { %v9477_v20 = vpop.f32.mrb[70].mxu1  ;;  %v4236_v12 = vmax.f32 %v9470_v17, %v9474_v52  ;;  %v4155_v60 = vsel %vm4123_vm4, %v9474_v52, 0.0  ;;  %vm4139_vm4 = vcmp.eq.s32.totalorder %v9442_v35, %v4102_v36  ;;  %4519 = vst [vmem:[%s7358_s19 + $0x28] sm:$0xff] (!%p5445_p9), %v9474_v52 }
 0x705   : > { %v9482_v31 = vpop.f32.mrb[71].mxu1  ;;  %v9484_v21 = vadd.f32 %v4155_v60, %v4154_v50  ;;  %v4156_v26 = vsel %vm4124_vm11, %v9477_v20, 0.0  ;;  %vm4140_vm11 = vcmp.eq.s32.totalorder %v9439_v38, %v4105_v14  ;;  %4520 = vst [vmem:[%s7358_s19 + $0x30] sm:$0xff] (!%p5445_p9), %v9477_v20 }
 0x706   : > { %4237 = vmax.xlane.f32.xlu0 %v4236_v12  ;;  %v4239_v28 = vmax.f32 %v9477_v20, %v9482_v31  ;;  %v4157_v10 = vsel %vm4125_vm15, %v9482_v31, 0.0  ;;  %vm4141_vm15 = vcmp.eq.s32.totalorder %v9442_v35, %v4105_v14  ;;  %4521 = vst [vmem:[%s7358_s19 + $0x38] sm:$0xff] (!%p5445_p9), %v9482_v31 }
 0x707   : > { %v9490_v15 = vadd.f32 %v4157_v10, %v4156_v26 }
 0x708   : > { %4240 = vmax.xlane.f32.xlu1 %v4239_v28 }
 0x70f   : > { %v9494_v62 = vpop.f32.mrb[72].mxu1 }
 0x710   : > { %v9498_v47 = vpop.f32.mrb[73].mxu1  ;;  %v4158_v40 = vsel %vm4126_vm0, %v9494_v62, 0.0  ;;  %vm4142_vm0 = vcmp.eq.s32.totalorder %v9439_v38, %v4108_v48  ;;  %4522 = vst [vmem:[%s7358_s19 + $0x40] sm:$0xff] (!%p5445_p9), %v9494_v62 }
 0x711   : > { %v9501_v61 = vpop.f32.mrb[74].mxu1  ;;  %v4242_v32 = vmax.f32 %v9494_v62, %v9498_v47  ;;  %v4159_v16 = vsel %vm4127_vm2, %v9498_v47, 0.0  ;;  %vm4143_vm2 = vcmp.eq.s32.totalorder %v9442_v35, %v4108_v48  ;;  %4523 = vst [vmem:[%s7358_s19 + $0x48] sm:$0xff] (!%p5445_p9), %v9498_v47 }
 0x712   : > { %v9506_v45 = vpop.f32.mrb[75].mxu1  ;;  %v9508_v19 = vadd.f32 %v4159_v16, %v4158_v40  ;;  %v4160_v46 = vsel %vm4128_vm8, %v9501_v61, 0.0  ;;  %vm4144_vm8 = vcmp.eq.s32.totalorder %v9439_v38, %v4111_v18  ;;  %4524 = vst [vmem:[%s7358_s19 + $0x50] sm:$0xff] (!%p5445_p9), %v9501_v61 }
 0x713   : > { %10394 = vst [vmem:[#allocation51_spill] sm:$0xff] %v9506_v45  ;;  %4243 = vmax.xlane.f32.xlu0 %v4242_v32  ;;  %v4245_v57 = vmax.f32 %v9501_v61, %v9506_v45  ;;  %v4161_v25 = vsel %vm4129_vm12, %v9506_v45, 0.0  ;;  %vm4145_vm12 = vcmp.eq.s32.totalorder %v9442_v35, %v4111_v18 }
 0x714   : > { %v9514_v24 = vadd.f32 %v4161_v25, %v4160_v46 }
 0x715   : > { %4246 = vmax.xlane.f32.xlu1 %v4245_v57 }
 0x71c   : > { %v9518_v51 = vpop.f32.mrb[76].mxu1 }
 0x71d   : > { %v9522_v44 = vpop.f32.mrb[77].mxu1  ;;  %v4162_v63 = vsel %vm4130_vm5, %v9518_v51, 0.0  ;;  %4526 = vst [vmem:[%s7358_s19 + $0x60] sm:$0xff] (!%p5445_p9), %v9518_v51 }
 0x71e   : > { %v9525_v23 = vpop.f32.mrb[78].mxu1  ;;  %v4248_v7 = vmax.f32 %v9518_v51, %v9522_v44  ;;  %v4163_v4 = vsel %vm4131_vm1, %v9522_v44, 0.0  ;;  %4527 = vst [vmem:[%s7358_s19 + $0x68] sm:$0xff] (!%p5445_p9), %v9522_v44 }
 0x71f   : > { %10395 = vst [vmem:[#allocation50_spill] sm:$0xff] %v9525_v23  ;;  %v9530_v8 = vpop.f32.mrb[79].mxu1  ;;  %v9532_v33 = vadd.f32 %v4163_v4, %v4162_v63  ;;  %v4164_v3 = vsel %vm4132_vm6, %v9525_v23, 0.0 }
 0x720   : > { %10396 = vst [vmem:[#allocation36_spill] sm:$0xff] %v9530_v8  ;;  %4249 = vmax.xlane.f32.xlu0 %v4248_v7  ;;  %v4251_v41 = vmax.f32 %v9525_v23, %v9530_v8  ;;  %v4165_v0 = vsel %vm4133_vm3, %v9530_v8, 0.0 }
 0x721   : > { %v9538_v34 = vadd.f32 %v4165_v0, %v4164_v3 }
 0x722   : > { %4252 = vmax.xlane.f32.xlu1 %v4251_v41 }
 0x728   : > { %v9542_v58 = vpop.f32.mrb[80].mxu1 }
 0x729   : > { %v9545_v2 = vpop.f32.mrb[81].mxu1  ;;  %v4166_v56 = vsel %vm4134_vm10, %v9542_v58, 0.0  ;;  %4530 = vst [vmem:[%s7358_s19 + $0x80] sm:$0xff] (!%p5445_p9), %v9542_v58 }
 0x72a   : > { %10397 = vst [vmem:[#allocation37_spill] sm:$0xff] %v9545_v2  ;;  %v9549_v9 = vpop.f32.mrb[82].mxu1  ;;  %v4254_v30 = vmax.f32 %v9542_v58, %v9545_v2  ;;  %v4167_v27 = vsel %vm4135_vm13, %v9545_v2, 0.0 }
 0x72b   : > { %v9554_v6 = vpop.f32.mrb[83].mxu1  ;;  %v9556_v22 = vadd.f32 %v4167_v27, %v4166_v56  ;;  %v4168_v59 = vsel %vm4136_vm7, %v9549_v9, 0.0  ;;  %4532 = vst [vmem:[%s7358_s19 + $0x90] sm:$0xff] (!%p5445_p9), %v9549_v9 }
 0x72c   : > { %10398 = vst [vmem:[#allocation52_spill] sm:$0xff] %v9554_v6  ;;  %4255 = vmax.xlane.f32.xlu0 %v4254_v30  ;;  %v4257_v42 = vmax.f32 %v9549_v9, %v9554_v6  ;;  %v4169_v53 = vsel %vm4137_vm9, %v9554_v6, 0.0 }
 0x72d   : > { %v9562_v39 = vadd.f32 %v4169_v53, %v4168_v59 }
 0x72e   : > { %4258 = vmax.xlane.f32.xlu1 %v4257_v42 }
 0x730   : > { %v9566_v50 = vpop.f32.mrb[84].mxu1 }
 0x731   : > { %v9569_v12 = vpop.f32.mrb[85].mxu1  ;;  %v4170_v60 = vsel %vm4138_vm14, %v9566_v50, 0.0  ;;  %4534 = vst [vmem:[%s7358_s19 + $0xa0] sm:$0xff] (!%p5445_p9), %v9566_v50 }
 0x732   : > { %v9573_v26 = vpop.f32.mrb[86].mxu1  ;;  %v4260_v1 = vmax.f32 %v9566_v50, %v9569_v12  ;;  %v4171_v28 = vsel %vm4139_vm4, %v9569_v12, 0.0  ;;  %4535 = vst [vmem:[%s7358_s19 + $0xa8] sm:$0xff] (!%p5445_p9), %v9569_v12 }
 0x733   : > { %v9578_v10 = vpop.f32.mrb[87].mxu1  ;;  %v9580_v40 = vadd.f32 %v4171_v28, %v4170_v60  ;;  %v4172_v32 = vsel %vm4140_vm11, %v9573_v26, 0.0  ;;  %v4065_v60 = vld [vmem:[%s7345_s22 + $0x70] sm:$0xff]  ;;  %4536 = vst [vmem:[%s7358_s19 + $0xb0] sm:$0xff] (!%p5445_p9), %v9573_v26 }
 0x734   : > { %10399 = vst [vmem:[#allocation54_spill] sm:$0xff] %v9578_v10  ;;  %4261 = vmax.xlane.f32.xlu0 %v4260_v1  ;;  %v4263_v16 = vmax.f32 %v9573_v26, %v9578_v10  ;;  %v4173_v46 = vsel %vm4141_vm15, %v9578_v10, 0.0  ;;  %v4066_v1 = vld [vmem:[%s7345_s22 + $0x78] sm:$0xff] }
 0x735   : > { %v9586_v57 = vadd.f32 %v4173_v46, %v4172_v32 }
 0x736   : > { %4264 = vmax.xlane.f32.xlu1 %v4263_v16 }
 0x738   : > { %v9590_v25 = vpop.f32.mrb[88].mxu1 }
 0x739   : > { %10400 = vst [vmem:[#allocation55_spill] sm:$0xff] %v9590_v25  ;;  %v9593_v49 = vpop.f32.mrb[89].mxu1  ;;  %v4174_v63 = vsel %vm4142_vm0, %v9590_v25, 0.0 }
 0x73a   : > { %10401 = vst [vmem:[#allocation53_spill] sm:$0xff] %v9593_v49  ;;  %v9597_v7 = vpop.f32.mrb[90].mxu1  ;;  %v4266_v4 = vmax.f32 %v9590_v25, %v9593_v49  ;;  %v4175_v3 = vsel %vm4143_vm2, %v9593_v49, 0.0 }
 0x73b   : > { %v4176_v41 = vsel %vm4144_vm8, %v9597_v7, 0.0  ;;  %v9603_v0 = vpop.f32.mrb[91].mxu1  ;;  %v9605_v5 = vadd.f32 %v4175_v3, %v4174_v63  ;;  %4540 = vst [vmem:[%s7358_s19 + $0xd0] sm:$0xff] (!%p5445_p9), %v9597_v7 }
 0x73c   : > { %v4177_v11 = vsel %vm4145_vm12, %v9603_v0, 0.0  ;;  %4267 = vmax.xlane.f32.xlu0 %v4266_v4  ;;  %v4269_v56 = vmax.f32 %v9597_v7, %v9603_v0  ;;  %4541 = vst [vmem:[%s7358_s19 + $0xd8] sm:$0xff] (!%p5445_p9), %v9603_v0 }
 0x73d   : > { %v9610_v30 = vadd.f32 %v4177_v11, %v4176_v41 }
 0x73e   : > { %4270 = vmax.xlane.f32.xlu1 %v4269_v56 }
 0x740   : > { %v9612_v27 = vpop.f32.mrb[92].mxu1 }
 0x741   : > { %v9614_v36 = vpop.f32.mrb[93].mxu1  ;;  %4542 = vst [vmem:[%s7358_s19 + $0xe0] sm:$0xff] (!%p5445_p9), %v9612_v27 }
 0x742   : > { %10402 = vst [vmem:[#allocation39_spill] sm:$0xff] %v9614_v36  ;;  %v9616_v59 = vpop.f32.mrb[94].mxu1  ;;  %v4272_v42 = vmax.f32 %v9612_v27, %v9614_v36 }
 0x743   : > { %10403 = vst [vmem:[#allocation38_spill] sm:$0xff] %v9616_v59  ;;  %v9620_v53 = vpop.f32.mrb[95].mxu1 }
 0x744   : > { %10404 = vst [vmem:[#allocation40_spill] sm:$0xff] %v9620_v53  ;;  %4273 = vmax.xlane.f32.xlu0 %v4272_v42  ;;  %v4275_v14 = vmax.f32 %v9616_v59, %v9620_v53 }
 0x746   : > { %4276 = vmax.xlane.f32.xlu1 %v4275_v14 }
 0x757   : > { %4113 = vperm.xlu1 %5889, %v4065_v60  }
 0x75a   : > { %4116 = vperm.xlu0 %5888, %v4066_v1  }
 0x779   : > { %4186 = vadd.xlane.f32.xlu0 %v9466_v37 }
 0x77b   : > { %4183 = vadd.xlane.f32.xlu1 %v9461_v43 }
 0x77d   : > { %4189 = vadd.xlane.f32.xlu0 %v9484_v21 }
 0x781   : > { %4192 = vadd.xlane.f32.xlu0 %v9490_v15 }
 0x785   : > { %v9630_v28 = vpop.xlane.xlu0 %4231  ;;  %4195 = vadd.xlane.f32.xlu0 %v9508_v19 }
 0x786   : > { %10405 = vst [vmem:[#allocation41_spill] sm:$0xff] %v9630_v28  ;;  %v4278_v48 = vsub.f32 %v9446_v13, %v9630_v28  ;;  %v4279_v32 = vsub.f32 %v9449_v54, %v9630_v28 }
 0x787   : > { %v9637_v16 = vpop.xlane.xlu1 %4234 }
 0x788   : > { %10406 = vst [vmem:[#allocation42_spill] sm:$0xff] %v9637_v16  ;;  %v4310_v46 = vmul.f32 1.442695, %v4278_v48  ;;  %v4312_v37 = vmul.f32 1.442695, %v4279_v32  ;;  %v4280_v43 = vsub.f32 %v9453_v55, %v9637_v16  ;;  %v4281_v21 = vsub.f32 %v9458_v29, %v9637_v16 }
 0x78a   : > { %6466 = vpow2.f32 %v4310_v46  ;;  %v4314_v15 = vmul.f32 1.442695, %v4280_v43  ;;  %v4316_v18 = vmul.f32 1.442695, %v4281_v21 }
 0x78b   : > { %6468 = vpow2.f32 %v4312_v37 }
 0x78c   : > { %6470 = vpow2.f32 %v4314_v15 }
 0x78d   : > { %6472 = vpow2.f32 %v4316_v18 }
 0x793   : > { %v9643_v4 = vpop.xlane.xlu0 %4237 }
 0x794   : > { %v6467_v63 = vpop.eup %6466  ;;  %v4282_v3 = vsub.f32 %v9470_v17, %v9643_v4  ;;  %v4283_v41 = vsub.f32 %v9474_v52, %v9643_v4 }
 0x795   : > { %v6469_v19 = vpop.eup %6468  ;;  %v9649_v56 = vpop.xlane.xlu1 %4240 }
 0x796   : > { %v6471_v11 = vpop.eup %6470  ;;  %v4374_v42 = vadd.f32 %v6469_v19, %v6467_v63  ;;  %v4318_v60 = vmul.f32 1.442695, %v4282_v3  ;;  %v4320_v1 = vmul.f32 1.442695, %v4283_v41  ;;  %v4284_v48 = vsub.f32 %v9477_v20, %v9649_v56 }
 0x797   : > { %v6473_v14 = vpop.eup %6472  ;;  %v4285_v32 = vsub.f32 %v9482_v31, %v9649_v56 }
 0x798   : > { %4375 = vadd.xlane.f32.xlu1 %v4374_v42  ;;  %v4377_v46 = vadd.f32 %v6473_v14, %v6471_v11  ;;  %6474 = vpow2.f32 %v4318_v60  ;;  %v4322_v37 = vmul.f32 1.442695, %v4284_v48 }
 0x799   : > { %v4324_v43 = vmul.f32 1.442695, %v4285_v32  ;;  %6476 = vpow2.f32 %v4320_v1 }
 0x79a   : > { %4378 = vadd.xlane.f32.xlu0 %v4377_v46  ;;  %6478 = vpow2.f32 %v4322_v37 }
 0x79b   : > { %6480 = vpow2.f32 %v4324_v43 }
 0x7a0   : > { %v9655_v21 = vpop.xlane.xlu0 %4243 }
 0x7a1   : > { %v4286_v15 = vsub.f32 %v9494_v62, %v9655_v21  ;;  %v4287_v18 = vsub.f32 %v9498_v47, %v9655_v21 }
 0x7a2   : > { %v6475_v63 = vpop.eup %6474  ;;  %v9661_v19 = vpop.xlane.xlu1 %4246 }
 0x7a3   : > { %v6477_v3 = vpop.eup %6476  ;;  %v4326_v41 = vmul.f32 1.442695, %v4286_v15  ;;  %v4328_v11 = vmul.f32 1.442695, %v4287_v18  ;;  %v4288_v42 = vsub.f32 %v9501_v61, %v9661_v19  ;;  %v4289_v14 = vsub.f32 %v9506_v45, %v9661_v19 }
 0x7a4   : > { %v6479_v60 = vpop.eup %6478  ;;  %v4380_v1 = vadd.f32 %v6477_v3, %v6475_v63 }
 0x7a5   : > { %v6481_v48 = vpop.eup %6480  ;;  %6482 = vpow2.f32 %v4326_v41  ;;  %v4330_v32 = vmul.f32 1.442695, %v4288_v42  ;;  %v4332_v46 = vmul.f32 1.442695, %v4289_v14 }
 0x7a6   : > { %6484 = vpow2.f32 %v4328_v11  ;;  %4381 = vadd.xlane.f32.xlu0 %v4380_v1  ;;  %v4383_v37 = vadd.f32 %v6481_v48, %v6479_v60 }
 0x7a7   : > { %6486 = vpow2.f32 %v4330_v32 }
 0x7a8   : > { %6488 = vpow2.f32 %v4332_v46  ;;  %4384 = vadd.xlane.f32.xlu1 %v4383_v37 }
 0x7ad   : > { %v9667_v43 = vpop.xlane.xlu0 %4249 }
 0x7ae   : > { %v4290_v15 = vsub.f32 %v9518_v51, %v9667_v43  ;;  %v4291_v18 = vsub.f32 %v9522_v44, %v9667_v43 }
 0x7af   : > { %v6483_v45 = vpop.eup %6482  ;;  %v9673_v63 = vpop.xlane.xlu1 %4252 }
 0x7b0   : > { %v6485_v3 = vpop.eup %6484  ;;  %v4334_v41 = vmul.f32 1.442695, %v4290_v15  ;;  %v4336_v42 = vmul.f32 1.442695, %v4291_v18  ;;  %v4292_v11 = vsub.f32 %v9525_v23, %v9673_v63  ;;  %v4293_v14 = vsub.f32 %v9530_v8, %v9673_v63 }
 0x7b1   : > { %v6487_v60 = vpop.eup %6486  ;;  %v4386_v1 = vadd.f32 %v6485_v3, %v6483_v45 }
 0x7b2   : > { %v6489_v48 = vpop.eup %6488  ;;  %6490 = vpow2.f32 %v4334_v41  ;;  %v4338_v32 = vmul.f32 1.442695, %v4292_v11  ;;  %v4340_v46 = vmul.f32 1.442695, %v4293_v14 }
 0x7b3   : > { %6492 = vpow2.f32 %v4336_v42  ;;  %4387 = vadd.xlane.f32.xlu0 %v4386_v1  ;;  %v4389_v37 = vadd.f32 %v6489_v48, %v6487_v60 }
 0x7b4   : > { %6494 = vpow2.f32 %v4338_v32 }
 0x7b5   : > { %6496 = vpow2.f32 %v4340_v46  ;;  %4390 = vadd.xlane.f32.xlu1 %v4389_v37 }
 0x7b9   : > { %v9679_v15 = vpop.xlane.xlu0 %4255 }
 0x7ba   : > { %v4294_v18 = vsub.f32 %v9542_v58, %v9679_v15  ;;  %v4295_v8 = vsub.f32 %v9545_v2, %v9679_v15 }
 0x7bb   : > { %v9685_v45 = vpop.xlane.xlu1 %4258 }
 0x7bc   : > { %v6491_v23 = vpop.eup %6490  ;;  %v4342_v41 = vmul.f32 1.442695, %v4294_v18  ;;  %v4344_v11 = vmul.f32 1.442695, %v4295_v8  ;;  %v4296_v42 = vsub.f32 %v9549_v9, %v9685_v45  ;;  %v4297_v14 = vsub.f32 %v9554_v6, %v9685_v45 }
 0x7bd   : > { %v6493_v3 = vpop.eup %6492 }
 0x7be   : > { %v6495_v60 = vpop.eup %6494  ;;  %v4392_v1 = vadd.f32 %v6493_v3, %v6491_v23  ;;  %6498 = vpow2.f32 %v4342_v41  ;;  %v4346_v32 = vmul.f32 1.442695, %v4296_v42  ;;  %v4348_v46 = vmul.f32 1.442695, %v4297_v14 }
 0x7bf   : > { %v6497_v48 = vpop.eup %6496  ;;  %6500 = vpow2.f32 %v4344_v11 }
 0x7c0   : > { %4393 = vadd.xlane.f32.xlu0 %v4392_v1  ;;  %v4395_v37 = vadd.f32 %v6497_v48, %v6495_v60  ;;  %6502 = vpow2.f32 %v4346_v32 }
 0x7c1   : > { %6504 = vpow2.f32 %v4348_v46  ;;  %v9691_v2 = vpop.xlane.xlu0 %4261 }
 0x7c2   : > { %4396 = vadd.xlane.f32.xlu1 %v4395_v37  ;;  %v4298_v8 = vsub.f32 %v9566_v50, %v9691_v2  ;;  %v4299_v18 = vsub.f32 %v9569_v12, %v9691_v2 }
 0x7c3   : > { %v9697_v6 = vpop.xlane.xlu1 %4264 }
 0x7c4   : > { %v4350_v23 = vmul.f32 1.442695, %v4298_v8  ;;  %v4352_v3 = vmul.f32 1.442695, %v4299_v18  ;;  %v4300_v41 = vsub.f32 %v9573_v26, %v9697_v6  ;;  %v4301_v11 = vsub.f32 %v9578_v10, %v9697_v6 }
 0x7c6   : > { %6506 = vpow2.f32 %v4350_v23  ;;  %v4354_v42 = vmul.f32 1.442695, %v4300_v41  ;;  %v4356_v14 = vmul.f32 1.442695, %v4301_v11 }
 0x7c7   : > { %6508 = vpow2.f32 %v4352_v3 }
 0x7c8   : > { %v6499_v60 = vpop.eup %6498  ;;  %6510 = vpow2.f32 %v4354_v42 }
 0x7c9   : > { %v6501_v1 = vpop.eup %6500  ;;  %6512 = vpow2.f32 %v4356_v14  ;;  %v9703_v48 = vpop.xlane.xlu0 %4267 }
 0x7ca   : > { %v6503_v32 = vpop.eup %6502  ;;  %v4302_v46 = vsub.f32 %v9590_v25, %v9703_v48  ;;  %v4303_v37 = vsub.f32 %v9593_v49, %v9703_v48  ;;  %v4398_v8 = vadd.f32 %v6501_v1, %v6499_v60 }
 0x7cb   : > { %v6505_v18 = vpop.eup %6504  ;;  %v9709_v10 = vpop.xlane.xlu1 %4270 }
 0x7cc   : > { %v4358_v23 = vmul.f32 1.442695, %v4302_v46  ;;  %v4360_v41 = vmul.f32 1.442695, %v4303_v37  ;;  %v4304_v3 = vsub.f32 %v9597_v7, %v9709_v10  ;;  %v4305_v11 = vsub.f32 %v9603_v0, %v9709_v10  ;;  %4399 = vadd.xlane.f32.xlu0 %v4398_v8 }
 0x7cd   : > { %v4401_v42 = vadd.f32 %v6505_v18, %v6503_v32 }
 0x7ce   : > { %6514 = vpow2.f32 %v4358_v23  ;;  %v4362_v14 = vmul.f32 1.442695, %v4304_v3  ;;  %v4364_v25 = vmul.f32 1.442695, %v4305_v11 }
 0x7cf   : > { %6516 = vpow2.f32 %v4360_v41  ;;  %4402 = vadd.xlane.f32.xlu1 %v4401_v42 }
 0x7d0   : > { %v6507_v49 = vpop.eup %6506  ;;  %6518 = vpow2.f32 %v4362_v14  ;;  %4198 = vadd.xlane.f32.xlu0 %v9514_v24 }
 0x7d1   : > { %v6509_v60 = vpop.eup %6508  ;;  %6520 = vpow2.f32 %v4364_v25  ;;  %v9716_v1 = vpop.xlane.xlu0 %4273 }
 0x7d2   : > { %v6511_v46 = vpop.eup %6510  ;;  %v4306_v37 = vsub.f32 %v9612_v27, %v9716_v1  ;;  %v4307_v32 = vsub.f32 %v9614_v36, %v9716_v1  ;;  %v4404_v8 = vadd.f32 %v6509_v60, %v6507_v49 }
 0x7d3   : > { %v6513_v18 = vpop.eup %6512  ;;  %v9722_v23 = vpop.xlane.xlu1 %4276 }
 0x7d4   : > { %v4366_v41 = vmul.f32 1.442695, %v4306_v37  ;;  %v4368_v3 = vmul.f32 1.442695, %v4307_v32  ;;  %v4308_v24 = vsub.f32 %v9616_v59, %v9722_v23  ;;  %v4309_v25 = vsub.f32 %v9620_v53, %v9722_v23  ;;  %4201 = vadd.xlane.f32.xlu0 %v9532_v33  ;;  %4405 = vadd.xlane.f32.xlu1 %v4404_v8 }
 0x7d5   : > { %v4407_v11 = vadd.f32 %v6513_v18, %v6511_v46 }
 0x7d6   : > { %6522 = vpow2.f32 %v4366_v41  ;;  %v4370_v42 = vmul.f32 1.442695, %v4308_v24  ;;  %v4372_v14 = vmul.f32 1.442695, %v4309_v25 }
 0x7d7   : > { %6524 = vpow2.f32 %v4368_v3  ;;  %v4114_v49 = vpop.permute.xlu1 %4113 }
 0x7d8   : > { %v6515_v60 = vpop.eup %6514  ;;  %6526 = vpow2.f32 %v4370_v42  ;;  %vm4146_vm5 = vcmp.eq.s32.totalorder %v9439_v38, %v4114_v49  ;;  %vm4147_vm1 = vcmp.eq.s32.totalorder %v9442_v35, %v4114_v49  ;;  %4204 = vadd.xlane.f32.xlu0 %v9538_v34  ;;  %4408 = vadd.xlane.f32.xlu1 %v4407_v11 }
 0x7d9   : > { %v6517_v37 = vpop.eup %6516  ;;  %6528 = vpow2.f32 %v4372_v14  ;;  %v4117_v32 = vpop.permute.xlu0 %4116  ;;  %v4178_v33 = vsel %vm4146_vm5, %v9612_v27, 0.0  ;;  %v4179_v46 = vsel %vm4147_vm1, %v9614_v36, 0.0 }
 0x7da   : > { %v6519_v8 = vpop.eup %6518  ;;  %vm4148_vm6 = vcmp.eq.s32.totalorder %v9439_v38, %v4117_v32  ;;  %vm4149_vm3 = vcmp.eq.s32.totalorder %v9442_v35, %v4117_v32  ;;  %v4410_v18 = vadd.f32 %v6517_v37, %v6515_v60  ;;  %v4224_v41 = vadd.f32 %v4179_v46, %v4178_v33 }
 0x7db   : > { %v6521_v3 = vpop.eup %6520  ;;  %v4180_v24 = vsel %vm4148_vm6, %v9616_v59, 0.0  ;;  %v4181_v34 = vsel %vm4149_vm3, %v9620_v53, 0.0 }
 0x7dc   : > { %v4227_v25 = vadd.f32 %v4181_v34, %v4180_v24  ;;  %4207 = vadd.xlane.f32.xlu0 %v9556_v22  ;;  %4411 = vadd.xlane.f32.xlu1 %v4410_v18  ;;  %v4413_v11 = vadd.f32 %v6521_v3, %v6519_v8 }
 0x7e0   : > { %v6523_v42 = vpop.eup %6522  ;;  %4213 = vadd.xlane.f32.xlu0 %v9580_v40  ;;  %4414 = vadd.xlane.f32.xlu1 %v4413_v11 }
 0x7e1   : > { %v6525_v14 = vpop.eup %6524 }
 0x7e2   : > { %v6527_v49 = vpop.eup %6526  ;;  %v4416_v38 = vadd.f32 %v6525_v14, %v6523_v42 }
 0x7e3   : > { %v6529_v32 = vpop.eup %6528 }
 0x7e4   : > { %4219 = vadd.xlane.f32.xlu0 %v9605_v5  ;;  %4417 = vadd.xlane.f32.xlu1 %v4416_v38  ;;  %v4419_v60 = vadd.f32 %v6529_v32, %v6527_v49 }
 0x7e8   : > { %4225 = vadd.xlane.f32.xlu0 %v4224_v41  ;;  %4420 = vadd.xlane.f32.xlu1 %v4419_v60 }
 0x7ec   : > { %4210 = vadd.xlane.f32.xlu1 %v9562_v39 }
 0x7f0   : > { %4216 = vadd.xlane.f32.xlu1 %v9586_v57 }
 0x7f4   : > { %4222 = vadd.xlane.f32.xlu1 %v9610_v30 }
 0x7f8   : > { %4228 = vadd.xlane.f32.xlu1 %v4227_v25 }
 0x806   : > { %v4187_v22 = vpop.xlane.xlu0 %4186 }
 0x808   : > { %v4184_v46 = vpop.xlane.xlu1 %4183 }
 0x80a   : > { %v4190_v40 = vpop.xlane.xlu0 %4189 }
 0x80e   : > { %v9744_v37 = vpop.xlane.xlu0 %4192 }
 0x812   : > { %v9746_v33 = vpop.xlane.xlu0 %4195 }
 0x825   : > { %v4376_v5 = vpop.xlane.xlu1 %4375 }
 0x827   : > { %v4379_v8 = vpop.xlane.xlu0 %4378 }
 0x828   : > { %6530 = vlog2.f32 %v4379_v8 }
 0x829   : > { %6532 = vlog2.f32 %v4376_v5 }
 0x832   : > { %v6531_v24 = vpop.eup %6530 }
 0x833   : > { %v4382_v38 = vpop.xlane.xlu0 %4381  ;;  %v6533_v34 = vpop.eup %6532  ;;  %v4425_v11 = vmul.f32 0.6931472, %v6531_v24 }
 0x834   : > { %6534 = vlog2.f32 %v4382_v38  ;;  %v4423_v14 = vmul.f32 0.6931472, %v6533_v34 }
 0x835   : > { %v4385_v18 = vpop.xlane.xlu1 %4384  ;;  %v4455_v8 = vadd.f32 %v4425_v11, %v9637_v16 }
 0x836   : > { %6536 = vlog2.f32 %v4385_v18  ;;  %v4454_v18 = vadd.f32 %v4423_v14, %v9630_v28 }
 0x837   : > { %v4471_v53 = vsub.f32 %v4455_v8, %v4187_v22 }
 0x83e   : > { %v6535_v25 = vpop.eup %6534 }
 0x83f   : > { %v4427_v49 = vmul.f32 0.6931472, %v6535_v25  ;;  %v4470_v25 = vsub.f32 %v4454_v18, %v4184_v46 }
 0x840   : > { %v4388_v41 = vpop.xlane.xlu0 %4387  ;;  %v6537_v60 = vpop.eup %6536 }
 0x841   : > { %6538 = vlog2.f32 %v4388_v41  ;;  %v4456_v41 = vadd.f32 %v4427_v49, %v9643_v4  ;;  %v4429_v35 = vmul.f32 0.6931472, %v6537_v60 }
 0x842   : > { %v4391_v39 = vpop.xlane.xlu1 %4390 }
 0x843   : > { %6540 = vlog2.f32 %v4391_v39  ;;  %v4472_v36 = vsub.f32 %v4456_v41, %v4190_v40 }
 0x84b   : > { %v6539_v38 = vpop.eup %6538 }
 0x84c   : > { %v4431_v39 = vmul.f32 0.6931472, %v6539_v38 }
 0x84d   : > { %v4394_v57 = vpop.xlane.xlu0 %4393  ;;  %v6541_v59 = vpop.eup %6540 }
 0x84e   : > { %6542 = vlog2.f32 %v4394_v57  ;;  %v4458_v11 = vadd.f32 %v4431_v39, %v9655_v21  ;;  %v4433_v28 = vmul.f32 0.6931472, %v6541_v59 }
 0x84f   : > { %v4397_v30 = vpop.xlane.xlu1 %4396 }
 0x850   : > { %6544 = vlog2.f32 %v4397_v30  ;;  %v4457_v30 = vadd.f32 %v4429_v35, %v9649_v56  ;;  %v4474_v46 = vsub.f32 %v4458_v11, %v9746_v33 }
 0x852   : > { %v4473_v60 = vsub.f32 %v4457_v30, %v9744_v37 }
 0x858   : > { %v6543_v34 = vpop.eup %6542 }
 0x859   : > { %v4400_v3 = vpop.xlane.xlu0 %4399  ;;  %v4435_v49 = vmul.f32 0.6931472, %v6543_v34 }
 0x85a   : > { %6546 = vlog2.f32 %v4400_v3  ;;  %v4486_v3 = vadd.f32 %v4471_v53, %v4470_v25  ;;  %v6545_v14 = vpop.eup %6544  ;;  %v4459_v53 = vadd.f32 %v4433_v28, %v9661_v19 }
 0x85c   : > { %v4403_v42 = vpop.xlane.xlu1 %4402  ;;  %v4487_v8 = vadd.f32 %v4486_v3, %v4472_v36 }
 0x85d   : > { %v4199_v32 = vpop.xlane.xlu0 %4198 }
 0x85e   : > { %v4488_v18 = vadd.f32 %v4487_v8, %v4473_v60  ;;  %v4475_v41 = vsub.f32 %v4459_v53, %v4199_v32 }
 0x861   : > { %v4406_v5 = vpop.xlane.xlu1 %4405  ;;  %v4202_v24 = vpop.xlane.xlu0 %4201 }
 0x862   : > { %6548 = vlog2.f32 %v4406_v5  ;;  %v4437_v5 = vmul.f32 0.6931472, %v6545_v14 }
 0x863   : > { %6550 = vlog2.f32 %v4403_v42  ;;  %v4460_v42 = vadd.f32 %v4435_v49, %v9667_v43 }
 0x864   : > { %v6547_v22 = vpop.eup %6546 }
 0x865   : > { %v4409_v57 = vpop.xlane.xlu1 %4408  ;;  %v4205_v38 = vpop.xlane.xlu0 %4204  ;;  %v4439_v35 = vmul.f32 0.6931472, %v6547_v22  ;;  %v4476_v36 = vsub.f32 %v4460_v42, %v4202_v24 }
 0x866   : > { %6552 = vlog2.f32 %v4409_v57  ;;  %v4489_v57 = vadd.f32 %v4488_v18, %v4474_v46 }
 0x867   : > { %v4462_v33 = vadd.f32 %v4439_v35, %v9679_v15 }
 0x868   : > { %v4490_v28 = vadd.f32 %v4489_v57, %v4475_v41 }
 0x869   : > { %v4412_v16 = vpop.xlane.xlu1 %4411  ;;  %v4208_v34 = vpop.xlane.xlu0 %4207 }
 0x86a   : > { %6554 = vlog2.f32 %v4412_v16  ;;  %v4461_v16 = vadd.f32 %v4437_v5, %v9673_v63  ;;  %v4491_v22 = vadd.f32 %v4490_v28, %v4476_v36  ;;  %v4478_v60 = vsub.f32 %v4462_v33, %v4208_v34 }
 0x86c   : > { %v6549_v59 = vpop.eup %6548  ;;  %v4477_v11 = vsub.f32 %v4461_v16, %v4205_v38 }
 0x86d   : > { %v4415_v40 = vpop.xlane.xlu1 %4414  ;;  %v6551_v39 = vpop.eup %6550  ;;  %v4443_v25 = vmul.f32 0.6931472, %v6549_v59 }
 0x86e   : > { %6556 = vlog2.f32 %v4415_v40  ;;  %v4441_v3 = vmul.f32 0.6931472, %v6551_v39  ;;  %v4214_v8 = vpop.xlane.xlu0 %4213  ;;  %v4492_v24 = vadd.f32 %v4491_v22, %v4477_v11 }
 0x86f   : > { %v4464_v32 = vadd.f32 %v4443_v25, %v9691_v2 }
 0x870   : > { %v6553_v30 = vpop.eup %6552  ;;  %v4463_v5 = vadd.f32 %v4441_v3, %v9685_v45  ;;  %v4493_v42 = vadd.f32 %v4492_v24, %v4478_v60 }
 0x871   : > { %v4418_v37 = vpop.xlane.xlu1 %4417  ;;  %v4445_v46 = vmul.f32 0.6931472, %v6553_v30  ;;  %v4480_v59 = vsub.f32 %v4464_v32, %v4214_v8 }
 0x872   : > { %6558 = vlog2.f32 %v4418_v37  ;;  %v4220_v36 = vpop.xlane.xlu0 %4219 }
 0x873   : > { %v4465_v34 = vadd.f32 %v4445_v46, %v9697_v6 }
 0x874   : > { %v6555_v14 = vpop.eup %6554 }
 0x875   : > { %v4421_v49 = vpop.xlane.xlu1 %4420  ;;  %v4447_v40 = vmul.f32 0.6931472, %v6555_v14 }
 0x876   : > { %6560 = vlog2.f32 %v4421_v49  ;;  %v4226_v8 = vpop.xlane.xlu0 %4225 }
 0x877   : > { %v4466_v39 = vadd.f32 %v4447_v40, %v9703_v48 }
 0x878   : > { %v6557_v35 = vpop.eup %6556 }
 0x879   : > { %v4211_v53 = vpop.xlane.xlu1 %4210  ;;  %v4449_v38 = vmul.f32 0.6931472, %v6557_v35  ;;  %v4482_v28 = vsub.f32 %v4466_v39, %v4220_v36  ;;  %v10407_v36 = vld [vmem:[#allocation51_spill] sm:$0xff] (!%p5445_p9) }
 0x87a   : > { %v4479_v18 = vsub.f32 %v4463_v5, %v4211_v53  ;;  %4525 = vst [vmem:[%s7358_s19 + $0x58] sm:$0xff] (!%p5445_p9), %v10407_v36 }
 0x87b   : > { %v4467_v14 = vadd.f32 %v4449_v38, %v9709_v10 }
 0x87c   : > { %v6559_v41 = vpop.eup %6558  ;;  %v4494_v57 = vadd.f32 %v4493_v42, %v4479_v18 }
 0x87d   : > { %v4451_v37 = vmul.f32 0.6931472, %v6559_v41  ;;  %v4217_v16 = vpop.xlane.xlu1 %4216 }
 0x87e   : > { %v4481_v33 = vsub.f32 %v4465_v34, %v4217_v16  ;;  %v4495_v25 = vadd.f32 %v4494_v57, %v4480_v59  ;;  %v4507_v57 = vld [vmem:[%s7360_s21] sm:$0xff] }
 0x87f   : > { %v4468_v3 = vadd.f32 %v4451_v37, %v9716_v1  ;;  %v10408_v16 = vld [vmem:[#allocation50_spill] sm:$0xff] (!%p5445_p9) }
 0x880   : > { %v6561_v30 = vpop.eup %6560  ;;  %v4496_v11 = vadd.f32 %v4495_v25, %v4481_v33  ;;  %4528 = vst [vmem:[%s7358_s19 + $0x70] sm:$0xff] (!%p5445_p9), %v10408_v16  ;;  %v10409_v33 = vld [vmem:[#allocation36_spill] sm:$0xff] (!%p5445_p9)  ;;  %v10410_v25 = vld [vmem:[#allocation37_spill] sm:$0xff] (!%p5445_p9) }
 0x881   : > { %v4453_v49 = vmul.f32 0.6931472, %v6561_v30  ;;  %v4223_v22 = vpop.xlane.xlu1 %4222  ;;  %v4484_v24 = vsub.f32 %v4468_v3, %v4226_v8  ;;  %4529 = vst [vmem:[%s7358_s19 + $0x78] sm:$0xff] (!%p5445_p9), %v10409_v33  ;;  %4531 = vst [vmem:[%s7358_s19 + $0x88] sm:$0xff] (!%p5445_p9), %v10410_v25  ;;  %v10411_v30 = vld [vmem:[#allocation52_spill] sm:$0xff] (!%p5445_p9)  ;;  %v10413_v3 = vld [vmem:[#allocation55_spill] sm:$0xff] (!%p5445_p9) }
 0x882   : > { %v4483_v60 = vsub.f32 %v4467_v14, %v4223_v22  ;;  %v4497_v32 = vadd.f32 %v4496_v11, %v4482_v28  ;;  %4533 = vst [vmem:[%s7358_s19 + $0x98] sm:$0xff] (!%p5445_p9), %v10411_v30  ;;  %v10412_v28 = vld [vmem:[#allocation54_spill] sm:$0xff] (!%p5445_p9)  ;;  %4538 = vst [vmem:[%s7358_s19 + $0xc0] sm:$0xff] (!%p5445_p9), %v10413_v3  ;;  %v10414_v11 = vld [vmem:[#allocation53_spill] sm:$0xff] (!%p5445_p9) }
 0x883   : > { %v4469_v46 = vadd.f32 %v4453_v49, %v9722_v23  ;;  %4537 = vst [vmem:[%s7358_s19 + $0xb8] sm:$0xff] (!%p5445_p9), %v10412_v28  ;;  %4539 = vst [vmem:[%s7358_s19 + $0xc8] sm:$0xff] (!%p5445_p9), %v10414_v11  ;;  %v10415_v14 = vld [vmem:[#allocation39_spill] sm:$0xff] (!%p5445_p9)  ;;  %v10416_v49 = vld [vmem:[#allocation38_spill] sm:$0xff] (!%p5445_p9) }
 0x884   : > { %v4498_v40 = vadd.f32 %v4497_v32, %v4483_v60  ;;  %4543 = vst [vmem:[%s7358_s19 + $0xe8] sm:$0xff] (!%p5445_p9), %v10415_v14  ;;  %4544 = vst [vmem:[%s7358_s19 + $0xf0] sm:$0xff] (!%p5445_p9), %v10416_v49  ;;  %v10417_v22 = vld [vmem:[#allocation40_spill] sm:$0xff] (!%p5445_p9) }
 0x885   : > { %v4229_v5 = vpop.xlane.xlu1 %4228  ;;  %4545 = vst [vmem:[%s7358_s19 + $0xf8] sm:$0xff] (!%p5445_p9), %v10417_v22 }
 0x886   : > { %v4485_v35 = vsub.f32 %v4469_v46, %v4229_v5  ;;  %v4499_v53 = vadd.f32 %v4498_v40, %v4484_v24 }
 0x888   : > { %v4500_v42 = vadd.f32 %v4499_v53, %v4485_v35 }
 0x88a   : > { %v4501_v18 = vrot.slane %v4500_v42, 4 }
 0x88c   : > { %v4502_v59 = vadd.f32 %v4501_v18, %v4500_v42 }
 0x88e   : > { %v4503_v41 = vrot.slane %v4502_v59, 2 }
 0x890   : > { %v4504_v39 = vadd.f32 %v4503_v41, %v4502_v59 }
 0x892   : > { %v4505_v38 = vrot.slane %v4504_v39, 1  ;;  %4513 = sbr.rel (%p5445_p9) target bundleno = 2201 (0x899), region = 92 }
 0x894   : > { %v4506_v34 = vadd.f32 %v4505_v38, %v4504_v39 }
 0x896   : > { %v4508_v37 = vadd.f32 %v4507_v57, %v4506_v34 }
 0x898   : > { %4509 = vst [vmem:[%s7360_s21] sm:$0xff] %v4508_v37 }
 0x899 PF: > { %p5446_p3 = scmp.ge.s32.totalorder %s6874_s27, 1 }
 0x89a   : > { %v10418_v60 = vld [vmem:[#allocation49_spill] sm:$0xff] (!%p5446_p3)  ;;  %v10419_v8 = vld [vmem:[#allocation48_spill] sm:$0xff] (!%p5446_p3)  ;;  %vm4568_vm10 = vcmp.ge.f32.partialorder (!%p5446_p3), %v9542_v58, %v9679_v15  ;;  %vm4570_vm14 = vcmp.ge.f32.partialorder (!%p5446_p3), %v9549_v9, %v9685_v45  ;;  %v6565_v41 = vld [vmem:[%s7356_s12 + $0x8] sm:$0xff] (!%p5446_p3)   ;;  %vm4558_vm0 = vcmp.ge.f32.partialorder (!%p5446_p3), %v9477_v20, %v9649_v56  ;;  %vm4559_vm2 = vcmp.ge.f32.partialorder (!%p5446_p3), %v9482_v31, %v9649_v56 }
 0x89b   : > { %4549 = sbr.rel (%p5446_p3) target bundleno = 2603 (0xa2b), region = 96  ;;  %v9835_v32 = vcvt.s32.f32 (!%p5446_p3), %v10418_v60  ;;  %v9838_v46 = vcvt.s32.f32 (!%p5446_p3), %v10419_v8  ;;  %v10420_v24 = vld [vmem:[#allocation37_spill] sm:$0xff] (!%p5446_p3)  ;;  %v10422_v35 = vld [vmem:[#allocation52_spill] sm:$0xff] (!%p5446_p3)  ;;  %v10423_v38 = vld [vmem:[#allocation42_spill] sm:$0xff] (!%p5446_p3)  ;;  %vm4556_vm8 = vcmp.ge.f32.partialorder (!%p5446_p3), %v9470_v17, %v9643_v4  ;;  %vm4557_vm12 = vcmp.ge.f32.partialorder (!%p5446_p3), %v9474_v52, %v9643_v4 }
 0x89c   : > { %vm4569_vm13 = vcmp.ge.f32.partialorder (!%p5446_p3), %v10420_v24, %v9679_v15  ;;  %v6562_v40 = vld [vmem:[%s7356_s12 + $0x40] sm:$0xff] (!%p5446_p3)   ;;  %vm4571_vm4 = vcmp.ge.f32.partialorder (!%p5446_p3), %v10422_v35, %v9685_v45  ;;  %v6564_v45 = vld [vmem:[%s7356_s12 + $0x48] sm:$0xff] (!%p5446_p3)   ;;  %vm4554_vm11 = vcmp.ge.f32.partialorder (!%p5446_p3), %v9453_v55, %v10423_v38  ;;  %vm4555_vm15 = vcmp.ge.f32.partialorder (!%p5446_p3), %v9458_v29, %v10423_v38  ;;  %v6566_v36 = vld [vmem:[%s7356_s12 + $0x50] sm:$0xff] (!%p5446_p3)  }
 0x89d   : > { %v10421_v5 = vld [vmem:[#allocation41_spill] sm:$0xff] (!%p5446_p3)  ;;  %v4600_v58 = vsel (!%p5446_p3), %vm4568_vm10, %v9835_v32, 256.0  ;;  %v4601_v15 = vsel (!%p5446_p3), %vm4569_vm13, %v9838_v46, 256.0  ;;  %5670 = vmatprep.subr.bf16.mxu0 (!%p5446_p3), %v6562_v40  ;;  %5734 = vmatprep.subr.bf16.mxu1 (!%p5446_p3), %v6562_v40  ;;  %v4602_v59 = vsel (!%p5446_p3), %vm4570_vm14, %v9835_v32, 256.0  ;;  %v4603_v9 = vsel (!%p5446_p3), %vm4571_vm4, %v9838_v46, 256.0  ;;  %v6567_v29 = vld [vmem:[%s7356_s12 + $0x10] sm:$0xff] (!%p5446_p3)  }
 0x89e   : > { %vm4552_vm7 = vcmp.ge.f32.partialorder (!%p5446_p3), %v9446_v13, %v10421_v5  ;;  %vm4553_vm9 = vcmp.ge.f32.partialorder (!%p5446_p3), %v9449_v54, %v10421_v5  ;;  %v6563_v53 = vld [vmem:[%s7356_s12] sm:$0xff] (!%p5446_p3)   ;;  %v4640_v54 = vmin.f32 (!%p5446_p3), %v4600_v58, %v4601_v15  ;;  %v4643_v39 = vmin.f32 (!%p5446_p3), %v4602_v59, %v4603_v9  ;;  %v10424_v33 = vld [vmem:[#allocation54_spill] sm:$0xff] (!%p5446_p3)  ;;  %v6568_v17 = vld [vmem:[%s7356_s12 + $0x58] sm:$0xff] (!%p5446_p3)  }
 0x89f   : > { %v4584_v42 = vsel (!%p5446_p3), %vm4552_vm7, %v9835_v32, 256.0  ;;  %v4585_v13 = vsel (!%p5446_p3), %vm4553_vm9, %v9838_v46, 256.0  ;;  %5671 = vmatpush3.bf16.msra.mxu0 (!%p5446_p3), %v6563_v53  ;;  %5742 = vmatpush3.bf16.msra.mxu1 (!%p5446_p3), %v6563_v53  ;;  %v4586_v57 = vsel (!%p5446_p3), %vm4554_vm11, %v9835_v32, 256.0  ;;  %v4587_v34 = vsel (!%p5446_p3), %vm4555_vm15, %v9838_v46, 256.0  ;;  %v6569_v30 = vld [vmem:[%s7356_s12 + $0x18] sm:$0xff] (!%p5446_p3)   ;;  %v10427_v3 = vld [vmem:[#allocation53_spill] sm:$0xff] (!%p5446_p3) }
 0x8a0   : > { %v4616_v18 = vmin.f32 (!%p5446_p3), %v4584_v42, %v4585_v13  ;;  %4641 = vmin.xlane.f32.xlu1 (!%p5446_p3), %v4640_v54  ;;  %v4590_v37 = vsel (!%p5446_p3), %vm4558_vm0, %v9835_v32, 256.0  ;;  %v4619_v55 = vmin.f32 (!%p5446_p3), %v4586_v57, %v4587_v34  ;;  %v4591_v16 = vsel (!%p5446_p3), %vm4559_vm2, %v9838_v46, 256.0  ;;  %5672 = vmatprep.subr.bf16.mxu0 (!%p5446_p3), %v6564_v45  ;;  %v6571_v11 = vld [vmem:[%s7356_s12 + $0x20] sm:$0xff] (!%p5446_p3)   ;;  %v6572_v14 = vld [vmem:[%s7356_s12 + $0x68] sm:$0xff] (!%p5446_p3)   ;;  %v10429_v8 = vld [vmem:[#allocation36_spill] sm:$0xff] (!%p5446_p3) }
 0x8a1   : > { %5735 = vmatprep.subr.bf16.mxu1 (!%p5446_p3), %v6564_v45  ;;  %v4588_v20 = vsel (!%p5446_p3), %vm4556_vm8, %v9835_v32, 256.0  ;;  %v4589_v31 = vsel (!%p5446_p3), %vm4557_vm12, %v9838_v46, 256.0  ;;  %vm4574_vm5 = vcmp.ge.f32.partialorder (!%p5446_p3), %v9573_v26, %v9697_v6  ;;  %v4625_v56 = vmin.f32 (!%p5446_p3), %v4590_v37, %v4591_v16  ;;  %v10428_v60 = vld [vmem:[#allocation50_spill] sm:$0xff] (!%p5446_p3)  ;;  %v6574_v40 = vld [vmem:[%s7356_s12 + $0x70] sm:$0xff] (!%p5446_p3)   ;;  %v10431_v58 = vld [vmem:[#allocation40_spill] sm:$0xff] (!%p5446_p3) }
 0x8a2   : > { %4617 = vmin.xlane.f32.xlu0 %v4616_v18  ;;  %vm4575_vm1 = vcmp.ge.f32.partialorder %v10424_v33, %v9697_v6  ;;  %vm4572_vm6 = vcmp.ge.f32.partialorder %v9566_v50, %v9691_v2  ;;  %v4622_v52 = vmin.f32 %v4588_v20, %v4589_v31  ;;  %v4606_v4 = vsel %vm4574_vm5, %v9835_v32, 256.0  ;;  %v10425_v50 = vld [vmem:[#allocation51_spill] sm:$0xff]  ;;  %v6573_v24 = vld [vmem:[%s7356_s12 + $0x28] sm:$0xff]   ;;  %v6576_v13 = vld [vmem:[%s7356_s12 + $0x78] sm:$0xff]  }
 0x8a3   : > { %5673 = vmatpush3.bf16.msra.mxu0 %v6565_v41  ;;  %5743 = vmatpush3.bf16.msra.mxu1 %v6565_v41  ;;  %v4607_v26 = vsel %vm4575_vm1, %v9838_v46, 256.0  ;;  %vm4573_vm3 = vcmp.ge.f32.partialorder %v9569_v12, %v9691_v2  ;;  %v4604_v6 = vsel %vm4572_vm6, %v9835_v32, 256.0  ;;  %vm4562_vm10 = vcmp.ge.f32.partialorder %v9501_v61, %v9661_v19  ;;  %v6570_v2 = vld [vmem:[%s7356_s12 + $0x60] sm:$0xff]   ;;  %v10432_v15 = vld [vmem:[#allocation39_spill] sm:$0xff] }
 0x8a4   : > { %5674 = vmatprep.subr.bf16.mxu0 %v6566_v36  ;;  %5736 = vmatprep.subr.bf16.mxu1 %v6566_v36  ;;  %v4605_v25 = vsel %vm4573_vm3, %v9838_v46, 256.0  ;;  %vm4563_vm13 = vcmp.ge.f32.partialorder %v10425_v50, %v9661_v19  ;;  %vm4560_vm7 = vcmp.ge.f32.partialorder %v9494_v62, %v9655_v21  ;;  %vm4561_vm9 = vcmp.ge.f32.partialorder %v9498_v47, %v9655_v21  ;;  %v10426_v21 = vld [vmem:[#allocation55_spill] sm:$0xff] }
 0x8a5   : > { %4644 = vmin.xlane.f32.xlu1 %v4643_v39  ;;  %v4649_v61 = vmin.f32 %v4606_v4, %v4607_v26  ;;  %v4646_v12 = vmin.f32 %v4604_v6, %v4605_v25  ;;  %v4594_v19 = vsel %vm4562_vm10, %v9835_v32, 256.0  ;;  %v4595_v28 = vsel %vm4563_vm13, %v9838_v46, 256.0  ;;  %v6575_v42 = vld [vmem:[%s7356_s12 + $0x30] sm:$0xff]  }
 0x8a6   : > { %4620 = vmin.xlane.f32.xlu0 %v4619_v55  ;;  %v4592_v62 = vsel %vm4560_vm7, %v9835_v32, 256.0  ;;  %v4593_v47 = vsel %vm4561_vm9, %v9838_v46, 256.0  ;;  %vm4578_vm14 = vcmp.ge.f32.partialorder %v9597_v7, %v9709_v10  ;;  %vm4579_vm4 = vcmp.ge.f32.partialorder %v9603_v0, %v9709_v10 }
 0x8a7   : > { %5675 = vmatpush3.bf16.msra.mxu0 %v6567_v29  ;;  %5744 = vmatpush3.bf16.msra.mxu1 %v6567_v29  ;;  %vm4576_vm11 = vcmp.ge.f32.partialorder %v10426_v21, %v9703_v48  ;;  %vm4577_vm15 = vcmp.ge.f32.partialorder %v10427_v3, %v9703_v48  ;;  %v4631_v7 = vmin.f32 %v4594_v19, %v4595_v28  ;;  %v4610_v10 = vsel %vm4578_vm14, %v9835_v32, 256.0 }
 0x8a8   : > { %5676 = vmatprep.subr.bf16.mxu0 %v6568_v17  ;;  %5737 = vmatprep.subr.bf16.mxu1 %v6568_v17  ;;  %v4628_v49 = vmin.f32 %v4592_v62, %v4593_v47  ;;  %v4611_v0 = vsel %vm4579_vm4, %v9838_v46, 256.0  ;;  %v4608_v22 = vsel %vm4576_vm11, %v9835_v32, 256.0  ;;  %v4609_v48 = vsel %vm4577_vm15, %v9838_v46, 256.0 }
 0x8a9   : > { %4626 = vmin.xlane.f32.xlu1 %v4625_v56  ;;  %vm4566_vm0 = vcmp.ge.f32.partialorder %v10428_v60, %v9673_v63  ;;  %vm4567_vm2 = vcmp.ge.f32.partialorder %v10429_v8, %v9673_v63  ;;  %vm4564_vm8 = vcmp.ge.f32.partialorder %v9518_v51, %v9667_v43  ;;  %vm4565_vm12 = vcmp.ge.f32.partialorder %v9522_v44, %v9667_v43  ;;  %v10430_v43 = vld [vmem:[#allocation38_spill] sm:$0xff] }
 0x8aa   : > { %4623 = vmin.xlane.f32.xlu0 %v4622_v52  ;;  %v4655_v5 = vmin.f32 %v4610_v10, %v4611_v0  ;;  %v4652_v35 = vmin.f32 %v4608_v22, %v4609_v48  ;;  %v4598_v63 = vsel %vm4566_vm0, %v9835_v32, 256.0  ;;  %v4599_v53 = vsel %vm4567_vm2, %v9838_v46, 256.0 }
 0x8ab   : > { %5677 = vmatpush3.bf16.msra.mxu0 %v6569_v30  ;;  %5745 = vmatpush3.bf16.msra.mxu1 %v6569_v30  ;;  %v4596_v51 = vsel %vm4564_vm8, %v9835_v32, 256.0  ;;  %v4597_v44 = vsel %vm4565_vm12, %v9838_v46, 256.0  ;;  %vm4582_vm5 = vcmp.ge.f32.partialorder %v10430_v43, %v9722_v23  ;;  %vm4583_vm1 = vcmp.ge.f32.partialorder %v10431_v58, %v9722_v23 }
 0x8ac   : > { %5678 = vmatprep.subr.bf16.mxu0 %v6570_v2  ;;  %5738 = vmatprep.subr.bf16.mxu1 %v6570_v2  ;;  %vm4580_vm6 = vcmp.ge.f32.partialorder %v9612_v27, %v9716_v1  ;;  %vm4581_vm3 = vcmp.ge.f32.partialorder %v10432_v15, %v9716_v1  ;;  %v4637_v54 = vmin.f32 %v4598_v63, %v4599_v53  ;;  %v4614_v59 = vsel %vm4582_vm5, %v9835_v32, 256.0  ;;  %v6577_v1 = vld [vmem:[%s7356_s12 + $0x38] sm:$0xff]  }
 0x8ad   : > { %4650 = vmin.xlane.f32.xlu1 %v4649_v61  ;;  %v4634_v18 = vmin.f32 %v4596_v51, %v4597_v44  ;;  %v4615_v23 = vsel %vm4583_vm1, %v9838_v46, 256.0  ;;  %v4612_v27 = vsel %vm4580_vm6, %v9835_v32, 256.0  ;;  %v4613_v9 = vsel %vm4581_vm3, %v9838_v46, 256.0 }
 0x8ae   : > { %4647 = vmin.xlane.f32.xlu0 %v4646_v12  ;;  %v4661_v45 = vmin.f32 %v4614_v59, %v4615_v23  ;;  %v4658_v41 = vmin.f32 %v4612_v27, %v4613_v9  ;;  %v6905_v16 = vmov 1.0|1.0  }
 0x8af   : > { %5679 = vmatpush3.bf16.msra.mxu0 %v6571_v11  ;;  %5746 = vmatpush3.bf16.msra.mxu1 %v6571_v11 }
 0x8b0   : > { %5680 = vmatprep.subr.bf16.mxu0 %v6572_v14  ;;  %5739 = vmatprep.subr.bf16.mxu1 %v6572_v14 }
 0x8b1   : > { %4632 = vmin.xlane.f32.xlu1 %v4631_v7 }
 0x8b2   : > { %4629 = vmin.xlane.f32.xlu0 %v4628_v49 }
 0x8b3   : > { %5681 = vmatpush3.bf16.msra.mxu0 %v6573_v24  ;;  %5747 = vmatpush3.bf16.msra.mxu1 %v6573_v24 }
 0x8b4   : > { %5682 = vmatprep.subr.bf16.mxu0 %v6574_v40  ;;  %5740 = vmatprep.subr.bf16.mxu1 %v6574_v40 }
 0x8b5   : > { %4656 = vmin.xlane.f32.xlu1 %v4655_v5 }
 0x8b6   : > { %4653 = vmin.xlane.f32.xlu0 %v4652_v35 }
 0x8b7   : > { %5683 = vmatpush3.bf16.msra.mxu0 %v6575_v42  ;;  %5748 = vmatpush3.bf16.msra.mxu1 %v6575_v42 }
 0x8b8   : > { %5684 = vmatprep.subr.bf16.mxu0 %v6576_v13  ;;  %5741 = vmatprep.subr.bf16.mxu1 %v6576_v13 }
 0x8b9   : > { %4638 = vmin.xlane.f32.xlu1 %v4637_v54 }
 0x8ba   : > { %4635 = vmin.xlane.f32.xlu0 %v4634_v18 }
 0x8bb   : > { %5685 = vmatpush3.bf16.msra.mxu0 %v6577_v1  ;;  %5749 = vmatpush3.bf16.msra.mxu1 %v6577_v1 }
 0x8bd   : > { %4662 = vmin.xlane.f32.xlu1 %v4661_v45 }
 0x8be   : > { %4659 = vmin.xlane.f32.xlu0 %v4658_v41 }
 0x92d   : > { %v4642_v39 = vpop.xlane.xlu1 %4641 }
 0x92e   : > { %vm4680_vm10 = vcmp.eq.f32.partialorder %v9835_v32, %v4642_v39  ;;  %vm4681_vm8 = vcmp.eq.f32.partialorder %v9838_v46, %v4642_v39 }
 0x92f   : > { %v4618_v38 = vpop.xlane.xlu0 %4617 }
 0x930   : > { %vm4664_vm14 = vcmp.eq.f32.partialorder %v9835_v32, %v4618_v38  ;;  %vm4665_vm0 = vcmp.eq.f32.partialorder %v9838_v46, %v4618_v38 }
 0x932   : > { %v4645_v57 = vpop.xlane.xlu1 %4644 }
 0x933   : > { %v4621_v34 = vpop.xlane.xlu0 %4620  ;;  %vm4682_vm13 = vcmp.eq.f32.partialorder %v9835_v32, %v4645_v57  ;;  %vm4683_vm11 = vcmp.eq.f32.partialorder %v9838_v46, %v4645_v57 }
 0x934   : > { %vm4666_vm7 = vcmp.eq.f32.partialorder %v9835_v32, %v4621_v34  ;;  %vm4667_vm9 = vcmp.eq.f32.partialorder %v9838_v46, %v4621_v34  ;;  %vm9957_vm4 = vmpackc.low %vm4682_vm13, %vm4680_vm10 }
 0x935   : > { %vm5497_vm15 = vmpackc.low %vm4666_vm7, %vm4664_vm14 }
 0x936   : > { %vm5495_vm2 = vmpackc.low %vm4667_vm9, %vm4665_vm0  ;;  %v4627_v36 = vpop.xlane.xlu1 %4626 }
 0x937   : > { %v4624_v55 = vpop.xlane.xlu0 %4623  ;;  %5496 = vmatprep.mubr.msk.bf16.mxu0 %vm5495_vm2, %v6905_v16  ;;  %vm5511_vm12 = vmpackc.low %vm4683_vm11, %vm4681_vm8  ;;  %vm4671_vm5 = vcmp.eq.f32.partialorder %v9838_v46, %v4627_v36  ;;  %vm4670_vm9 = vcmp.eq.f32.partialorder %v9835_v32, %v4627_v36 }
 0x938   : > { %vm4669_vm1 = vcmp.eq.f32.partialorder %v9838_v46, %v4624_v55  ;;  %5512 = vmatprep.mubr.msk.bf16.mxu1 %vm5511_vm12, %v6905_v16  ;;  %5498 = vmatmul.mubr.msk.bf16.vlgmr.msra.gmra.mrb[0].mxu0 %vm5497_vm15, %v6905_v16  ;;  %vm4668_vm14 = vcmp.eq.f32.partialorder %v9835_v32, %v4624_v55 }
 0x939   : > { %vm5499_vm6 = vmpackc.low %vm4671_vm5, %vm4669_vm1  ;;  %5514 = vmatmul.mubr.msk.bf16.vlgmr.msra.gmra.mrb[0].mxu1 %vm9957_vm4, %v6905_v16 }
 0x93a   : > { %5500 = vmatprep.mubr.msk.bf16.mxu0 %vm5499_vm6, %v6905_v16  ;;  %v4651_v29 = vpop.xlane.xlu1 %4650  ;;  %vm5501_vm15 = vmpackc.low %vm4670_vm9, %vm4668_vm14 }
 0x93b   : > { %v4648_v20 = vpop.xlane.xlu0 %4647  ;;  %vm4686_vm3 = vcmp.eq.f32.partialorder %v9835_v32, %v4651_v29  ;;  %vm4687_vm10 = vcmp.eq.f32.partialorder %v9838_v46, %v4651_v29 }
 0x93c   : > { %vm4684_vm13 = vcmp.eq.f32.partialorder %v9835_v32, %v4648_v20  ;;  %vm4685_vm7 = vcmp.eq.f32.partialorder %v9838_v46, %v4648_v20 }
 0x93d   : > { %vm5515_vm11 = vmpackc.low %vm4687_vm10, %vm4685_vm7 }
 0x93e   : > { %5516 = vmatprep.mubr.msk.bf16.mxu1 %vm5515_vm11, %v6905_v16  ;;  %vm5517_vm4 = vmpackc.low %vm4686_vm3, %vm4684_vm13  ;;  %v4633_v31 = vpop.xlane.xlu1 %4632 }
 0x93f   : > { %v4630_v56 = vpop.xlane.xlu0 %4629  ;;  %vm4675_vm0 = vcmp.eq.f32.partialorder %v9838_v46, %v4633_v31  ;;  %vm4674_vm3 = vcmp.eq.f32.partialorder %v9835_v32, %v4633_v31 }
 0x940   : > { %vm4673_vm2 = vcmp.eq.f32.partialorder %v9838_v46, %v4630_v56  ;;  %5502 = vmatmul.mubr.msk.bf16.gmra.mrb[4].mxu0 %vm5501_vm15, %v6905_v16  ;;  %vm4672_vm10 = vcmp.eq.f32.partialorder %v9835_v32, %v4630_v56 }
 0x941   : > { %vm5503_vm8 = vmpackc.low %vm4675_vm0, %vm4673_vm2  ;;  %5518 = vmatmul.mubr.msk.bf16.gmra.mrb[4].mxu1 %vm5517_vm4, %v6905_v16 }
 0x942   : > { %5504 = vmatprep.mubr.msk.bf16.mxu0 %vm5503_vm8, %v6905_v16  ;;  %v4657_v33 = vpop.xlane.xlu1 %4656  ;;  %vm5505_vm9 = vmpackc.low %vm4674_vm3, %vm4672_vm10 }
 0x943   : > { %v4654_v17 = vpop.xlane.xlu0 %4653  ;;  %vm4690_vm12 = vcmp.eq.f32.partialorder %v9835_v32, %v4657_v33  ;;  %vm4691_vm5 = vcmp.eq.f32.partialorder %v9838_v46, %v4657_v33 }
 0x944   : > { %vm4688_vm1 = vcmp.eq.f32.partialorder %v9835_v32, %v4654_v17  ;;  %vm4689_vm6 = vcmp.eq.f32.partialorder %v9838_v46, %v4654_v17 }
 0x945   : > { %vm5519_vm13 = vmpackc.low %vm4691_vm5, %vm4689_vm6 }
 0x946   : > { %5520 = vmatprep.mubr.msk.bf16.mxu1 %vm5519_vm13, %v6905_v16  ;;  %vm5521_vm7 = vmpackc.low %vm4690_vm12, %vm4688_vm1  ;;  %v4639_v52 = vpop.xlane.xlu1 %4638 }
 0x947   : > { %v4636_v4 = vpop.xlane.xlu0 %4635  ;;  %vm4679_vm14 = vcmp.eq.f32.partialorder %v9838_v46, %v4639_v52  ;;  %vm4678_vm12 = vcmp.eq.f32.partialorder %v9835_v32, %v4639_v52 }
 0x948   : > { %vm4677_vm11 = vcmp.eq.f32.partialorder %v9838_v46, %v4636_v4  ;;  %5506 = vmatmul.mubr.msk.bf16.gmra.mrb[8].mxu0 %vm5505_vm9, %v6905_v16  ;;  %vm4676_vm5 = vcmp.eq.f32.partialorder %v9835_v32, %v4636_v4 }
 0x949   : > { %vm5507_vm4 = vmpackc.low %vm4679_vm14, %vm4677_vm11  ;;  %5522 = vmatmul.mubr.msk.bf16.gmra.mrb[8].mxu1 %vm5521_vm7, %v6905_v16 }
 0x94a   : > { %5508 = vmatprep.mubr.msk.bf16.mxu0 %vm5507_vm4, %v6905_v16  ;;  %v4663_v26 = vpop.xlane.xlu1 %4662  ;;  %vm5509_vm3 = vmpackc.low %vm4678_vm12, %vm4676_vm5 }
 0x94b   : > { %v4660_v6 = vpop.xlane.xlu0 %4659  ;;  %vm4694_vm15 = vcmp.eq.f32.partialorder %v9835_v32, %v4663_v26  ;;  %vm4695_vm0 = vcmp.eq.f32.partialorder %v9838_v46, %v4663_v26 }
 0x94c   : > { %vm4692_vm2 = vcmp.eq.f32.partialorder %v9835_v32, %v4660_v6  ;;  %vm4693_vm8 = vcmp.eq.f32.partialorder %v9838_v46, %v4660_v6 }
 0x94d   : > { %vm5523_vm1 = vmpackc.low %vm4695_vm0, %vm4693_vm8 }
 0x94e   : > { %5524 = vmatprep.mubr.msk.bf16.mxu1 %vm5523_vm1, %v6905_v16  ;;  %vm5525_vm6 = vmpackc.low %vm4694_vm15, %vm4692_vm2 }
 0x950   : > { %5510 = vmatmul.mubr.msk.bf16.gmra.mrb[12].mxu0 %vm5509_vm3, %v6905_v16 }
 0x951   : > { %5526 = vmatmul.mubr.msk.bf16.gmra.mrb[12].mxu1 %vm5525_vm6, %v6905_v16 }
 0xa0b   : > { %v5686_v25 = vpop.f32.mrb[0].mxu0 }
 0xa0c   : > { %v5710_v50 = vpop.f32.mrb[0].mxu1  ;;  %v5687_v30 = vpop.f32.mrb[1].mxu0 }
 0xa0d   : > { %v5688_v2 = vadd.f32 %v5687_v30, %v5686_v25  ;;  %v5711_v61 = vpop.f32.mrb[1].mxu1  ;;  %v5689_v12 = vpop.f32.mrb[2].mxu0 }
 0xa0e   : > { %v5712_v46 = vadd.f32 %v5711_v61, %v5710_v50  ;;  %v5713_v19 = vpop.f32.mrb[2].mxu1  ;;  %v5690_v28 = vpop.f32.mrb[3].mxu0 }
 0xa0f   : > { %5001 = vst [vmem:[#allocation2] sm:$0xff] %v5688_v2  ;;  %v5691_v32 = vadd.f32 %v5690_v28, %v5689_v12  ;;  %v5714_v62 = vpop.f32.mrb[3].mxu1 }
 0xa10   : > { %5009 = vst [vmem:[#allocation2 + $0x40] sm:$0xff] %v5712_v46  ;;  %v5715_v47 = vadd.f32 %v5714_v62, %v5713_v19 }
 0xa11   : > { %5002 = vst [vmem:[#allocation2 + $0x8] sm:$0xff] %v5691_v32 }
 0xa12   : > { %5010 = vst [vmem:[#allocation2 + $0x48] sm:$0xff] %v5715_v47 }
 0xa13   : > { %v5692_v21 = vpop.f32.mrb[4].mxu0 }
 0xa14   : > { %v5716_v3 = vpop.f32.mrb[4].mxu1  ;;  %v5693_v11 = vpop.f32.mrb[5].mxu0 }
 0xa15   : > { %v5694_v14 = vadd.f32 %v5693_v11, %v5692_v21  ;;  %v5717_v7 = vpop.f32.mrb[5].mxu1  ;;  %v5695_v49 = vpop.f32.mrb[6].mxu0 }
 0xa16   : > { %v5718_v10 = vadd.f32 %v5717_v7, %v5716_v3  ;;  %v5719_v0 = vpop.f32.mrb[6].mxu1  ;;  %v5696_v22 = vpop.f32.mrb[7].mxu0 }
 0xa17   : > { %5003 = vst [vmem:[#allocation2 + $0x10] sm:$0xff] %v5694_v14  ;;  %v5697_v48 = vadd.f32 %v5696_v22, %v5695_v49  ;;  %v5720_v60 = vpop.f32.mrb[7].mxu1 }
 0xa18   : > { %5011 = vst [vmem:[#allocation2 + $0x50] sm:$0xff] %v5718_v10  ;;  %v5721_v8 = vadd.f32 %v5720_v60, %v5719_v0 }
 0xa19   : > { %5004 = vst [vmem:[#allocation2 + $0x18] sm:$0xff] %v5697_v48 }
 0xa1a   : > { %5012 = vst [vmem:[#allocation2 + $0x58] sm:$0xff] %v5721_v8 }
 0xa1b   : > { %v5698_v24 = vpop.f32.mrb[8].mxu0 }
 0xa1c   : > { %v5722_v40 = vpop.f32.mrb[8].mxu1  ;;  %v5699_v5 = vpop.f32.mrb[9].mxu0 }
 0xa1d   : > { %v5700_v35 = vadd.f32 %v5699_v5, %v5698_v24  ;;  %v5723_v63 = vpop.f32.mrb[9].mxu1  ;;  %v5701_v53 = vpop.f32.mrb[10].mxu0 }
 0xa1e   : > { %v5724_v51 = vadd.f32 %v5723_v63, %v5722_v40  ;;  %v5725_v44 = vpop.f32.mrb[10].mxu1  ;;  %v5702_v43 = vpop.f32.mrb[11].mxu0 }
 0xa1f   : > { %5005 = vst [vmem:[#allocation2 + $0x20] sm:$0xff] %v5700_v35  ;;  %v5703_v58 = vadd.f32 %v5702_v43, %v5701_v53  ;;  %v5726_v15 = vpop.f32.mrb[11].mxu1 }
 0xa20   : > { %5013 = vst [vmem:[#allocation2 + $0x60] sm:$0xff] %v5724_v51  ;;  %v5727_v42 = vadd.f32 %v5726_v15, %v5725_v44 }
 0xa21   : > { %5006 = vst [vmem:[#allocation2 + $0x28] sm:$0xff] %v5703_v58 }
 0xa22   : > { %5014 = vst [vmem:[#allocation2 + $0x68] sm:$0xff] %v5727_v42 }
 0xa23   : > { %v5704_v13 = vpop.f32.mrb[12].mxu0 }
 0xa24   : > { %v5728_v54 = vpop.f32.mrb[12].mxu1  ;;  %v5705_v18 = vpop.f32.mrb[13].mxu0 }
 0xa25   : > { %v5706_v59 = vadd.f32 %v5705_v18, %v5704_v13  ;;  %v5729_v23 = vpop.f32.mrb[13].mxu1  ;;  %v5707_v27 = vpop.f32.mrb[14].mxu0 }
 0xa26   : > { %v5730_v9 = vadd.f32 %v5729_v23, %v5728_v54  ;;  %v5731_v1 = vpop.f32.mrb[14].mxu1  ;;  %v5708_v45 = vpop.f32.mrb[15].mxu0 }
 0xa27   : > { %5007 = vst [vmem:[#allocation2 + $0x30] sm:$0xff] %v5706_v59  ;;  %v5709_v41 = vadd.f32 %v5708_v45, %v5707_v27  ;;  %v5732_v39 = vpop.f32.mrb[15].mxu1 }
 0xa28   : > { %5015 = vst [vmem:[#allocation2 + $0x70] sm:$0xff] %v5730_v9  ;;  %v5733_v38 = vadd.f32 %v5732_v39, %v5731_v1 }
 0xa29   : > { %5008 = vst [vmem:[#allocation2 + $0x38] sm:$0xff] %v5709_v41 }
 0xa2a   : > { %5016 = vst [vmem:[#allocation2 + $0x78] sm:$0xff] %v5733_v38 }
 0xa2b PF: > { %s10435_s22 = sld [smem:[#allocation34_spill]]  ;;  %s10436_s27 = sld [smem:[#allocation32_spill]] }
 0xa2c   : > { %s5541_s14 = sshll.u32 %s6878_s28, 12  ;;  %s10437_s17 = sld [smem:[#allocation67_spill]] }
 0xa2d   : > { %s5037_s4 = sshll.u32 %s7358_s19, 4  ;;  %s6906_s26 = smov [#allocation12]   ;;  %s10013_s4 = int_to_ptr.vmem [resolvable:$true] %s5037_s4 }
 0xa2e   : > { %s6728_s24 = scalar_lea.vmem %s10013_s4, 4096  ;;  %s6732_s29 = sshll.u32 %s6906_s26, 4  ;;  %s6733_s29 = int_to_ptr.vmem [resolvable:$false] %s6732_s29 }
 0xa2f   : > { %p6729_p10 = scmp.ne.s32.totalorder %s10013_s4, %s6728_s24  ;;  %s6734_s16 = scalar_lea.vmem %s6733_s29, 8192 }
 0xa30   : > { %p6735_p11 = scmp.lt.s32.totalorder %s10013_s4, %s6733_s29  ;;  %p6736_p1 = scmp.lt.s32.totalorder %s6734_s16, %s6728_s24 }
 0xa31   : > { %s5018_s8 = scalar_lea.sflag [#allocation5], %s10435_s22  ;;  %p10438_p12 = scmp.ne.s32.totalorder %s10436_s27, 0 }
 0xa32   : > { %s10010_s1 = scalar_lea.hbm %s10437_s17, %s5541_s14  ;;  %p6737_p2 = por %p6736_p1, %p6735_p11 }
 0xa33   : > { %p6730_p7 = pnand %p6729_p10, %p10438_p12 }
 0xa35   : > { %p6731_p8 = pneg %p6730_p7 }
 0xa37   : > { %p6738_p5 = pnand %p6737_p2, %p6731_p8 }
 0xa39   : > { %6741 = shalt.err (!%p6738_p5)
}
 0xa3a   : > { %s6742_s15 = scalar_lea.hbm %s10010_s1, 4096  ;;  %s6746_s23 = scalar_lea.hbm %s10437_s17, 8192 }
 0xa3b   : > { %p6743_p0 = scmp.ne.s32.totalorder %s10010_s1, %s6742_s15  ;;  %p6747_p6 = scmp.lt.u32.totalorder %s10010_s1, %s10437_s17 }
 0xa3c   : > { %p6748_p9 = scmp.lt.u32.totalorder %s6746_s23, %s6742_s15  ;;  %p6750_p10 = scmp.lt.u32.totalorder %s6742_s15, %s10010_s1 }
 0xa3d   : > { %p6744_p4 = pnand %p6743_p0, %p10438_p12 }
 0xa3e   : > { %p6749_p3 = por %p6748_p9, %p6747_p6 }
 0xa3f   : > { %p6745_p13 = pneg %p6744_p4 }
 0xa40   : > { %p6751_p7 = por %p6750_p10, %p6749_p3 }
 0xa42   : > { %p6752_p8 = pnand %p6751_p7, %p6745_p13 }
 0xa44   : > { %6755 = shalt.err (!%p6752_p8)
}
 0xa45   : > { %s6907_s3 = smov 256   ;;  %s6908_s6 = smov 16  }
 0xa46   : > { %5760 = dma.vmem_to_hbm [thread:$0]  (%p10438_p12), %s10013_s4, 4096, %s10010_s1, %s5018_s8, %s6907_s3, %s6907_s3, %s6908_s6  }
 0xa47   : > { %s5532_s10 = sshll.u32 %s6878_s28, 7  ;;  %s5053_s25 = sshll.u32 %s7360_s21, 4  ;;  %s5054_s25 = int_to_ptr.vmem [resolvable:$true] %s5053_s25 }
 0xa48   : > { %s10439_s30 = sld [smem:[#allocation68_spill]]  ;;  %s5023_s11 = scalar_lea.sflag [#allocation14], %s10435_s22 }
 0xa49   : > { %s6756_s14 = scalar_lea.vmem %s5054_s25, 128  ;;  %s6909_s5 = smov [#allocation13]  }
 0xa4a   : > { %p6757_p11 = scmp.ne.s32.totalorder %s5054_s25, %s6756_s14  ;;  %s6760_s18 = sshll.u32 %s6909_s5, 4  ;;  %s6761_s18 = int_to_ptr.vmem [resolvable:$false] %s6760_s18 }
 0xa4b   : > { %s6762_s24 = scalar_lea.vmem %s6761_s18, 256  ;;  %p6763_p5 = scmp.lt.s32.totalorder %s5054_s25, %s6761_s18 }
 0xa4c   : > { %p6758_p1 = pnand %p6757_p11, %p10438_p12  ;;  %p6764_p0 = scmp.lt.s32.totalorder %s6762_s24, %s6756_s14 }
 0xa4e   : > { %s10440_s2 = smov %s10439_s30  ;;  %s10044_s9 = scalar_lea.hbm %s10439_s30, %s5532_s10 }
 0xa4f   : > { %p6759_p2 = pneg %p6758_p1  ;;  %p6765_p4 = por %p6764_p0, %p6763_p5 }
 0xa51   : > { %p6766_p13 = pnand %p6765_p4, %p6759_p2 }
 0xa53   : > { %6769 = shalt.err (!%p6766_p13)
}
 0xa54   : > { %s6770_s28 = scalar_lea.hbm %s10044_s9, 128  ;;  %s6774_s1 = scalar_lea.hbm %s10440_s2, 256 }
 0xa55   : > { %p6771_p6 = scmp.ne.s32.totalorder %s10044_s9, %s6770_s28  ;;  %p6775_p10 = scmp.lt.u32.totalorder %s10044_s9, %s10440_s2 }
 0xa56   : > { %p6776_p7 = scmp.lt.u32.totalorder %s6774_s1, %s6770_s28  ;;  %p6778_p11 = scmp.lt.u32.totalorder %s6770_s28, %s10044_s9 }
 0xa57   : > { %p6772_p9 = pnand %p6771_p6, %p10438_p12 }
 0xa58   : > { %p6777_p8 = por %p6776_p7, %p6775_p10 }
 0xa59   : > { %p6773_p3 = pneg %p6772_p9 }
 0xa5a   : > { %p6779_p1 = por %p6778_p11, %p6777_p8 }
 0xa5c   : > { %p6780_p2 = pnand %p6779_p1, %p6773_p3 }
 0xa5e   : > { %6783 = shalt.err (!%p6780_p2)
}
 0xa5f   : > { %5761 = dma.vmem_to_hbm [thread:$0]  (%p10438_p12), %s5054_s25, 128, %s10044_s9, %s5023_s11  }
 0xa60 PF: > { %s10441_s26 = sld [smem:[#allocation27_spill]]  ;;  %s10442_s29 = sld [smem:[#allocation20_spill]] }
 0xa61   : > { %s10443_s16 = sld [smem:[#allocation33_spill]] }
 0xa66   : > { %p5788_p5 = scmp.ge.s32.totalorder %s10441_s26, 2  ;;  %s5065_s15 = sand.u32 1, %s10442_s29  }
 0xa67   : > { %p10444_p0 = scmp.ne.s32.totalorder %s10443_s16, 0  ;;  %s5066_s0 = scalar_lea.sflag [#allocation5], %s5065_s15 }
 0xa69   : > { %p5781_p4 = pnand %p5788_p5, %p10444_p0 }
 0xa6b   : > { %6841 = dma.done.wait (!%p5781_p4), %s5066_s0, 4096  }
 0xa6c   : > { %6843 = vsyncadd (!%p5781_p4), %s5066_s0, 4294963200  ;;  %s5075_s7 = scalar_lea.sflag [#allocation14], %s5065_s15 }
 0xa6d   : > { %6845 = dma.done.wait (!%p5781_p4), %s5075_s7, 128  }
 0xa6e   : > { %6847 = vsyncadd (!%p5781_p4), %s5075_s7, 4294967168  ;;  %s38_s13 = sadd.s32 1, %s10441_s26   ;;  %s10445_s21 = sld [smem:[#allocation21_spill]] }
 0xa6f   : > { %p35_p13 = scmp.ge.s32.totalorder %s38_s13, 6   ;;  %s10446_s22 = sld [smem:[#allocation22_spill]] }
 0xa70   : > { %s10447_s23 = sld [smem:[#allocation31_spill]]  ;;  %s10448_s24 = sld [smem:[#allocation23_spill]] }
 0xa71   : > { %s10449_s25 = sld [smem:[#allocation24_spill]]  ;;  %s10450_s26 = sld [smem:[#allocation30_spill]] }
 0xa72   : > { %s10451_s27 = sld [smem:[#allocation25_spill]]  ;;  %s10452_s28 = sld [smem:[#allocation26_spill]] }
 0xa73   : > { %s10453_s29 = sld [smem:[#allocation28_spill]]  ;;  %s10454_s30 = sld [smem:[#allocation29_spill]] }
 0xa74   :  { %37 = sbr.rel (!%p35_p13) target bundleno = 29 (0x1d), region = 204 }
 0xa7b   :  { %5080 = vsyncpa [#allocation4], 1 }
 0xa7c   :  { %5082 = vsyncpa [#allocation4 + $0x1], 1 }
 0xa7d   :  { %5083 = vsyncpa [#allocation7], 1 }
 0xa7e   :  { %5085 = vsyncpa [#allocation7 + $0x1], 1 }
 0xa7f   :  { %5086 = vsyncpa [#allocation10], 1 }
 0xa80   :  { %5088 = vsyncpa [#allocation10 + $0x1], 1 }
 0xa81   :  { %5089 = vsyncpa [#allocation5], 1 }
 0xa82   :  { %5091 = vsyncpa [#allocation5 + $0x1], 1 }
 0xa83   :  { %5092 = vsyncpa [#allocation14], 1 }
 0xa84   :  { %5094 = vsyncpa [#allocation14 + $0x1], 1 }

</bundles_post_ra>
